<compile_context>
chip_gen: v7x
topology: tpu7x:2x2x1
jax: 0.10.0
libtpu: 0.0.40
codegen_flags: <defaults>
</compile_context>

<pallas_src>
import functools

import jax
import jax.numpy as jnp
import numpy as np
from jax.experimental import pallas as pl
from jax.experimental.pallas import tpu as pltpu


# ----------------------------- math helpers ---------------------------------------
def _softplus(x):
    return jnp.log1p(jnp.exp(-jnp.abs(x))) + jnp.maximum(x, 0.0)


def _mish_ref(x):
    # reference / wrapper-side mish (standard formulation)
    return x * jnp.tanh(_softplus(x))


def _mish_fast(x):
    # mish(x) = x * tanh(softplus(x)) = x * (p^2 - 1) / (p^2 + 1),  p = 1 + e^x
    # (for x > 20 mish(x) == x to f32 precision; the clamp keeps p^2 finite)
    p = 1.0 + jnp.exp(jnp.minimum(x, 20.0))
    p2 = p * p
    return x * (p2 - 1.0) / (p2 + 1.0)


# ----------------------------------- kernel ---------------------------------------
def _cond_resblock_kernel(
    x_ref, film_ref, tidx_ref, bmat_rb_ref, bmat_br_ref,
    gmat_gc2_ref, gmat_cg2_ref,
    w1_ref, b1_ref, g1_ref, be1_ref,
    w2_ref, b2_ref, g2_ref, be2_ref,
    wr_ref, br_ref,
    out_ref,
    *, T, K, C_out, G, cond_predict_scale, inv_group_elems, eps=1e-5,
):
    f32 = jnp.float32
    pad = K // 2
    cdt = w1_ref.dtype                       # matmul operand dtype (f32 or bf16)

    tidx = tidx_ref[...]                     # (1, rows) int32 time index per lane
    bmat_rb = bmat_rb_ref[...]               # (rows, BB) one-hot row -> local sample
    bmat_br = bmat_br_ref[...]               # (BB, rows) one-hot local sample -> row
    gmat_gc2 = gmat_gc2_ref[...]             # (2G, 2C) blockdiag(group<-chan, x2)
    gmat_cg2 = gmat_cg2_ref[...]             # (2C, 2G) blockdiag(chan<-group, x2)

    # Hoisted per-tap time-validity masks, shared by both convolutions.
    masks = {}
    for k in range(K):
        s = pad - k
        if s != 0 and s not in masks:
            masks[s] = (tidx >= s) & (tidx < T + s)          # (1, rows)

    def shifted(v, s):
        # v_shifted[:, r] = v[:, r - s] within each sample's T lanes, zero at the
        # pad (lane-roll wrap / cross-sample lanes are exactly the masked lanes).
        if s == 0:
            return v
        return jnp.where(masks[s], jnp.roll(v, s, axis=1), jnp.zeros((), v.dtype))

    def conv_knt(h_c, w_ref, b_ref):
        # K-tap 'same' temporal conv as K (C_out, C) @ (C, rows) MXU matmuls,
        # f32 accumulation.
        acc = jnp.zeros((C_out, h_c.shape[1]), f32)
        for k in range(K):
            acc = acc + jnp.dot(w_ref[k], shifted(h_c, pad - k),
                                preferred_element_type=f32)
        return acc + b_ref[...].astype(f32)

    def group_norm(h, gamma, beta):
        # One-pass per-(sample, group) statistics over (C//G channels x T steps);
        # sums and broadcasts use 4 MXU dots total (reduce, group-sum,
        # group-broadcast, row-broadcast).  Stats operands stay f32.
        # TODO(synk): consider Precision.HIGHEST on these dots at production widths.
        hh = jnp.concatenate([h, h * h], axis=0)                          # (2C, rows)
        s_cb = jnp.dot(hh, bmat_rb, preferred_element_type=f32)           # (2C, BB)
        s_gb = jnp.dot(gmat_gc2, s_cb,
                       preferred_element_type=f32) * inv_group_elems      # (2G, BB)
        mean_gb = s_gb[:G]
        var_gb = jnp.maximum(s_gb[G:] - mean_gb * mean_gb, 0.0)
        rstd_gb = jax.lax.rsqrt(var_gb + eps)
        st_gb = jnp.concatenate([mean_gb, rstd_gb], axis=0)               # (2G, BB)
        st_cb = jnp.dot(gmat_cg2, st_gb, preferred_element_type=f32)      # (2C, BB)
        st = jnp.dot(st_cb, bmat_br, preferred_element_type=f32)          # (2C, rows)
        return (h - st[:C_out]) * st[C_out:] * gamma + beta

    x_c = x_ref[...]                                                      # (C_in, rows)

    # ---- Conv1dBlock #1: conv -> GroupNorm -> Mish --------------------------------
    h = conv_knt(x_c, w1_ref, b1_ref)
    h = _mish_fast(group_norm(h, g1_ref[...].astype(f32), be1_ref[...].astype(f32)))

    # ---- FiLM conditioning (pre-broadcast (C_film, rows) from the wrapper) --------
    film = film_ref[...].astype(f32)
    if cond_predict_scale:
        h = film[:C_out] * h + film[C_out:]
    else:
        h = h + film

    # ---- Conv1dBlock #2 ------------------------------------------------------------
    h2 = conv_knt(h.astype(cdt), w2_ref, b2_ref)
    h2 = _mish_fast(group_norm(h2, g2_ref[...].astype(f32), be2_ref[...].astype(f32)))

    # ---- residual 1x1 conv on the raw input ----------------------------------------
    # (PyTorch uses Identity when in_channels == out_channels; pass wr=I, br=0.)
    res = jnp.dot(wr_ref[...], x_c, preferred_element_type=f32) + br_ref[...].astype(f32)
    out_ref[...] = (h2 + res).astype(out_ref.dtype)


# ----------------------------------- wrapper ---------------------------------------
def _has_two_tensorcores():
    # v7x-class chips have 2 TensorCores per chip (want >=2 parallel grid steps);
    # v5e/v6e have 1 TC, where the grid is a serial loop (prefer the fewest steps).
    try:
        kind = jax.devices()[0].device_kind.lower().replace(" ", "")
        return ("v7" in kind) or ("7x" in kind)
    except Exception:
        return False


def _pick_block_batch(B, T, two_tc):
    """Samples per grid step: keep each block's lane extent (BB*T) a multiple of 128
    (unmasked stores), cap it at ~512 rows (good MXU fill, tiny in VMEM), and on
    two-TensorCore chips prefer an even number of grid steps so both cores work."""
    cands = [bb for bb in range(1, B + 1)
             if B % bb == 0 and (bb * T) % 128 == 0]
    if not cands:
        return B                                     # fallback: one full-batch step
    if two_tc:
        good = [bb for bb in cands if (B // bb) % 2 == 0 and bb * T <= 512]
        if good:
            return max(good)
    good = [bb for bb in cands if bb * T <= 512]
    return max(good) if good else min(cands)


def cond_residual_block_1d(x_nct, cond, params, *, n_groups, cond_predict_scale,
                           compute_dtype=jnp.bfloat16, out_dtype=jnp.float32):
    """x_nct: (B, C_in, T), cond: (B, cond_dim) -> (B, C_out, T)."""
    B, C_in, T = x_nct.shape
    K, _, C_out = params["w1"].shape
    G = n_groups
    assert C_out % G == 0
    Cg = C_out // G
    f32 = jnp.float32

    BB = _pick_block_batch(B, T, _has_two_tensorcores())
    rows = BB * T
    n_blocks = B // BB

    # Activations laid out (channels, batch*time): lane axis = rows (lane-dense),
    # sublane axis = channels (never blocked).  bf16 cast halves x's HBM traffic.
    x_flat = jnp.transpose(x_nct, (1, 0, 2)).reshape(C_in, B * T).astype(compute_dtype)

    # cond encoder (Mish -> Linear) hoisted to one batched matmul; FiLM scale/bias
    # are broadcast over each sample's T steps here so the kernel applies them
    # purely elementwise (no per-step broadcast dots; no dead scale operand when
    # cond_predict_scale=False).
    e = _mish_ref(cond.astype(f32)) @ params["wc"].astype(f32) + params["bc"].astype(f32)
    C_film = e.shape[1]                       # 2*C_out (scale|bias) or C_out (bias)
    film_rows = jnp.broadcast_to(e.T[:, :, None], (C_film, B, T)).reshape(C_film, B * T)

    # Per-block constants (identical for every grid step -> DMA'd once).
    tidx = jnp.tile(jnp.arange(T, dtype=jnp.int32), BB).reshape(1, rows)
    bmat_rb = (jnp.arange(rows, dtype=jnp.int32)[:, None] // T ==
               jnp.arange(BB, dtype=jnp.int32)[None, :]).astype(f32)       # (rows, BB)
    bmat_br = bmat_rb.T                                                     # (BB, rows)
    gmat_gc = (jnp.arange(C_out)[None, :] // Cg ==
               jnp.arange(G)[:, None]).astype(f32)                          # (G, C)
    zg = jnp.zeros_like(gmat_gc)
    gmat_gc2 = jnp.concatenate(
        [jnp.concatenate([gmat_gc, zg], axis=1),
         jnp.concatenate([zg, gmat_gc], axis=1)], axis=0)                   # (2G, 2C)
    gmat_cg2 = gmat_gc2.T                                                   # (2C, 2G)

    # Weights: (K, C_out, C) so each tap is a stationary (C_out, C) LHS for the MXU.
    w1_t = jnp.transpose(params["w1"], (0, 2, 1)).astype(compute_dtype)
    w2_t = jnp.transpose(params["w2"], (0, 2, 1)).astype(compute_dtype)
    wr_t = jnp.transpose(params["wr"]).astype(compute_dtype)
    b1 = params["b1"].reshape(C_out, 1).astype(f32)
    g1 = params["g1"].reshape(C_out, 1).astype(f32)
    be1 = params["be1"].reshape(C_out, 1).astype(f32)
    b2 = params["b2"].reshape(C_out, 1).astype(f32)
    g2 = params["g2"].reshape(C_out, 1).astype(f32)
    be2 = params["be2"].reshape(C_out, 1).astype(f32)
    br = params["br"].reshape(C_out, 1).astype(f32)

    const_args = (tidx, bmat_rb, bmat_br, gmat_gc2, gmat_cg2,
                  w1_t, b1, g1, be1, w2_t, b2, g2, be2, wr_t, br)

    kernel = functools.partial(
        _cond_resblock_kernel, T=T, K=K, C_out=C_out, G=G,
        cond_predict_scale=cond_predict_scale,
        inv_group_elems=1.0 / float(Cg * T))

    def _run(single_buffer_consts):
        def const_spec(a):
            idx = lambda i, nd=a.ndim: (0,) * nd
            if single_buffer_consts:
                # Constant index_map -> double-buffering buys nothing; single-buffer
                # weights/one-hots to halve their VMEM residency (v7x has 64 MiB).
                return pl.BlockSpec(a.shape, idx, pipeline_mode=pl.Buffered(1))
            return pl.BlockSpec(a.shape, idx)

        return pl.pallas_call(
            kernel,
            out_shape=jax.ShapeDtypeStruct((C_out, B * T), out_dtype),
            grid=(n_blocks,),
            in_specs=[pl.BlockSpec((C_in, rows), lambda i: (0, i)),
                      pl.BlockSpec((C_film, rows), lambda i: (0, i))]
                     + [const_spec(a) for a in const_args],
            out_specs=pl.BlockSpec((C_out, rows), lambda i: (0, i)),
            compiler_params=pltpu.CompilerParams(
                dimension_semantics=("parallel",),
                vmem_limit_bytes=64 * 1024 * 1024),
        )(x_flat, film_rows, *const_args)

    try:
        out_flat = _run(True)
    except Exception:
        # Fallback for JAX builds that reject pipeline_mode / Buffered(1).
        out_flat = _run(False)

    return jnp.transpose(out_flat.reshape(C_out, B, T), (1, 0, 2))          # NCT


# ------------------------------ pure-JAX reference ---------------------------------
def reference_forward(x_nct, cond, params, n_groups, cond_predict_scale):
    B, C_in, T = x_nct.shape
    K, _, C_out = params["w1"].shape
    pad = K // 2
    x = jnp.transpose(x_nct, (0, 2, 1)).astype(jnp.float32)

    def conv_block(h_in, w, b, gamma, beta):
        hp = jnp.pad(h_in, ((0, 0), (pad, pad), (0, 0)))
        h = sum(jnp.einsum("btc,co->bto", hp[:, k:k + T, :], w[k]) for k in range(K)) + b
        Bh, Th, Ch = h.shape
        hg = h.reshape(Bh, Th, n_groups, Ch // n_groups)
        mean = hg.mean(axis=(1, 3), keepdims=True)
        var = hg.var(axis=(1, 3), keepdims=True)
        hg = (hg - mean) / jnp.sqrt(var + 1e-5)
        h = hg.reshape(Bh, Th, Ch) * gamma + beta
        return _mish_ref(h)

    h = conv_block(x, params["w1"], params["b1"], params["g1"], params["be1"])
    e = _mish_ref(cond.astype(jnp.float32)) @ params["wc"] + params["bc"]
    if cond_predict_scale:
        h = e[:, None, :C_out] * h + e[:, None, C_out:]
    else:
        h = h + e[:, None, :]
    h = conv_block(h, params["w2"], params["b2"], params["g2"], params["be2"])
    res = x @ params["wr"] + params["br"]
    return jnp.transpose(h + res, (0, 2, 1))


# --------------------------------------- main --------------------------------------
if __name__ == "__main__":
    B, C_in, C_out, T, cond_dim, K, G = 16, 4, 16, 16, 8, 3, 8
    cond_predict_scale = True
    cond_channels = 2 * C_out if cond_predict_scale else C_out

    key = jax.random.PRNGKey(0)
    ks = jax.random.split(key, 14)
    # Parameter layouts (torch shapes noted):
    #   conv weight torch (C_out, C_in, K)          -> here (K, C_in, C_out)
    #   linear weight torch (cond_channels, cond_d) -> here (cond_dim, cond_channels)
    #   residual 1x1 conv torch (C_out, C_in, 1)    -> here (C_in, C_out)
    params = {
        "w1": 0.3 * jax.random.normal(ks[0], (K, C_in, C_out), jnp.float32),
        "b1": 0.1 * jax.random.normal(ks[1], (1, C_out), jnp.float32),
        "g1": 1.0 + 0.1 * jax.random.normal(ks[2], (1, C_out), jnp.float32),
        "be1": 0.1 * jax.random.normal(ks[3], (1, C_out), jnp.float32),
        "w2": 0.3 * jax.random.normal(ks[4], (K, C_out, C_out), jnp.float32),
        "b2": 0.1 * jax.random.normal(ks[5], (1, C_out), jnp.float32),
        "g2": 1.0 + 0.1 * jax.random.normal(ks[6], (1, C_out), jnp.float32),
        "be2": 0.1 * jax.random.normal(ks[7], (1, C_out), jnp.float32),
        "wc": 0.3 * jax.random.normal(ks[8], (cond_dim, cond_channels), jnp.float32),
        "bc": 0.1 * jax.random.normal(ks[9], (1, cond_channels), jnp.float32),
        "wr": 0.3 * jax.random.normal(ks[10], (C_in, C_out), jnp.float32),
        "br": 0.1 * jax.random.normal(ks[11], (1, C_out), jnp.float32),
    }
    x = jax.random.normal(ks[12], (B, C_in, T), jnp.float32)      # [batch, in_channels, horizon]
    cond = jax.random.normal(ks[13], (B, cond_dim), jnp.float32)  # [batch, cond_dim]

    ref = reference_forward(x, cond, params, G, cond_predict_scale)

    # f32 compute path: tight agreement with the f32 reference.
    out = cond_residual_block_1d(x, cond, params, n_groups=G,
                                 cond_predict_scale=cond_predict_scale,
                                 compute_dtype=jnp.float32)
    out = jax.block_until_ready(out)
    assert out.shape == (B, C_out, T)
    if not np.allclose(np.asarray(out), np.asarray(ref), atol=2e-4, rtol=2e-4):
        raise AssertionError("f32 Pallas kernel does not match reference")

    # Default bf16-MXU path (production default): loose smoke tolerance only.
    out_bf = cond_residual_block_1d(x, cond, params, n_groups=G,
                                    cond_predict_scale=cond_predict_scale)
    out_bf = jax.block_until_ready(out_bf)
    if not np.allclose(np.asarray(out_bf), np.asarray(ref), atol=2e-1, rtol=2e-1):
        raise AssertionError("bf16 Pallas kernel diverges beyond bf16 tolerance")

    # cond_predict_scale=False path (FiLM bias only; no dead scale operand DMA).
    params_nb = dict(params)
    params_nb["wc"] = params["wc"][:, :C_out]
    params_nb["bc"] = params["bc"][:, :C_out]
    ref_nb = reference_forward(x, cond, params_nb, G, False)
    out_nb = cond_residual_block_1d(x, cond, params_nb, n_groups=G,
                                    cond_predict_scale=False,
                                    compute_dtype=jnp.float32)
    out_nb = jax.block_until_ready(out_nb)
    if not np.allclose(np.asarray(out_nb), np.asarray(ref_nb), atol=2e-4, rtol=2e-4):
        raise AssertionError("cond_predict_scale=False path does not match reference")

    print("KERNEL_OK")
</pallas_src>

<mosaic_0001>
module attributes {stable_mosaic.version = 11 : i64} {
  func.func @_cond_resblock_kernel(%arg0: i32, %arg1: memref<4x256xf32, #tpu.memory_space<vmem>>, %arg2: memref<32x256xf32, #tpu.memory_space<vmem>>, %arg3: memref<1x256xi32, #tpu.memory_space<vmem>>, %arg4: memref<256x16xf32, #tpu.memory_space<vmem>>, %arg5: memref<16x256xf32, #tpu.memory_space<vmem>>, %arg6: memref<16x32xf32, #tpu.memory_space<vmem>>, %arg7: memref<32x16xf32, #tpu.memory_space<vmem>>, %arg8: memref<3x16x4xf32, #tpu.memory_space<vmem>>, %arg9: memref<16x1xf32, #tpu.memory_space<vmem>>, %arg10: memref<16x1xf32, #tpu.memory_space<vmem>>, %arg11: memref<16x1xf32, #tpu.memory_space<vmem>>, %arg12: memref<3x16x16xf32, #tpu.memory_space<vmem>>, %arg13: memref<16x1xf32, #tpu.memory_space<vmem>>, %arg14: memref<16x1xf32, #tpu.memory_space<vmem>>, %arg15: memref<16x1xf32, #tpu.memory_space<vmem>>, %arg16: memref<16x4xf32, #tpu.memory_space<vmem>>, %arg17: memref<16x1xf32, #tpu.memory_space<vmem>>, %arg18: memref<16x256xf32, #tpu.memory_space<vmem>>) attributes {dimension_semantics = [#tpu.dimension_semantics<parallel>], iteration_bounds = array<i64: 1>, scalar_prefetch = 0 : i64, scratch_operands = 0 : i64, tpu.core_type = #tpu.core_type<tc>, window_params = [{transform_indices = @transform_0, window_bounds = array<i64: 4, 256>}, {transform_indices = @transform_1, window_bounds = array<i64: 32, 256>}, {pipeline_mode = #tpu.pipeline_mode<synchronous>, transform_indices = @transform_2, window_bounds = array<i64: 1, 256>}, {pipeline_mode = #tpu.pipeline_mode<synchronous>, transform_indices = @transform_3, window_bounds = array<i64: 256, 16>}, {pipeline_mode = #tpu.pipeline_mode<synchronous>, transform_indices = @transform_4, window_bounds = array<i64: 16, 256>}, {pipeline_mode = #tpu.pipeline_mode<synchronous>, transform_indices = @transform_5, window_bounds = array<i64: 16, 32>}, {pipeline_mode = #tpu.pipeline_mode<synchronous>, transform_indices = @transform_6, window_bounds = array<i64: 32, 16>}, {pipeline_mode = #tpu.pipeline_mode<synchronous>, transform_indices = @transform_7, window_bounds = array<i64: 3, 16, 4>}, {pipeline_mode = #tpu.pipeline_mode<synchronous>, transform_indices = @transform_8, window_bounds = array<i64: 16, 1>}, {pipeline_mode = #tpu.pipeline_mode<synchronous>, transform_indices = @transform_9, window_bounds = array<i64: 16, 1>}, {pipeline_mode = #tpu.pipeline_mode<synchronous>, transform_indices = @transform_10, window_bounds = array<i64: 16, 1>}, {pipeline_mode = #tpu.pipeline_mode<synchronous>, transform_indices = @transform_11, window_bounds = array<i64: 3, 16, 16>}, {pipeline_mode = #tpu.pipeline_mode<synchronous>, transform_indices = @transform_12, window_bounds = array<i64: 16, 1>}, {pipeline_mode = #tpu.pipeline_mode<synchronous>, transform_indices = @transform_13, window_bounds = array<i64: 16, 1>}, {pipeline_mode = #tpu.pipeline_mode<synchronous>, transform_indices = @transform_14, window_bounds = array<i64: 16, 1>}, {pipeline_mode = #tpu.pipeline_mode<synchronous>, transform_indices = @transform_15, window_bounds = array<i64: 16, 4>}, {pipeline_mode = #tpu.pipeline_mode<synchronous>, transform_indices = @transform_16, window_bounds = array<i64: 16, 1>}, {transform_indices = @transform_17, window_bounds = array<i64: 16, 256>}]} {
    %c0 = arith.constant 0 : index
    %c0_0 = arith.constant 0 : index
    %0 = vector.load %arg3[%c0, %c0_0] : memref<1x256xi32, #tpu.memory_space<vmem>>, vector<1x256xi32>
    %c0_1 = arith.constant 0 : index
    %c0_2 = arith.constant 0 : index
    %1 = vector.load %arg4[%c0_1, %c0_2] : memref<256x16xf32, #tpu.memory_space<vmem>>, vector<256x16xf32>
    %c0_3 = arith.constant 0 : index
    %c0_4 = arith.constant 0 : index
    %2 = vector.load %arg5[%c0_3, %c0_4] : memref<16x256xf32, #tpu.memory_space<vmem>>, vector<16x256xf32>
    %c0_5 = arith.constant 0 : index
    %c0_6 = arith.constant 0 : index
    %3 = vector.load %arg6[%c0_5, %c0_6] : memref<16x32xf32, #tpu.memory_space<vmem>>, vector<16x32xf32>
    %c0_7 = arith.constant 0 : index
    %c0_8 = arith.constant 0 : index
    %4 = vector.load %arg7[%c0_7, %c0_8] : memref<32x16xf32, #tpu.memory_space<vmem>>, vector<32x16xf32>
    %c1_i32 = arith.constant 1 : i32
    %5 = vector.broadcast %c1_i32 : i32 to vector<1x256xi32>
    %6 = arith.cmpi sge, %0, %5 : vector<1x256xi32>
    %c17_i32 = arith.constant 17 : i32
    %7 = vector.broadcast %c17_i32 : i32 to vector<1x256xi32>
    %8 = arith.cmpi slt, %0, %7 : vector<1x256xi32>
    %9 = arith.andi %6, %8 : vector<1x256xi1>
    %c-1_i32 = arith.constant -1 : i32
    %10 = vector.broadcast %c-1_i32 : i32 to vector<1x256xi32>
    %11 = arith.cmpi sge, %0, %10 : vector<1x256xi32>
    %c15_i32 = arith.constant 15 : i32
    %12 = vector.broadcast %c15_i32 : i32 to vector<1x256xi32>
    %13 = arith.cmpi slt, %0, %12 : vector<1x256xi32>
    %14 = arith.andi %11, %13 : vector<1x256xi1>
    %c0_9 = arith.constant 0 : index
    %c0_10 = arith.constant 0 : index
    %15 = vector.load %arg1[%c0_9, %c0_10] : memref<4x256xf32, #tpu.memory_space<vmem>>, vector<4x256xf32>
    %cst = arith.constant 0.000000e+00 : f32
    %16 = vector.broadcast %cst : f32 to vector<16x256xf32>
    %c0_11 = arith.constant 0 : index
    %c0_12 = arith.constant 0 : index
    %c0_13 = arith.constant 0 : index
    %17 = vector.load %arg8[%c0_11, %c0_12, %c0_13] : memref<3x16x4xf32, #tpu.memory_space<vmem>>, vector<1x16x4xf32>
    %18 = vector.shape_cast %17 : vector<1x16x4xf32> to vector<16x4xf32>
    %19 = vector.extract_strided_slice %15 {offsets = [0, 255], sizes = [4, 1], strides = [1, 1]} : vector<4x256xf32> to vector<4x1xf32>
    %20 = vector.extract_strided_slice %15 {offsets = [0, 0], sizes = [4, 255], strides = [1, 1]} : vector<4x256xf32> to vector<4x255xf32>
    %21 = tpu.concatenate %19, %20 in 1 : vector<4x1xf32>, vector<4x255xf32> -> vector<4x256xf32>
    %cst_14 = arith.constant 0.000000e+00 : f32
    %22 = vector.shape_cast %9 : vector<1x256xi1> to vector<1x256xi1>
    %23 = vector.broadcast %22 : vector<1x256xi1> to vector<4x256xi1>
    %24 = vector.broadcast %cst_14 : f32 to vector<4x256xf32>
    %25 = arith.select %23, %21, %24 : vector<4x256xi1>, vector<4x256xf32>
    %cst_15 = arith.constant dense<0.000000e+00> : vector<16x256xf32>
    %26 = tpu.matmul %18, %25, %cst_15 {dimension_numbers = #tpu.dot_dimension_numbers<[1], [0], [0], [1], [0, 0, 1, 1], [], []>} : vector<16x4xf32>, vector<4x256xf32>, vector<16x256xf32> -> vector<16x256xf32>
    %27 = arith.addf %16, %26 : vector<16x256xf32>
    %c1 = arith.constant 1 : index
    %c0_16 = arith.constant 0 : index
    %c0_17 = arith.constant 0 : index
    %28 = vector.load %arg8[%c1, %c0_16, %c0_17] : memref<3x16x4xf32, #tpu.memory_space<vmem>>, vector<1x16x4xf32>
    %29 = vector.shape_cast %28 : vector<1x16x4xf32> to vector<16x4xf32>
    %cst_18 = arith.constant dense<0.000000e+00> : vector<16x256xf32>
    %30 = tpu.matmul %29, %15, %cst_18 {dimension_numbers = #tpu.dot_dimension_numbers<[1], [0], [0], [1], [0, 0, 1, 1], [], []>} : vector<16x4xf32>, vector<4x256xf32>, vector<16x256xf32> -> vector<16x256xf32>
    %31 = arith.addf %27, %30 : vector<16x256xf32>
    %c2 = arith.constant 2 : index
    %c0_19 = arith.constant 0 : index
    %c0_20 = arith.constant 0 : index
    %32 = vector.load %arg8[%c2, %c0_19, %c0_20] : memref<3x16x4xf32, #tpu.memory_space<vmem>>, vector<1x16x4xf32>
    %33 = vector.shape_cast %32 : vector<1x16x4xf32> to vector<16x4xf32>
    %34 = vector.extract_strided_slice %15 {offsets = [0, 1], sizes = [4, 255], strides = [1, 1]} : vector<4x256xf32> to vector<4x255xf32>
    %35 = vector.extract_strided_slice %15 {offsets = [0, 0], sizes = [4, 1], strides = [1, 1]} : vector<4x256xf32> to vector<4x1xf32>
    %36 = tpu.concatenate %34, %35 in 1 : vector<4x255xf32>, vector<4x1xf32> -> vector<4x256xf32>
    %cst_21 = arith.constant 0.000000e+00 : f32
    %37 = vector.shape_cast %14 : vector<1x256xi1> to vector<1x256xi1>
    %38 = vector.broadcast %37 : vector<1x256xi1> to vector<4x256xi1>
    %39 = vector.broadcast %cst_21 : f32 to vector<4x256xf32>
    %40 = arith.select %38, %36, %39 : vector<4x256xi1>, vector<4x256xf32>
    %cst_22 = arith.constant dense<0.000000e+00> : vector<16x256xf32>
    %41 = tpu.matmul %33, %40, %cst_22 {dimension_numbers = #tpu.dot_dimension_numbers<[1], [0], [0], [1], [0, 0, 1, 1], [], []>} : vector<16x4xf32>, vector<4x256xf32>, vector<16x256xf32> -> vector<16x256xf32>
    %42 = arith.addf %31, %41 : vector<16x256xf32>
    %c0_23 = arith.constant 0 : index
    %c0_24 = arith.constant 0 : index
    %43 = vector.load %arg9[%c0_23, %c0_24] : memref<16x1xf32, #tpu.memory_space<vmem>>, vector<16x1xf32>
    %44 = vector.broadcast %43 : vector<16x1xf32> to vector<16x256xf32>
    %45 = arith.addf %42, %44 : vector<16x256xf32>
    %c0_25 = arith.constant 0 : index
    %c0_26 = arith.constant 0 : index
    %46 = vector.load %arg10[%c0_25, %c0_26] : memref<16x1xf32, #tpu.memory_space<vmem>>, vector<16x1xf32>
    %c0_27 = arith.constant 0 : index
    %c0_28 = arith.constant 0 : index
    %47 = vector.load %arg11[%c0_27, %c0_28] : memref<16x1xf32, #tpu.memory_space<vmem>>, vector<16x1xf32>
    %48 = arith.mulf %45, %45 : vector<16x256xf32>
    %49 = tpu.concatenate %45, %48 in 0 : vector<16x256xf32>, vector<16x256xf32> -> vector<32x256xf32>
    %cst_29 = arith.constant dense<0.000000e+00> : vector<32x16xf32>
    %50 = tpu.matmul %49, %1, %cst_29 {dimension_numbers = #tpu.dot_dimension_numbers<[1], [0], [0], [1], [0, 0, 1, 1], [], []>} : vector<32x256xf32>, vector<256x16xf32>, vector<32x16xf32> -> vector<32x16xf32>
    %cst_30 = arith.constant dense<0.000000e+00> : vector<16x16xf32>
    %51 = tpu.matmul %3, %50, %cst_30 {dimension_numbers = #tpu.dot_dimension_numbers<[1], [0], [0], [1], [0, 0, 1, 1], [], []>} : vector<16x32xf32>, vector<32x16xf32>, vector<16x16xf32> -> vector<16x16xf32>
    %cst_31 = arith.constant 3.125000e-02 : f32
    %52 = vector.broadcast %cst_31 : f32 to vector<16x16xf32>
    %53 = arith.mulf %51, %52 : vector<16x16xf32>
    %54 = vector.extract_strided_slice %53 {offsets = [0, 0], sizes = [8, 16], strides = [1, 1]} : vector<16x16xf32> to vector<8x16xf32>
    %55 = vector.extract_strided_slice %53 {offsets = [8, 0], sizes = [8, 16], strides = [1, 1]} : vector<16x16xf32> to vector<8x16xf32>
    %56 = arith.mulf %54, %54 : vector<8x16xf32>
    %57 = arith.subf %55, %56 : vector<8x16xf32>
    %cst_32 = arith.constant 0.000000e+00 : f32
    %58 = vector.broadcast %cst_32 : f32 to vector<8x16xf32>
    %59 = arith.maximumf %57, %58 : vector<8x16xf32>
    %cst_33 = arith.constant 9.99999974E-6 : f32
    %60 = vector.broadcast %cst_33 : f32 to vector<8x16xf32>
    %61 = arith.addf %59, %60 : vector<8x16xf32>
    %62 = math.rsqrt %61 : vector<8x16xf32>
    %63 = tpu.concatenate %54, %62 in 0 : vector<8x16xf32>, vector<8x16xf32> -> vector<16x16xf32>
    %cst_34 = arith.constant dense<0.000000e+00> : vector<32x16xf32>
    %64 = tpu.matmul %4, %63, %cst_34 {dimension_numbers = #tpu.dot_dimension_numbers<[1], [0], [0], [1], [0, 0, 1, 1], [], []>} : vector<32x16xf32>, vector<16x16xf32>, vector<32x16xf32> -> vector<32x16xf32>
    %cst_35 = arith.constant dense<0.000000e+00> : vector<32x256xf32>
    %65 = tpu.matmul %64, %2, %cst_35 {dimension_numbers = #tpu.dot_dimension_numbers<[1], [0], [0], [1], [0, 0, 1, 1], [], []>} : vector<32x16xf32>, vector<16x256xf32>, vector<32x256xf32> -> vector<32x256xf32>
    %66 = vector.extract_strided_slice %65 {offsets = [0, 0], sizes = [16, 256], strides = [1, 1]} : vector<32x256xf32> to vector<16x256xf32>
    %67 = arith.subf %45, %66 : vector<16x256xf32>
    %68 = vector.extract_strided_slice %65 {offsets = [16, 0], sizes = [16, 256], strides = [1, 1]} : vector<32x256xf32> to vector<16x256xf32>
    %69 = arith.mulf %67, %68 : vector<16x256xf32>
    %70 = vector.broadcast %46 : vector<16x1xf32> to vector<16x256xf32>
    %71 = arith.mulf %69, %70 : vector<16x256xf32>
    %72 = vector.broadcast %47 : vector<16x1xf32> to vector<16x256xf32>
    %73 = arith.addf %71, %72 : vector<16x256xf32>
    %cst_36 = arith.constant 2.000000e+01 : f32
    %74 = vector.broadcast %cst_36 : f32 to vector<16x256xf32>
    %75 = arith.minimumf %73, %74 : vector<16x256xf32>
    %76 = math.exp %75 : vector<16x256xf32>
    %cst_37 = arith.constant 1.000000e+00 : f32
    %77 = vector.broadcast %cst_37 : f32 to vector<16x256xf32>
    %78 = arith.addf %77, %76 : vector<16x256xf32>
    %79 = arith.mulf %78, %78 : vector<16x256xf32>
    %cst_38 = arith.constant 1.000000e+00 : f32
    %80 = vector.broadcast %cst_38 : f32 to vector<16x256xf32>
    %81 = arith.subf %79, %80 : vector<16x256xf32>
    %82 = arith.mulf %73, %81 : vector<16x256xf32>
    %cst_39 = arith.constant 1.000000e+00 : f32
    %83 = vector.broadcast %cst_39 : f32 to vector<16x256xf32>
    %84 = arith.addf %79, %83 : vector<16x256xf32>
    %85 = arith.divf %82, %84 : vector<16x256xf32>
    %c0_40 = arith.constant 0 : index
    %c0_41 = arith.constant 0 : index
    %86 = vector.load %arg2[%c0_40, %c0_41] : memref<32x256xf32, #tpu.memory_space<vmem>>, vector<32x256xf32>
    %87 = vector.extract_strided_slice %86 {offsets = [0, 0], sizes = [16, 256], strides = [1, 1]} : vector<32x256xf32> to vector<16x256xf32>
    %88 = arith.mulf %87, %85 : vector<16x256xf32>
    %89 = vector.extract_strided_slice %86 {offsets = [16, 0], sizes = [16, 256], strides = [1, 1]} : vector<32x256xf32> to vector<16x256xf32>
    %90 = arith.addf %88, %89 : vector<16x256xf32>
    %cst_42 = arith.constant 0.000000e+00 : f32
    %91 = vector.broadcast %cst_42 : f32 to vector<16x256xf32>
    %c0_43 = arith.constant 0 : index
    %c0_44 = arith.constant 0 : index
    %c0_45 = arith.constant 0 : index
    %92 = vector.load %arg12[%c0_43, %c0_44, %c0_45] : memref<3x16x16xf32, #tpu.memory_space<vmem>>, vector<1x16x16xf32>
    %93 = vector.shape_cast %92 : vector<1x16x16xf32> to vector<16x16xf32>
    %94 = vector.extract_strided_slice %90 {offsets = [0, 255], sizes = [16, 1], strides = [1, 1]} : vector<16x256xf32> to vector<16x1xf32>
    %95 = vector.extract_strided_slice %90 {offsets = [0, 0], sizes = [16, 255], strides = [1, 1]} : vector<16x256xf32> to vector<16x255xf32>
    %96 = tpu.concatenate %94, %95 in 1 : vector<16x1xf32>, vector<16x255xf32> -> vector<16x256xf32>
    %cst_46 = arith.constant 0.000000e+00 : f32
    %97 = vector.shape_cast %9 : vector<1x256xi1> to vector<1x256xi1>
    %98 = vector.broadcast %97 : vector<1x256xi1> to vector<16x256xi1>
    %99 = vector.broadcast %cst_46 : f32 to vector<16x256xf32>
    %100 = arith.select %98, %96, %99 : vector<16x256xi1>, vector<16x256xf32>
    %cst_47 = arith.constant dense<0.000000e+00> : vector<16x256xf32>
    %101 = tpu.matmul %93, %100, %cst_47 {dimension_numbers = #tpu.dot_dimension_numbers<[1], [0], [0], [1], [0, 0, 1, 1], [], []>} : vector<16x16xf32>, vector<16x256xf32>, vector<16x256xf32> -> vector<16x256xf32>
    %102 = arith.addf %91, %101 : vector<16x256xf32>
    %c1_48 = arith.constant 1 : index
    %c0_49 = arith.constant 0 : index
    %c0_50 = arith.constant 0 : index
    %103 = vector.load %arg12[%c1_48, %c0_49, %c0_50] : memref<3x16x16xf32, #tpu.memory_space<vmem>>, vector<1x16x16xf32>
    %104 = vector.shape_cast %103 : vector<1x16x16xf32> to vector<16x16xf32>
    %cst_51 = arith.constant dense<0.000000e+00> : vector<16x256xf32>
    %105 = tpu.matmul %104, %90, %cst_51 {dimension_numbers = #tpu.dot_dimension_numbers<[1], [0], [0], [1], [0, 0, 1, 1], [], []>} : vector<16x16xf32>, vector<16x256xf32>, vector<16x256xf32> -> vector<16x256xf32>
    %106 = arith.addf %102, %105 : vector<16x256xf32>
    %c2_52 = arith.constant 2 : index
    %c0_53 = arith.constant 0 : index
    %c0_54 = arith.constant 0 : index
    %107 = vector.load %arg12[%c2_52, %c0_53, %c0_54] : memref<3x16x16xf32, #tpu.memory_space<vmem>>, vector<1x16x16xf32>
    %108 = vector.shape_cast %107 : vector<1x16x16xf32> to vector<16x16xf32>
    %109 = vector.extract_strided_slice %90 {offsets = [0, 1], sizes = [16, 255], strides = [1, 1]} : vector<16x256xf32> to vector<16x255xf32>
    %110 = vector.extract_strided_slice %90 {offsets = [0, 0], sizes = [16, 1], strides = [1, 1]} : vector<16x256xf32> to vector<16x1xf32>
    %111 = tpu.concatenate %109, %110 in 1 : vector<16x255xf32>, vector<16x1xf32> -> vector<16x256xf32>
    %cst_55 = arith.constant 0.000000e+00 : f32
    %112 = vector.shape_cast %14 : vector<1x256xi1> to vector<1x256xi1>
    %113 = vector.broadcast %112 : vector<1x256xi1> to vector<16x256xi1>
    %114 = vector.broadcast %cst_55 : f32 to vector<16x256xf32>
    %115 = arith.select %113, %111, %114 : vector<16x256xi1>, vector<16x256xf32>
    %cst_56 = arith.constant dense<0.000000e+00> : vector<16x256xf32>
    %116 = tpu.matmul %108, %115, %cst_56 {dimension_numbers = #tpu.dot_dimension_numbers<[1], [0], [0], [1], [0, 0, 1, 1], [], []>} : vector<16x16xf32>, vector<16x256xf32>, vector<16x256xf32> -> vector<16x256xf32>
    %117 = arith.addf %106, %116 : vector<16x256xf32>
    %c0_57 = arith.constant 0 : index
    %c0_58 = arith.constant 0 : index
    %118 = vector.load %arg13[%c0_57, %c0_58] : memref<16x1xf32, #tpu.memory_space<vmem>>, vector<16x1xf32>
    %119 = vector.broadcast %118 : vector<16x1xf32> to vector<16x256xf32>
    %120 = arith.addf %117, %119 : vector<16x256xf32>
    %c0_59 = arith.constant 0 : index
    %c0_60 = arith.constant 0 : index
    %121 = vector.load %arg14[%c0_59, %c0_60] : memref<16x1xf32, #tpu.memory_space<vmem>>, vector<16x1xf32>
    %c0_61 = arith.constant 0 : index
    %c0_62 = arith.constant 0 : index
    %122 = vector.load %arg15[%c0_61, %c0_62] : memref<16x1xf32, #tpu.memory_space<vmem>>, vector<16x1xf32>
    %123 = arith.mulf %120, %120 : vector<16x256xf32>
    %124 = tpu.concatenate %120, %123 in 0 : vector<16x256xf32>, vector<16x256xf32> -> vector<32x256xf32>
    %cst_63 = arith.constant dense<0.000000e+00> : vector<32x16xf32>
    %125 = tpu.matmul %124, %1, %cst_63 {dimension_numbers = #tpu.dot_dimension_numbers<[1], [0], [0], [1], [0, 0, 1, 1], [], []>} : vector<32x256xf32>, vector<256x16xf32>, vector<32x16xf32> -> vector<32x16xf32>
    %cst_64 = arith.constant dense<0.000000e+00> : vector<16x16xf32>
    %126 = tpu.matmul %3, %125, %cst_64 {dimension_numbers = #tpu.dot_dimension_numbers<[1], [0], [0], [1], [0, 0, 1, 1], [], []>} : vector<16x32xf32>, vector<32x16xf32>, vector<16x16xf32> -> vector<16x16xf32>
    %cst_65 = arith.constant 3.125000e-02 : f32
    %127 = vector.broadcast %cst_65 : f32 to vector<16x16xf32>
    %128 = arith.mulf %126, %127 : vector<16x16xf32>
    %129 = vector.extract_strided_slice %128 {offsets = [0, 0], sizes = [8, 16], strides = [1, 1]} : vector<16x16xf32> to vector<8x16xf32>
    %130 = vector.extract_strided_slice %128 {offsets = [8, 0], sizes = [8, 16], strides = [1, 1]} : vector<16x16xf32> to vector<8x16xf32>
    %131 = arith.mulf %129, %129 : vector<8x16xf32>
    %132 = arith.subf %130, %131 : vector<8x16xf32>
    %cst_66 = arith.constant 0.000000e+00 : f32
    %133 = vector.broadcast %cst_66 : f32 to vector<8x16xf32>
    %134 = arith.maximumf %132, %133 : vector<8x16xf32>
    %cst_67 = arith.constant 9.99999974E-6 : f32
    %135 = vector.broadcast %cst_67 : f32 to vector<8x16xf32>
    %136 = arith.addf %134, %135 : vector<8x16xf32>
    %137 = math.rsqrt %136 : vector<8x16xf32>
    %138 = tpu.concatenate %129, %137 in 0 : vector<8x16xf32>, vector<8x16xf32> -> vector<16x16xf32>
    %cst_68 = arith.constant dense<0.000000e+00> : vector<32x16xf32>
    %139 = tpu.matmul %4, %138, %cst_68 {dimension_numbers = #tpu.dot_dimension_numbers<[1], [0], [0], [1], [0, 0, 1, 1], [], []>} : vector<32x16xf32>, vector<16x16xf32>, vector<32x16xf32> -> vector<32x16xf32>
    %cst_69 = arith.constant dense<0.000000e+00> : vector<32x256xf32>
    %140 = tpu.matmul %139, %2, %cst_69 {dimension_numbers = #tpu.dot_dimension_numbers<[1], [0], [0], [1], [0, 0, 1, 1], [], []>} : vector<32x16xf32>, vector<16x256xf32>, vector<32x256xf32> -> vector<32x256xf32>
    %141 = vector.extract_strided_slice %140 {offsets = [0, 0], sizes = [16, 256], strides = [1, 1]} : vector<32x256xf32> to vector<16x256xf32>
    %142 = arith.subf %120, %141 : vector<16x256xf32>
    %143 = vector.extract_strided_slice %140 {offsets = [16, 0], sizes = [16, 256], strides = [1, 1]} : vector<32x256xf32> to vector<16x256xf32>
    %144 = arith.mulf %142, %143 : vector<16x256xf32>
    %145 = vector.broadcast %121 : vector<16x1xf32> to vector<16x256xf32>
    %146 = arith.mulf %144, %145 : vector<16x256xf32>
    %147 = vector.broadcast %122 : vector<16x1xf32> to vector<16x256xf32>
    %148 = arith.addf %146, %147 : vector<16x256xf32>
    %cst_70 = arith.constant 2.000000e+01 : f32
    %149 = vector.broadcast %cst_70 : f32 to vector<16x256xf32>
    %150 = arith.minimumf %148, %149 : vector<16x256xf32>
    %151 = math.exp %150 : vector<16x256xf32>
    %cst_71 = arith.constant 1.000000e+00 : f32
    %152 = vector.broadcast %cst_71 : f32 to vector<16x256xf32>
    %153 = arith.addf %152, %151 : vector<16x256xf32>
    %154 = arith.mulf %153, %153 : vector<16x256xf32>
    %cst_72 = arith.constant 1.000000e+00 : f32
    %155 = vector.broadcast %cst_72 : f32 to vector<16x256xf32>
    %156 = arith.subf %154, %155 : vector<16x256xf32>
    %157 = arith.mulf %148, %156 : vector<16x256xf32>
    %cst_73 = arith.constant 1.000000e+00 : f32
    %158 = vector.broadcast %cst_73 : f32 to vector<16x256xf32>
    %159 = arith.addf %154, %158 : vector<16x256xf32>
    %160 = arith.divf %157, %159 : vector<16x256xf32>
    %c0_74 = arith.constant 0 : index
    %c0_75 = arith.constant 0 : index
    %161 = vector.load %arg16[%c0_74, %c0_75] : memref<16x4xf32, #tpu.memory_space<vmem>>, vector<16x4xf32>
    %cst_76 = arith.constant dense<0.000000e+00> : vector<16x256xf32>
    %162 = tpu.matmul %161, %15, %cst_76 {dimension_numbers = #tpu.dot_dimension_numbers<[1], [0], [0], [1], [0, 0, 1, 1], [], []>} : vector<16x4xf32>, vector<4x256xf32>, vector<16x256xf32> -> vector<16x256xf32>
    %c0_77 = arith.constant 0 : index
    %c0_78 = arith.constant 0 : index
    %163 = vector.load %arg17[%c0_77, %c0_78] : memref<16x1xf32, #tpu.memory_space<vmem>>, vector<16x1xf32>
    %164 = vector.broadcast %163 : vector<16x1xf32> to vector<16x256xf32>
    %165 = arith.addf %162, %164 : vector<16x256xf32>
    %166 = arith.addf %160, %165 : vector<16x256xf32>
    %c0_79 = arith.constant 0 : index
    %c0_80 = arith.constant 0 : index
    %167 = vector.load %arg18[%c0_79, %c0_80] : memref<16x256xf32, #tpu.memory_space<vmem>>, vector<16x256xf32>
    tpu.vector_store %arg18[%c0_79, %c0_80], %166 {strides = array<i32>} : memref<16x256xf32, #tpu.memory_space<vmem>>, vector<16x256xf32>,
    return
  }
  func.func @transform_0(%arg0: i32) -> (i32, i32) {
    %c0_i32 = arith.constant 0 : i32
    %c0_i32_0 = arith.constant 0 : i32
    return %c0_i32, %arg0 : i32, i32
  }
  func.func @transform_1(%arg0: i32) -> (i32, i32) {
    %c0_i32 = arith.constant 0 : i32
    %c0_i32_0 = arith.constant 0 : i32
    return %c0_i32, %arg0 : i32, i32
  }
  func.func @transform_2(%arg0: i32) -> (i32, i32) {
    %c0_i32 = arith.constant 0 : i32
    %c0_i32_0 = arith.constant 0 : i32
    %c0_i32_1 = arith.constant 0 : i32
    return %c0_i32, %c0_i32_0 : i32, i32
  }
  func.func @transform_3(%arg0: i32) -> (i32, i32) {
    %c0_i32 = arith.constant 0 : i32
    %c0_i32_0 = arith.constant 0 : i32
    %c0_i32_1 = arith.constant 0 : i32
    return %c0_i32, %c0_i32_0 : i32, i32
  }
  func.func @transform_4(%arg0: i32) -> (i32, i32) {
    %c0_i32 = arith.constant 0 : i32
    %c0_i32_0 = arith.constant 0 : i32
    %c0_i32_1 = arith.constant 0 : i32
    return %c0_i32, %c0_i32_0 : i32, i32
  }
  func.func @transform_5(%arg0: i32) -> (i32, i32) {
    %c0_i32 = arith.constant 0 : i32
    %c0_i32_0 = arith.constant 0 : i32
    %c0_i32_1 = arith.constant 0 : i32
    return %c0_i32, %c0_i32_0 : i32, i32
  }
  func.func @transform_6(%arg0: i32) -> (i32, i32) {
    %c0_i32 = arith.constant 0 : i32
    %c0_i32_0 = arith.constant 0 : i32
    %c0_i32_1 = arith.constant 0 : i32
    return %c0_i32, %c0_i32_0 : i32, i32
  }
  func.func @transform_7(%arg0: i32) -> (i32, i32, i32) {
    %c0_i32 = arith.constant 0 : i32
    %c0_i32_0 = arith.constant 0 : i32
    %c0_i32_1 = arith.constant 0 : i32
    %c0_i32_2 = arith.constant 0 : i32
    return %c0_i32, %c0_i32_0, %c0_i32_1 : i32, i32, i32
  }
  func.func @transform_8(%arg0: i32) -> (i32, i32) {
    %c0_i32 = arith.constant 0 : i32
    %c0_i32_0 = arith.constant 0 : i32
    %c0_i32_1 = arith.constant 0 : i32
    return %c0_i32, %c0_i32_0 : i32, i32
  }
  func.func @transform_9(%arg0: i32) -> (i32, i32) {
    %c0_i32 = arith.constant 0 : i32
    %c0_i32_0 = arith.constant 0 : i32
    %c0_i32_1 = arith.constant 0 : i32
    return %c0_i32, %c0_i32_0 : i32, i32
  }
  func.func @transform_10(%arg0: i32) -> (i32, i32) {
    %c0_i32 = arith.constant 0 : i32
    %c0_i32_0 = arith.constant 0 : i32
    %c0_i32_1 = arith.constant 0 : i32
    return %c0_i32, %c0_i32_0 : i32, i32
  }
  func.func @transform_11(%arg0: i32) -> (i32, i32, i32) {
    %c0_i32 = arith.constant 0 : i32
    %c0_i32_0 = arith.constant 0 : i32
    %c0_i32_1 = arith.constant 0 : i32
    %c0_i32_2 = arith.constant 0 : i32
    return %c0_i32, %c0_i32_0, %c0_i32_1 : i32, i32, i32
  }
  func.func @transform_12(%arg0: i32) -> (i32, i32) {
    %c0_i32 = arith.constant 0 : i32
    %c0_i32_0 = arith.constant 0 : i32
    %c0_i32_1 = arith.constant 0 : i32
    return %c0_i32, %c0_i32_0 : i32, i32
  }
  func.func @transform_13(%arg0: i32) -> (i32, i32) {
    %c0_i32 = arith.constant 0 : i32
    %c0_i32_0 = arith.constant 0 : i32
    %c0_i32_1 = arith.constant 0 : i32
    return %c0_i32, %c0_i32_0 : i32, i32
  }
  func.func @transform_14(%arg0: i32) -> (i32, i32) {
    %c0_i32 = arith.constant 0 : i32
    %c0_i32_0 = arith.constant 0 : i32
    %c0_i32_1 = arith.constant 0 : i32
    return %c0_i32, %c0_i32_0 : i32, i32
  }
  func.func @transform_15(%arg0: i32) -> (i32, i32) {
    %c0_i32 = arith.constant 0 : i32
    %c0_i32_0 = arith.constant 0 : i32
    %c0_i32_1 = arith.constant 0 : i32
    return %c0_i32, %c0_i32_0 : i32, i32
  }
  func.func @transform_16(%arg0: i32) -> (i32, i32) {
    %c0_i32 = arith.constant 0 : i32
    %c0_i32_0 = arith.constant 0 : i32
    %c0_i32_1 = arith.constant 0 : i32
    return %c0_i32, %c0_i32_0 : i32, i32
  }
  func.func @transform_17(%arg0: i32) -> (i32, i32) {
    %c0_i32 = arith.constant 0 : i32
    %c0_i32_0 = arith.constant 0 : i32
    return %c0_i32, %arg0 : i32, i32
  }
}

module attributes {stable_mosaic.version = 11 : i64} {
  func.func @_cond_resblock_kernel(%arg0: i32, %arg1: memref<4x256xf32, #tpu.memory_space<vmem>>, %arg2: memref<32x256xf32, #tpu.memory_space<vmem>>, %arg3: memref<1x256xi32, #tpu.memory_space<vmem>>, %arg4: memref<256x16xf32, #tpu.memory_space<vmem>>, %arg5: memref<16x256xf32, #tpu.memory_space<vmem>>, %arg6: memref<16x32xf32, #tpu.memory_space<vmem>>, %arg7: memref<32x16xf32, #tpu.memory_space<vmem>>, %arg8: memref<3x16x4xf32, #tpu.memory_space<vmem>>, %arg9: memref<16x1xf32, #tpu.memory_space<vmem>>, %arg10: memref<16x1xf32, #tpu.memory_space<vmem>>, %arg11: memref<16x1xf32, #tpu.memory_space<vmem>>, %arg12: memref<3x16x16xf32, #tpu.memory_space<vmem>>, %arg13: memref<16x1xf32, #tpu.memory_space<vmem>>, %arg14: memref<16x1xf32, #tpu.memory_space<vmem>>, %arg15: memref<16x1xf32, #tpu.memory_space<vmem>>, %arg16: memref<16x4xf32, #tpu.memory_space<vmem>>, %arg17: memref<16x1xf32, #tpu.memory_space<vmem>>, %arg18: memref<16x256xf32, #tpu.memory_space<vmem>>) attributes {dimension_semantics = [#tpu.dimension_semantics<parallel>], iteration_bounds = array<i64: 1>, scalar_prefetch = 0 : i64, scratch_operands = 0 : i64, tpu.core_type = #tpu.core_type<tc>, window_params = [{transform_indices = @transform_0, window_bounds = array<i64: 4, 256>}, {transform_indices = @transform_1, window_bounds = array<i64: 32, 256>}, {pipeline_mode = #tpu.pipeline_mode<synchronous>, transform_indices = @transform_2, window_bounds = array<i64: 1, 256>}, {pipeline_mode = #tpu.pipeline_mode<synchronous>, transform_indices = @transform_3, window_bounds = array<i64: 256, 16>}, {pipeline_mode = #tpu.pipeline_mode<synchronous>, transform_indices = @transform_4, window_bounds = array<i64: 16, 256>}, {pipeline_mode = #tpu.pipeline_mode<synchronous>, transform_indices = @transform_5, window_bounds = array<i64: 16, 32>}, {pipeline_mode = #tpu.pipeline_mode<synchronous>, transform_indices = @transform_6, window_bounds = array<i64: 32, 16>}, {pipeline_mode = #tpu.pipeline_mode<synchronous>, transform_indices = @transform_7, window_bounds = array<i64: 3, 16, 4>}, {pipeline_mode = #tpu.pipeline_mode<synchronous>, transform_indices = @transform_8, window_bounds = array<i64: 16, 1>}, {pipeline_mode = #tpu.pipeline_mode<synchronous>, transform_indices = @transform_9, window_bounds = array<i64: 16, 1>}, {pipeline_mode = #tpu.pipeline_mode<synchronous>, transform_indices = @transform_10, window_bounds = array<i64: 16, 1>}, {pipeline_mode = #tpu.pipeline_mode<synchronous>, transform_indices = @transform_11, window_bounds = array<i64: 3, 16, 16>}, {pipeline_mode = #tpu.pipeline_mode<synchronous>, transform_indices = @transform_12, window_bounds = array<i64: 16, 1>}, {pipeline_mode = #tpu.pipeline_mode<synchronous>, transform_indices = @transform_13, window_bounds = array<i64: 16, 1>}, {pipeline_mode = #tpu.pipeline_mode<synchronous>, transform_indices = @transform_14, window_bounds = array<i64: 16, 1>}, {pipeline_mode = #tpu.pipeline_mode<synchronous>, transform_indices = @transform_15, window_bounds = array<i64: 16, 4>}, {pipeline_mode = #tpu.pipeline_mode<synchronous>, transform_indices = @transform_16, window_bounds = array<i64: 16, 1>}, {transform_indices = @transform_17, window_bounds = array<i64: 16, 256>}]} {
    %c0 = arith.constant 0 : index
    %c0_0 = arith.constant 0 : index
    %0 = vector.load %arg3[%c0, %c0_0] : memref<1x256xi32, #tpu.memory_space<vmem>>, vector<1x256xi32>
    %c0_1 = arith.constant 0 : index
    %c0_2 = arith.constant 0 : index
    %1 = vector.load %arg4[%c0_1, %c0_2] : memref<256x16xf32, #tpu.memory_space<vmem>>, vector<256x16xf32>
    %c0_3 = arith.constant 0 : index
    %c0_4 = arith.constant 0 : index
    %2 = vector.load %arg5[%c0_3, %c0_4] : memref<16x256xf32, #tpu.memory_space<vmem>>, vector<16x256xf32>
    %c0_5 = arith.constant 0 : index
    %c0_6 = arith.constant 0 : index
    %3 = vector.load %arg6[%c0_5, %c0_6] : memref<16x32xf32, #tpu.memory_space<vmem>>, vector<16x32xf32>
    %c0_7 = arith.constant 0 : index
    %c0_8 = arith.constant 0 : index
    %4 = vector.load %arg7[%c0_7, %c0_8] : memref<32x16xf32, #tpu.memory_space<vmem>>, vector<32x16xf32>
    %c1_i32 = arith.constant 1 : i32
    %5 = vector.broadcast %c1_i32 : i32 to vector<1x256xi32>
    %6 = arith.cmpi sge, %0, %5 : vector<1x256xi32>
    %c17_i32 = arith.constant 17 : i32
    %7 = vector.broadcast %c17_i32 : i32 to vector<1x256xi32>
    %8 = arith.cmpi slt, %0, %7 : vector<1x256xi32>
    %9 = arith.andi %6, %8 : vector<1x256xi1>
    %c-1_i32 = arith.constant -1 : i32
    %10 = vector.broadcast %c-1_i32 : i32 to vector<1x256xi32>
    %11 = arith.cmpi sge, %0, %10 : vector<1x256xi32>
    %c15_i32 = arith.constant 15 : i32
    %12 = vector.broadcast %c15_i32 : i32 to vector<1x256xi32>
    %13 = arith.cmpi slt, %0, %12 : vector<1x256xi32>
    %14 = arith.andi %11, %13 : vector<1x256xi1>
    %c0_9 = arith.constant 0 : index
    %c0_10 = arith.constant 0 : index
    %15 = vector.load %arg1[%c0_9, %c0_10] : memref<4x256xf32, #tpu.memory_space<vmem>>, vector<4x256xf32>
    %cst = arith.constant 0.000000e+00 : f32
    %16 = vector.broadcast %cst : f32 to vector<16x256xf32>
    %c0_11 = arith.constant 0 : index
    %c0_12 = arith.constant 0 : index
    %c0_13 = arith.constant 0 : index
    %17 = vector.load %arg8[%c0_11, %c0_12, %c0_13] : memref<3x16x4xf32, #tpu.memory_space<vmem>>, vector<1x16x4xf32>
    %18 = vector.shape_cast %17 : vector<1x16x4xf32> to vector<16x4xf32>
    %19 = vector.extract_strided_slice %15 {offsets = [0, 255], sizes = [4, 1], strides = [1, 1]} : vector<4x256xf32> to vector<4x1xf32>
    %20 = vector.extract_strided_slice %15 {offsets = [0, 0], sizes = [4, 255], strides = [1, 1]} : vector<4x256xf32> to vector<4x255xf32>
    %21 = tpu.concatenate %19, %20 in 1 : vector<4x1xf32>, vector<4x255xf32> -> vector<4x256xf32>
    %cst_14 = arith.constant 0.000000e+00 : f32
    %22 = vector.shape_cast %9 : vector<1x256xi1> to vector<1x256xi1>
    %23 = vector.broadcast %22 : vector<1x256xi1> to vector<4x256xi1>
    %24 = vector.broadcast %cst_14 : f32 to vector<4x256xf32>
    %25 = arith.select %23, %21, %24 : vector<4x256xi1>, vector<4x256xf32>
    %cst_15 = arith.constant dense<0.000000e+00> : vector<16x256xf32>
    %26 = tpu.matmul %18, %25, %cst_15 {dimension_numbers = #tpu.dot_dimension_numbers<[1], [0], [0], [1], [0, 0, 1, 1], [], []>} : vector<16x4xf32>, vector<4x256xf32>, vector<16x256xf32> -> vector<16x256xf32>
    %27 = arith.addf %16, %26 : vector<16x256xf32>
    %c1 = arith.constant 1 : index
    %c0_16 = arith.constant 0 : index
    %c0_17 = arith.constant 0 : index
    %28 = vector.load %arg8[%c1, %c0_16, %c0_17] : memref<3x16x4xf32, #tpu.memory_space<vmem>>, vector<1x16x4xf32>
    %29 = vector.shape_cast %28 : vector<1x16x4xf32> to vector<16x4xf32>
    %cst_18 = arith.constant dense<0.000000e+00> : vector<16x256xf32>
    %30 = tpu.matmul %29, %15, %cst_18 {dimension_numbers = #tpu.dot_dimension_numbers<[1], [0], [0], [1], [0, 0, 1, 1], [], []>} : vector<16x4xf32>, vector<4x256xf32>, vector<16x256xf32> -> vector<16x256xf32>
    %31 = arith.addf %27, %30 : vector<16x256xf32>
    %c2 = arith.constant 2 : index
    %c0_19 = arith.constant 0 : index
    %c0_20 = arith.constant 0 : index
    %32 = vector.load %arg8[%c2, %c0_19, %c0_20] : memref<3x16x4xf32, #tpu.memory_space<vmem>>, vector<1x16x4xf32>
    %33 = vector.shape_cast %32 : vector<1x16x4xf32> to vector<16x4xf32>
    %34 = vector.extract_strided_slice %15 {offsets = [0, 1], sizes = [4, 255], strides = [1, 1]} : vector<4x256xf32> to vector<4x255xf32>
    %35 = vector.extract_strided_slice %15 {offsets = [0, 0], sizes = [4, 1], strides = [1, 1]} : vector<4x256xf32> to vector<4x1xf32>
    %36 = tpu.concatenate %34, %35 in 1 : vector<4x255xf32>, vector<4x1xf32> -> vector<4x256xf32>
    %cst_21 = arith.constant 0.000000e+00 : f32
    %37 = vector.shape_cast %14 : vector<1x256xi1> to vector<1x256xi1>
    %38 = vector.broadcast %37 : vector<1x256xi1> to vector<4x256xi1>
    %39 = vector.broadcast %cst_21 : f32 to vector<4x256xf32>
    %40 = arith.select %38, %36, %39 : vector<4x256xi1>, vector<4x256xf32>
    %cst_22 = arith.constant dense<0.000000e+00> : vector<16x256xf32>
    %41 = tpu.matmul %33, %40, %cst_22 {dimension_numbers = #tpu.dot_dimension_numbers<[1], [0], [0], [1], [0, 0, 1, 1], [], []>} : vector<16x4xf32>, vector<4x256xf32>, vector<16x256xf32> -> vector<16x256xf32>
    %42 = arith.addf %31, %41 : vector<16x256xf32>
    %c0_23 = arith.constant 0 : index
    %c0_24 = arith.constant 0 : index
    %43 = vector.load %arg9[%c0_23, %c0_24] : memref<16x1xf32, #tpu.memory_space<vmem>>, vector<16x1xf32>
    %44 = vector.broadcast %43 : vector<16x1xf32> to vector<16x256xf32>
    %45 = arith.addf %42, %44 : vector<16x256xf32>
    %c0_25 = arith.constant 0 : index
    %c0_26 = arith.constant 0 : index
    %46 = vector.load %arg10[%c0_25, %c0_26] : memref<16x1xf32, #tpu.memory_space<vmem>>, vector<16x1xf32>
    %c0_27 = arith.constant 0 : index
    %c0_28 = arith.constant 0 : index
    %47 = vector.load %arg11[%c0_27, %c0_28] : memref<16x1xf32, #tpu.memory_space<vmem>>, vector<16x1xf32>
    %48 = arith.mulf %45, %45 : vector<16x256xf32>
    %49 = tpu.concatenate %45, %48 in 0 : vector<16x256xf32>, vector<16x256xf32> -> vector<32x256xf32>
    %cst_29 = arith.constant dense<0.000000e+00> : vector<32x16xf32>
    %50 = tpu.matmul %49, %1, %cst_29 {dimension_numbers = #tpu.dot_dimension_numbers<[1], [0], [0], [1], [0, 0, 1, 1], [], []>} : vector<32x256xf32>, vector<256x16xf32>, vector<32x16xf32> -> vector<32x16xf32>
    %cst_30 = arith.constant dense<0.000000e+00> : vector<16x16xf32>
    %51 = tpu.matmul %3, %50, %cst_30 {dimension_numbers = #tpu.dot_dimension_numbers<[1], [0], [0], [1], [0, 0, 1, 1], [], []>} : vector<16x32xf32>, vector<32x16xf32>, vector<16x16xf32> -> vector<16x16xf32>
    %cst_31 = arith.constant 3.125000e-02 : f32
    %52 = vector.broadcast %cst_31 : f32 to vector<16x16xf32>
    %53 = arith.mulf %51, %52 : vector<16x16xf32>
    %54 = vector.extract_strided_slice %53 {offsets = [0, 0], sizes = [8, 16], strides = [1, 1]} : vector<16x16xf32> to vector<8x16xf32>
    %55 = vector.extract_strided_slice %53 {offsets = [8, 0], sizes = [8, 16], strides = [1, 1]} : vector<16x16xf32> to vector<8x16xf32>
    %56 = arith.mulf %54, %54 : vector<8x16xf32>
    %57 = arith.subf %55, %56 : vector<8x16xf32>
    %cst_32 = arith.constant 0.000000e+00 : f32
    %58 = vector.broadcast %cst_32 : f32 to vector<8x16xf32>
    %59 = arith.maximumf %57, %58 : vector<8x16xf32>
    %cst_33 = arith.constant 9.99999974E-6 : f32
    %60 = vector.broadcast %cst_33 : f32 to vector<8x16xf32>
    %61 = arith.addf %59, %60 : vector<8x16xf32>
    %62 = math.rsqrt %61 : vector<8x16xf32>
    %63 = tpu.concatenate %54, %62 in 0 : vector<8x16xf32>, vector<8x16xf32> -> vector<16x16xf32>
    %cst_34 = arith.constant dense<0.000000e+00> : vector<32x16xf32>
    %64 = tpu.matmul %4, %63, %cst_34 {dimension_numbers = #tpu.dot_dimension_numbers<[1], [0], [0], [1], [0, 0, 1, 1], [], []>} : vector<32x16xf32>, vector<16x16xf32>, vector<32x16xf32> -> vector<32x16xf32>
    %cst_35 = arith.constant dense<0.000000e+00> : vector<32x256xf32>
    %65 = tpu.matmul %64, %2, %cst_35 {dimension_numbers = #tpu.dot_dimension_numbers<[1], [0], [0], [1], [0, 0, 1, 1], [], []>} : vector<32x16xf32>, vector<16x256xf32>, vector<32x256xf32> -> vector<32x256xf32>
    %66 = vector.extract_strided_slice %65 {offsets = [0, 0], sizes = [16, 256], strides = [1, 1]} : vector<32x256xf32> to vector<16x256xf32>
    %67 = arith.subf %45, %66 : vector<16x256xf32>
    %68 = vector.extract_strided_slice %65 {offsets = [16, 0], sizes = [16, 256], strides = [1, 1]} : vector<32x256xf32> to vector<16x256xf32>
    %69 = arith.mulf %67, %68 : vector<16x256xf32>
    %70 = vector.broadcast %46 : vector<16x1xf32> to vector<16x256xf32>
    %71 = arith.mulf %69, %70 : vector<16x256xf32>
    %72 = vector.broadcast %47 : vector<16x1xf32> to vector<16x256xf32>
    %73 = arith.addf %71, %72 : vector<16x256xf32>
    %cst_36 = arith.constant 2.000000e+01 : f32
    %74 = vector.broadcast %cst_36 : f32 to vector<16x256xf32>
    %75 = arith.minimumf %73, %74 : vector<16x256xf32>
    %76 = math.exp %75 : vector<16x256xf32>
    %cst_37 = arith.constant 1.000000e+00 : f32
    %77 = vector.broadcast %cst_37 : f32 to vector<16x256xf32>
    %78 = arith.addf %77, %76 : vector<16x256xf32>
    %79 = arith.mulf %78, %78 : vector<16x256xf32>
    %cst_38 = arith.constant 1.000000e+00 : f32
    %80 = vector.broadcast %cst_38 : f32 to vector<16x256xf32>
    %81 = arith.subf %79, %80 : vector<16x256xf32>
    %82 = arith.mulf %73, %81 : vector<16x256xf32>
    %cst_39 = arith.constant 1.000000e+00 : f32
    %83 = vector.broadcast %cst_39 : f32 to vector<16x256xf32>
    %84 = arith.addf %79, %83 : vector<16x256xf32>
    %85 = arith.divf %82, %84 : vector<16x256xf32>
    %c0_40 = arith.constant 0 : index
    %c0_41 = arith.constant 0 : index
    %86 = vector.load %arg2[%c0_40, %c0_41] : memref<32x256xf32, #tpu.memory_space<vmem>>, vector<32x256xf32>
    %87 = vector.extract_strided_slice %86 {offsets = [0, 0], sizes = [16, 256], strides = [1, 1]} : vector<32x256xf32> to vector<16x256xf32>
    %88 = arith.mulf %87, %85 : vector<16x256xf32>
    %89 = vector.extract_strided_slice %86 {offsets = [16, 0], sizes = [16, 256], strides = [1, 1]} : vector<32x256xf32> to vector<16x256xf32>
    %90 = arith.addf %88, %89 : vector<16x256xf32>
    %cst_42 = arith.constant 0.000000e+00 : f32
    %91 = vector.broadcast %cst_42 : f32 to vector<16x256xf32>
    %c0_43 = arith.constant 0 : index
    %c0_44 = arith.constant 0 : index
    %c0_45 = arith.constant 0 : index
    %92 = vector.load %arg12[%c0_43, %c0_44, %c0_45] : memref<3x16x16xf32, #tpu.memory_space<vmem>>, vector<1x16x16xf32>
    %93 = vector.shape_cast %92 : vector<1x16x16xf32> to vector<16x16xf32>
    %94 = vector.extract_strided_slice %90 {offsets = [0, 255], sizes = [16, 1], strides = [1, 1]} : vector<16x256xf32> to vector<16x1xf32>
    %95 = vector.extract_strided_slice %90 {offsets = [0, 0], sizes = [16, 255], strides = [1, 1]} : vector<16x256xf32> to vector<16x255xf32>
    %96 = tpu.concatenate %94, %95 in 1 : vector<16x1xf32>, vector<16x255xf32> -> vector<16x256xf32>
    %cst_46 = arith.constant 0.000000e+00 : f32
    %97 = vector.shape_cast %9 : vector<1x256xi1> to vector<1x256xi1>
    %98 = vector.broadcast %97 : vector<1x256xi1> to vector<16x256xi1>
    %99 = vector.broadcast %cst_46 : f32 to vector<16x256xf32>
    %100 = arith.select %98, %96, %99 : vector<16x256xi1>, vector<16x256xf32>
    %cst_47 = arith.constant dense<0.000000e+00> : vector<16x256xf32>
    %101 = tpu.matmul %93, %100, %cst_47 {dimension_numbers = #tpu.dot_dimension_numbers<[1], [0], [0], [1], [0, 0, 1, 1], [], []>} : vector<16x16xf32>, vector<16x256xf32>, vector<16x256xf32> -> vector<16x256xf32>
    %102 = arith.addf %91, %101 : vector<16x256xf32>
    %c1_48 = arith.constant 1 : index
    %c0_49 = arith.constant 0 : index
    %c0_50 = arith.constant 0 : index
    %103 = vector.load %arg12[%c1_48, %c0_49, %c0_50] : memref<3x16x16xf32, #tpu.memory_space<vmem>>, vector<1x16x16xf32>
    %104 = vector.shape_cast %103 : vector<1x16x16xf32> to vector<16x16xf32>
    %cst_51 = arith.constant dense<0.000000e+00> : vector<16x256xf32>
    %105 = tpu.matmul %104, %90, %cst_51 {dimension_numbers = #tpu.dot_dimension_numbers<[1], [0], [0], [1], [0, 0, 1, 1], [], []>} : vector<16x16xf32>, vector<16x256xf32>, vector<16x256xf32> -> vector<16x256xf32>
    %106 = arith.addf %102, %105 : vector<16x256xf32>
    %c2_52 = arith.constant 2 : index
    %c0_53 = arith.constant 0 : index
    %c0_54 = arith.constant 0 : index
    %107 = vector.load %arg12[%c2_52, %c0_53, %c0_54] : memref<3x16x16xf32, #tpu.memory_space<vmem>>, vector<1x16x16xf32>
    %108 = vector.shape_cast %107 : vector<1x16x16xf32> to vector<16x16xf32>
    %109 = vector.extract_strided_slice %90 {offsets = [0, 1], sizes = [16, 255], strides = [1, 1]} : vector<16x256xf32> to vector<16x255xf32>
    %110 = vector.extract_strided_slice %90 {offsets = [0, 0], sizes = [16, 1], strides = [1, 1]} : vector<16x256xf32> to vector<16x1xf32>
    %111 = tpu.concatenate %109, %110 in 1 : vector<16x255xf32>, vector<16x1xf32> -> vector<16x256xf32>
    %cst_55 = arith.constant 0.000000e+00 : f32
    %112 = vector.shape_cast %14 : vector<1x256xi1> to vector<1x256xi1>
    %113 = vector.broadcast %112 : vector<1x256xi1> to vector<16x256xi1>
    %114 = vector.broadcast %cst_55 : f32 to vector<16x256xf32>
    %115 = arith.select %113, %111, %114 : vector<16x256xi1>, vector<16x256xf32>
    %cst_56 = arith.constant dense<0.000000e+00> : vector<16x256xf32>
    %116 = tpu.matmul %108, %115, %cst_56 {dimension_numbers = #tpu.dot_dimension_numbers<[1], [0], [0], [1], [0, 0, 1, 1], [], []>} : vector<16x16xf32>, vector<16x256xf32>, vector<16x256xf32> -> vector<16x256xf32>
    %117 = arith.addf %106, %116 : vector<16x256xf32>
    %c0_57 = arith.constant 0 : index
    %c0_58 = arith.constant 0 : index
    %118 = vector.load %arg13[%c0_57, %c0_58] : memref<16x1xf32, #tpu.memory_space<vmem>>, vector<16x1xf32>
    %119 = vector.broadcast %118 : vector<16x1xf32> to vector<16x256xf32>
    %120 = arith.addf %117, %119 : vector<16x256xf32>
    %c0_59 = arith.constant 0 : index
    %c0_60 = arith.constant 0 : index
    %121 = vector.load %arg14[%c0_59, %c0_60] : memref<16x1xf32, #tpu.memory_space<vmem>>, vector<16x1xf32>
    %c0_61 = arith.constant 0 : index
    %c0_62 = arith.constant 0 : index
    %122 = vector.load %arg15[%c0_61, %c0_62] : memref<16x1xf32, #tpu.memory_space<vmem>>, vector<16x1xf32>
    %123 = arith.mulf %120, %120 : vector<16x256xf32>
    %124 = tpu.concatenate %120, %123 in 0 : vector<16x256xf32>, vector<16x256xf32> -> vector<32x256xf32>
    %cst_63 = arith.constant dense<0.000000e+00> : vector<32x16xf32>
    %125 = tpu.matmul %124, %1, %cst_63 {dimension_numbers = #tpu.dot_dimension_numbers<[1], [0], [0], [1], [0, 0, 1, 1], [], []>} : vector<32x256xf32>, vector<256x16xf32>, vector<32x16xf32> -> vector<32x16xf32>
    %cst_64 = arith.constant dense<0.000000e+00> : vector<16x16xf32>
    %126 = tpu.matmul %3, %125, %cst_64 {dimension_numbers = #tpu.dot_dimension_numbers<[1], [0], [0], [1], [0, 0, 1, 1], [], []>} : vector<16x32xf32>, vector<32x16xf32>, vector<16x16xf32> -> vector<16x16xf32>
    %cst_65 = arith.constant 3.125000e-02 : f32
    %127 = vector.broadcast %cst_65 : f32 to vector<16x16xf32>
    %128 = arith.mulf %126, %127 : vector<16x16xf32>
    %129 = vector.extract_strided_slice %128 {offsets = [0, 0], sizes = [8, 16], strides = [1, 1]} : vector<16x16xf32> to vector<8x16xf32>
    %130 = vector.extract_strided_slice %128 {offsets = [8, 0], sizes = [8, 16], strides = [1, 1]} : vector<16x16xf32> to vector<8x16xf32>
    %131 = arith.mulf %129, %129 : vector<8x16xf32>
    %132 = arith.subf %130, %131 : vector<8x16xf32>
    %cst_66 = arith.constant 0.000000e+00 : f32
    %133 = vector.broadcast %cst_66 : f32 to vector<8x16xf32>
    %134 = arith.maximumf %132, %133 : vector<8x16xf32>
    %cst_67 = arith.constant 9.99999974E-6 : f32
    %135 = vector.broadcast %cst_67 : f32 to vector<8x16xf32>
    %136 = arith.addf %134, %135 : vector<8x16xf32>
    %137 = math.rsqrt %136 : vector<8x16xf32>
    %138 = tpu.concatenate %129, %137 in 0 : vector<8x16xf32>, vector<8x16xf32> -> vector<16x16xf32>
    %cst_68 = arith.constant dense<0.000000e+00> : vector<32x16xf32>
    %139 = tpu.matmul %4, %138, %cst_68 {dimension_numbers = #tpu.dot_dimension_numbers<[1], [0], [0], [1], [0, 0, 1, 1], [], []>} : vector<32x16xf32>, vector<16x16xf32>, vector<32x16xf32> -> vector<32x16xf32>
    %cst_69 = arith.constant dense<0.000000e+00> : vector<32x256xf32>
    %140 = tpu.matmul %139, %2, %cst_69 {dimension_numbers = #tpu.dot_dimension_numbers<[1], [0], [0], [1], [0, 0, 1, 1], [], []>} : vector<32x16xf32>, vector<16x256xf32>, vector<32x256xf32> -> vector<32x256xf32>
    %141 = vector.extract_strided_slice %140 {offsets = [0, 0], sizes = [16, 256], strides = [1, 1]} : vector<32x256xf32> to vector<16x256xf32>
    %142 = arith.subf %120, %141 : vector<16x256xf32>
    %143 = vector.extract_strided_slice %140 {offsets = [16, 0], sizes = [16, 256], strides = [1, 1]} : vector<32x256xf32> to vector<16x256xf32>
    %144 = arith.mulf %142, %143 : vector<16x256xf32>
    %145 = vector.broadcast %121 : vector<16x1xf32> to vector<16x256xf32>
    %146 = arith.mulf %144, %145 : vector<16x256xf32>
    %147 = vector.broadcast %122 : vector<16x1xf32> to vector<16x256xf32>
    %148 = arith.addf %146, %147 : vector<16x256xf32>
    %cst_70 = arith.constant 2.000000e+01 : f32
    %149 = vector.broadcast %cst_70 : f32 to vector<16x256xf32>
    %150 = arith.minimumf %148, %149 : vector<16x256xf32>
    %151 = math.exp %150 : vector<16x256xf32>
    %cst_71 = arith.constant 1.000000e+00 : f32
    %152 = vector.broadcast %cst_71 : f32 to vector<16x256xf32>
    %153 = arith.addf %152, %151 : vector<16x256xf32>
    %154 = arith.mulf %153, %153 : vector<16x256xf32>
    %cst_72 = arith.constant 1.000000e+00 : f32
    %155 = vector.broadcast %cst_72 : f32 to vector<16x256xf32>
    %156 = arith.subf %154, %155 : vector<16x256xf32>
    %157 = arith.mulf %148, %156 : vector<16x256xf32>
    %cst_73 = arith.constant 1.000000e+00 : f32
    %158 = vector.broadcast %cst_73 : f32 to vector<16x256xf32>
    %159 = arith.addf %154, %158 : vector<16x256xf32>
    %160 = arith.divf %157, %159 : vector<16x256xf32>
    %c0_74 = arith.constant 0 : index
    %c0_75 = arith.constant 0 : index
    %161 = vector.load %arg16[%c0_74, %c0_75] : memref<16x4xf32, #tpu.memory_space<vmem>>, vector<16x4xf32>
    %cst_76 = arith.constant dense<0.000000e+00> : vector<16x256xf32>
    %162 = tpu.matmul %161, %15, %cst_76 {dimension_numbers = #tpu.dot_dimension_numbers<[1], [0], [0], [1], [0, 0, 1, 1], [], []>} : vector<16x4xf32>, vector<4x256xf32>, vector<16x256xf32> -> vector<16x256xf32>
    %c0_77 = arith.constant 0 : index
    %c0_78 = arith.constant 0 : index
    %163 = vector.load %arg17[%c0_77, %c0_78] : memref<16x1xf32, #tpu.memory_space<vmem>>, vector<16x1xf32>
    %164 = vector.broadcast %163 : vector<16x1xf32> to vector<16x256xf32>
    %165 = arith.addf %162, %164 : vector<16x256xf32>
    %166 = arith.addf %160, %165 : vector<16x256xf32>
    %c0_79 = arith.constant 0 : index
    %c0_80 = arith.constant 0 : index
    %167 = vector.load %arg18[%c0_79, %c0_80] : memref<16x256xf32, #tpu.memory_space<vmem>>, vector<16x256xf32>
    tpu.vector_store %arg18[%c0_79, %c0_80], %166 {strides = array<i32>} : memref<16x256xf32, #tpu.memory_space<vmem>>, vector<16x256xf32>,
    return
  }
  func.func @transform_0(%arg0: i32) -> (i32, i32) {
    %c0_i32 = arith.constant 0 : i32
    %c0_i32_0 = arith.constant 0 : i32
    return %c0_i32, %arg0 : i32, i32
  }
  func.func @transform_1(%arg0: i32) -> (i32, i32) {
    %c0_i32 = arith.constant 0 : i32
    %c0_i32_0 = arith.constant 0 : i32
    return %c0_i32, %arg0 : i32, i32
  }
  func.func @transform_2(%arg0: i32) -> (i32, i32) {
    %c0_i32 = arith.constant 0 : i32
    %c0_i32_0 = arith.constant 0 : i32
    %c0_i32_1 = arith.constant 0 : i32
    return %c0_i32, %c0_i32_0 : i32, i32
  }
  func.func @transform_3(%arg0: i32) -> (i32, i32) {
    %c0_i32 = arith.constant 0 : i32
    %c0_i32_0 = arith.constant 0 : i32
    %c0_i32_1 = arith.constant 0 : i32
    return %c0_i32, %c0_i32_0 : i32, i32
  }
  func.func @transform_4(%arg0: i32) -> (i32, i32) {
    %c0_i32 = arith.constant 0 : i32
    %c0_i32_0 = arith.constant 0 : i32
    %c0_i32_1 = arith.constant 0 : i32
    return %c0_i32, %c0_i32_0 : i32, i32
  }
  func.func @transform_5(%arg0: i32) -> (i32, i32) {
    %c0_i32 = arith.constant 0 : i32
    %c0_i32_0 = arith.constant 0 : i32
    %c0_i32_1 = arith.constant 0 : i32
    return %c0_i32, %c0_i32_0 : i32, i32
  }
  func.func @transform_6(%arg0: i32) -> (i32, i32) {
    %c0_i32 = arith.constant 0 : i32
    %c0_i32_0 = arith.constant 0 : i32
    %c0_i32_1 = arith.constant 0 : i32
    return %c0_i32, %c0_i32_0 : i32, i32
  }
  func.func @transform_7(%arg0: i32) -> (i32, i32, i32) {
    %c0_i32 = arith.constant 0 : i32
    %c0_i32_0 = arith.constant 0 : i32
    %c0_i32_1 = arith.constant 0 : i32
    %c0_i32_2 = arith.constant 0 : i32
    return %c0_i32, %c0_i32_0, %c0_i32_1 : i32, i32, i32
  }
  func.func @transform_8(%arg0: i32) -> (i32, i32) {
    %c0_i32 = arith.constant 0 : i32
    %c0_i32_0 = arith.constant 0 : i32
    %c0_i32_1 = arith.constant 0 : i32
    return %c0_i32, %c0_i32_0 : i32, i32
  }
  func.func @transform_9(%arg0: i32) -> (i32, i32) {
    %c0_i32 = arith.constant 0 : i32
    %c0_i32_0 = arith.constant 0 : i32
    %c0_i32_1 = arith.constant 0 : i32
    return %c0_i32, %c0_i32_0 : i32, i32
  }
  func.func @transform_10(%arg0: i32) -> (i32, i32) {
    %c0_i32 = arith.constant 0 : i32
    %c0_i32_0 = arith.constant 0 : i32
    %c0_i32_1 = arith.constant 0 : i32
    return %c0_i32, %c0_i32_0 : i32, i32
  }
  func.func @transform_11(%arg0: i32) -> (i32, i32, i32) {
    %c0_i32 = arith.constant 0 : i32
    %c0_i32_0 = arith.constant 0 : i32
    %c0_i32_1 = arith.constant 0 : i32
    %c0_i32_2 = arith.constant 0 : i32
    return %c0_i32, %c0_i32_0, %c0_i32_1 : i32, i32, i32
  }
  func.func @transform_12(%arg0: i32) -> (i32, i32) {
    %c0_i32 = arith.constant 0 : i32
    %c0_i32_0 = arith.constant 0 : i32
    %c0_i32_1 = arith.constant 0 : i32
    return %c0_i32, %c0_i32_0 : i32, i32
  }
  func.func @transform_13(%arg0: i32) -> (i32, i32) {
    %c0_i32 = arith.constant 0 : i32
    %c0_i32_0 = arith.constant 0 : i32
    %c0_i32_1 = arith.constant 0 : i32
    return %c0_i32, %c0_i32_0 : i32, i32
  }
  func.func @transform_14(%arg0: i32) -> (i32, i32) {
    %c0_i32 = arith.constant 0 : i32
    %c0_i32_0 = arith.constant 0 : i32
    %c0_i32_1 = arith.constant 0 : i32
    return %c0_i32, %c0_i32_0 : i32, i32
  }
  func.func @transform_15(%arg0: i32) -> (i32, i32) {
    %c0_i32 = arith.constant 0 : i32
    %c0_i32_0 = arith.constant 0 : i32
    %c0_i32_1 = arith.constant 0 : i32
    return %c0_i32, %c0_i32_0 : i32, i32
  }
  func.func @transform_16(%arg0: i32) -> (i32, i32) {
    %c0_i32 = arith.constant 0 : i32
    %c0_i32_0 = arith.constant 0 : i32
    %c0_i32_1 = arith.constant 0 : i32
    return %c0_i32, %c0_i32_0 : i32, i32
  }
  func.func @transform_17(%arg0: i32) -> (i32, i32) {
    %c0_i32 = arith.constant 0 : i32
    %c0_i32_0 = arith.constant 0 : i32
    return %c0_i32, %arg0 : i32, i32
  }
}

</mosaic_0001>

<bundles_post_ra>
// kernel: tpu_custom_call.1
= control target key start
LH: loop header
LB: loop body
LE: loop exit
PB: predicated region body
PF: predicated region fallthrough
CT: control target
= control target key end

     0   :  { %s3594_s0 = inlined_call_operand.hbm [shape: f32[4,256], index: 0, kind: input, shape index: {}]   ;;  %s3595_s1 = inlined_call_operand.hbm [shape: f32[32,256], index: 1, kind: input, shape index: {}]   ;;  %s3596_s2 = inlined_call_operand.hbm [shape: s32[1,256], index: 2, kind: input, shape index: {}]   ;;  %s3597_s3 = inlined_call_operand.hbm [shape: f32[256,16], index: 3, kind: input, shape index: {}]   ;;  %s3598_s4 = inlined_call_operand.hbm [shape: f32[16,256], index: 4, kind: input, shape index: {}]   ;;  %s3599_s5 = inlined_call_operand.hbm [shape: f32[16,32], index: 5, kind: input, shape index: {}]   ;;  %s3600_s6 = inlined_call_operand.hbm [shape: f32[32,16], index: 6, kind: input, shape index: {}]   ;;  %s3601_s7 = inlined_call_operand.hbm [shape: f32[3,16,4], index: 7, kind: input, shape index: {}]   ;;  %s3602_s8 = inlined_call_operand.hbm [shape: f32[16,1], index: 8, kind: input, shape index: {}]   ;;  %s3603_s9 = inlined_call_operand.hbm [shape: f32[16,1], index: 9, kind: input, shape index: {}]   ;;  %s3604_s10 = inlined_call_operand.hbm [shape: f32[16,1], index: 10, kind: input, shape index: {}]   ;;  %s3605_s11 = inlined_call_operand.hbm [shape: f32[3,16,16], index: 11, kind: input, shape index: {}]   ;;  %s3606_s12 = inlined_call_operand.hbm [shape: f32[16,1], index: 12, kind: input, shape index: {}]   ;;  %s3607_s13 = inlined_call_operand.hbm [shape: f32[16,1], index: 13, kind: input, shape index: {}]   ;;  %s3608_s14 = inlined_call_operand.hbm [shape: f32[16,1], index: 14, kind: input, shape index: {}]   ;;  %s3609_s15 = inlined_call_operand.hbm [shape: f32[16,4], index: 15, kind: input, shape index: {}]   ;;  %s3610_s16 = inlined_call_operand.hbm [shape: f32[16,1], index: 16, kind: input, shape index: {}]   ;;  %s3611_s17 = inlined_call_operand.hbm [shape: f32[16,256], index: 17, kind: output, shape index: {}]  }
   0x1   :  { %3619 = sst [smem:[#allocation40_spill]] %s3594_s0 }
   0x2   :  { %3620 = sst [smem:[#allocation41_spill]] %s3595_s1 }
   0x3   :  { %3621 = sst [smem:[#allocation42_spill]] %s3611_s17 }
   0x4   :  { %22 = vsyncpa [#allocation3], 0 }
   0x5   :  { %23 = vsyncpa [#allocation6], 0 }
   0x6   :  { %24 = vsyncpa [#allocation9], 0 }
   0x7   :  { %25 = vsyncpa [#allocation12], 0 }
   0x8   :  { %26 = vsyncpa [#allocation15], 0 }
   0x9   :  { %27 = vsyncpa [#allocation18], 0 }
   0xa   :  { %28 = vsyncpa [#allocation21], 0 }
   0xb   :  { %29 = vsyncpa [#allocation24], 0 }
   0xc   :  { %30 = vsyncpa [#allocation27], 0 }
   0xd   :  { %31 = vsyncpa [#allocation4], 0  ;;  %s2882_s24 = smov [#allocation5]   ;;  %s3622_s28 = sld [smem:[#allocation41_spill]] }
   0xe   :  { %s47_s25 = sshll.u32 %s2882_s24, 4  ;;  %s48_s25 = int_to_ptr.vmem [resolvable:$true] %s47_s25 }
  0x13   :  { %s2466_s29 = scalar_lea.hbm %s3622_s28, 1024 }
  0x14   :  { %p2467_p0 = scmp.ne.s32.totalorder %s3622_s28, %s2466_s29  ;;  %p2470_p1 = scmp.lt.u32.totalorder %s2466_s29, %s3622_s28 }
  0x16   :  { %p2472_p2 = pnand %p2470_p1, %p2467_p0 }
  0x18   :  { %2475 = shalt.err (!%p2472_p2)
}
  0x19   :  { %s2476_s1 = scalar_lea.vmem %s48_s25, 1024  ;;  %p2481_p4 = scmp.lt.s32.totalorder %s48_s25, %s48_s25 }
  0x1a   :  { %p2477_p3 = scmp.ne.s32.totalorder %s48_s25, %s2476_s1  ;;  %p2482_p5 = scmp.lt.s32.totalorder %s2476_s1, %s2476_s1 }
  0x1c   :  { %p2483_p6 = por %p2482_p5, %p2481_p4 }
  0x1e   :  { %p2484_p7 = pnand %p2483_p6, %p2477_p3 }
  0x20   :  { %2487 = shalt.err (!%p2484_p7)
}
  0x21   :  { %s3615_s20 = smov 256   ;;  %s3617_s21 = smov 16  }
  0x22   :  { %53 = dma.hbm_to_vmem [thread:$0]  %s3622_s28, 1024, %s48_s25, [#allocation6], %s3615_s20, %s3615_s20, %s3617_s21  }
  0x23   :  { %s2885_s24 = smov [#allocation8]   ;;  %s2488_s0 = scalar_lea.hbm %s3597_s3, 4096 }
  0x24   :  { %s69_s26 = sshll.u32 %s2885_s24, 4  ;;  %p2489_p8 = scmp.ne.s32.totalorder %s3597_s3, %s2488_s0  ;;  %s70_s26 = int_to_ptr.vmem [resolvable:$true] %s69_s26 }
  0x25   :  { %p2492_p9 = scmp.lt.u32.totalorder %s2488_s0, %s3597_s3 }
  0x27   :  { %p2494_p10 = pnand %p2492_p9, %p2489_p8 }
  0x29   :  { %2497 = shalt.err (!%p2494_p10)
}
  0x2a   :  { %s2498_s17 = scalar_lea.vmem %s70_s26, 4096  ;;  %p2503_p12 = scmp.lt.s32.totalorder %s70_s26, %s70_s26 }
  0x2b   :  { %p2499_p11 = scmp.ne.s32.totalorder %s70_s26, %s2498_s17  ;;  %p2504_p13 = scmp.lt.s32.totalorder %s2498_s17, %s2498_s17 }
  0x2d   :  { %p2505_p0 = por %p2504_p13, %p2503_p12 }
  0x2f   :  { %p2506_p1 = pnand %p2505_p0, %p2499_p11 }
  0x31   :  { %2509 = shalt.err (!%p2506_p1)
}
  0x32   :  { %s2886_s25 = smov 128   ;;  %s2887_s28 = smov 8  }
  0x33   :  { %75 = dma.hbm_to_vmem [thread:$0]  %s3597_s3, 4096, %s70_s26, [#allocation9], %s2886_s25, %s2886_s25, %s2887_s28  }
  0x34   :  { %s2888_s24 = smov [#allocation11]   ;;  %s2889_s29 = smov [#allocation14]  }
  0x35   :  { %s93_s27 = sshll.u32 %s2888_s24, 4  ;;  %s117_s0 = sshll.u32 %s2889_s29, 4  ;;  %s94_s27 = int_to_ptr.vmem [resolvable:$true] %s93_s27  ;;  %s3028_s0 = int_to_ptr.vmem [resolvable:$true] %s117_s0 }
  0x36   :  { %s2510_s18 = scalar_lea.hbm %s3599_s5, 256 }
  0x37   :  { %p2511_p2 = scmp.ne.s32.totalorder %s3599_s5, %s2510_s18  ;;  %p2514_p3 = scmp.lt.u32.totalorder %s2510_s18, %s3599_s5 }
  0x39   :  { %p2516_p4 = pnand %p2514_p3, %p2511_p2 }
  0x3b   :  { %2519 = shalt.err (!%p2516_p4)
}
  0x3c   :  { %s2520_s3 = scalar_lea.vmem %s94_s27, 256  ;;  %p2525_p6 = scmp.lt.s32.totalorder %s94_s27, %s94_s27 }
  0x3d   :  { %p2521_p5 = scmp.ne.s32.totalorder %s94_s27, %s2520_s3  ;;  %p2526_p7 = scmp.lt.s32.totalorder %s2520_s3, %s2520_s3 }
  0x3f   :  { %p2527_p8 = por %p2526_p7, %p2525_p6 }
  0x41   :  { %p2528_p9 = pnand %p2527_p8, %p2521_p5 }
  0x43   :  { %2531 = shalt.err (!%p2528_p9)
}
  0x44   :  { %99 = dma.hbm_to_vmem [thread:$0]  %s3599_s5, 256, %s94_s27, [#allocation12], %s2886_s25, %s2886_s25, %s2887_s28  }
  0x45   :  { %s2532_s20 = scalar_lea.hbm %s3601_s7, 768 }
  0x46   :  { %p2533_p10 = scmp.ne.s32.totalorder %s3601_s7, %s2532_s20  ;;  %p2536_p11 = scmp.lt.u32.totalorder %s2532_s20, %s3601_s7 }
  0x48   :  { %p2538_p12 = pnand %p2536_p11, %p2533_p10 }
  0x4a   :  { %2541 = shalt.err (!%p2538_p12)
}
  0x4b   :  { %s2542_s18 = scalar_lea.vmem %s3028_s0, 768  ;;  %p2547_p0 = scmp.lt.s32.totalorder %s3028_s0, %s3028_s0 }
  0x4c   :  { %p2543_p13 = scmp.ne.s32.totalorder %s3028_s0, %s2542_s18  ;;  %p2548_p1 = scmp.lt.s32.totalorder %s2542_s18, %s2542_s18 }
  0x4e   :  { %p2549_p2 = por %p2548_p1, %p2547_p0 }
  0x50   :  { %p2550_p3 = pnand %p2549_p2, %p2543_p13 }
  0x52   :  { %2553 = shalt.err (!%p2550_p3)
}
  0x53   :  { %123 = dma.hbm_to_vmem [thread:$0]  %s3601_s7, 768, %s3028_s0, [#allocation15], %s2886_s25, %s2886_s25, %s2887_s28  }
  0x54   :  { %s2890_s19 = smov [#allocation17]   ;;  %s2891_s3 = smov [#allocation20]  }
  0x55   :  { %s141_s1 = sshll.u32 %s2890_s19, 4  ;;  %s165_s26 = sshll.u32 %s2891_s3, 4  ;;  %s142_s1 = int_to_ptr.vmem [resolvable:$true] %s141_s1  ;;  %s3065_s26 = int_to_ptr.vmem [resolvable:$true] %s165_s26 }
  0x56   :  { %s2554_s24 = scalar_lea.hbm %s3603_s9, 256 }
  0x57   :  { %p2555_p4 = scmp.ne.s32.totalorder %s3603_s9, %s2554_s24  ;;  %p2558_p5 = scmp.lt.u32.totalorder %s2554_s24, %s3603_s9 }
  0x59   :  { %p2560_p6 = pnand %p2558_p5, %p2555_p4 }
  0x5b   :  { %2563 = shalt.err (!%p2560_p6)
}
  0x5c   :  { %s2564_s7 = scalar_lea.vmem %s142_s1, 256  ;;  %p2569_p8 = scmp.lt.s32.totalorder %s142_s1, %s142_s1 }
  0x5d   :  { %p2565_p7 = scmp.ne.s32.totalorder %s142_s1, %s2564_s7  ;;  %p2570_p9 = scmp.lt.s32.totalorder %s2564_s7, %s2564_s7 }
  0x5f   :  { %p2571_p10 = por %p2570_p9, %p2569_p8 }
  0x61   :  { %p2572_p11 = pnand %p2571_p10, %p2565_p7 }
  0x63   :  { %2575 = shalt.err (!%p2572_p11)
}
  0x64   :  { %147 = dma.hbm_to_vmem [thread:$0]  %s3603_s9, 256, %s142_s1, [#allocation18], %s2886_s25, %s2886_s25, %s2887_s28  }
  0x65   :  { %s2576_s27 = scalar_lea.hbm %s3605_s11, 768 }
  0x66   :  { %p2577_p12 = scmp.ne.s32.totalorder %s3605_s11, %s2576_s27  ;;  %p2580_p13 = scmp.lt.u32.totalorder %s2576_s27, %s3605_s11 }
  0x68   :  { %p2582_p0 = pnand %p2580_p13, %p2577_p12 }
  0x6a   :  { %2585 = shalt.err (!%p2582_p0)
}
  0x6b   :  { %s2586_s24 = scalar_lea.vmem %s3065_s26, 768  ;;  %p2591_p2 = scmp.lt.s32.totalorder %s3065_s26, %s3065_s26 }
  0x6c   :  { %p2587_p1 = scmp.ne.s32.totalorder %s3065_s26, %s2586_s24  ;;  %p2592_p3 = scmp.lt.s32.totalorder %s2586_s24, %s2586_s24 }
  0x6e   :  { %p2593_p4 = por %p2592_p3, %p2591_p2 }
  0x70   :  { %p2594_p5 = pnand %p2593_p4, %p2587_p1 }
  0x72   :  { %2597 = shalt.err (!%p2594_p5)
}
  0x73   :  { %171 = dma.hbm_to_vmem [thread:$0]  %s3605_s11, 768, %s3065_s26, [#allocation21], %s2886_s25, %s2886_s25, %s2887_s28  }
  0x74   :  { %s2892_s20 = smov [#allocation23]   ;;  %s2893_s29 = smov [#allocation26]  }
  0x75   :  { %s189_s21 = sshll.u32 %s2892_s20, 4  ;;  %s213_s17 = sshll.u32 %s2893_s29, 4  ;;  %s190_s21 = int_to_ptr.vmem [resolvable:$true] %s189_s21  ;;  %s3102_s17 = int_to_ptr.vmem [resolvable:$true] %s213_s17 }
  0x76   :  { %s2598_s30 = scalar_lea.hbm %s3607_s13, 256 }
  0x77   :  { %p2599_p6 = scmp.ne.s32.totalorder %s3607_s13, %s2598_s30  ;;  %p2602_p7 = scmp.lt.u32.totalorder %s2598_s30, %s3607_s13 }
  0x79   :  { %p2604_p8 = pnand %p2602_p7, %p2599_p6 }
  0x7b   :  { %2607 = shalt.err (!%p2604_p8)
}
  0x7c   :  { %s2608_s11 = scalar_lea.vmem %s190_s21, 256  ;;  %p2613_p10 = scmp.lt.s32.totalorder %s190_s21, %s190_s21 }
  0x7d   :  { %p2609_p9 = scmp.ne.s32.totalorder %s190_s21, %s2608_s11  ;;  %p2614_p11 = scmp.lt.s32.totalorder %s2608_s11, %s2608_s11 }
  0x7f   :  { %p2615_p12 = por %p2614_p11, %p2613_p10 }
  0x81   :  { %p2616_p13 = pnand %p2615_p12, %p2609_p9 }
  0x83   :  { %2619 = shalt.err (!%p2616_p13)
}
  0x84   :  { %195 = dma.hbm_to_vmem [thread:$0]  %s3607_s13, 256, %s190_s21, [#allocation24], %s2886_s25, %s2886_s25, %s2887_s28  }
  0x85   :  { %s2620_s24 = scalar_lea.hbm %s3609_s15, 256 }
  0x86   :  { %p2621_p0 = scmp.ne.s32.totalorder %s3609_s15, %s2620_s24  ;;  %p2624_p1 = scmp.lt.u32.totalorder %s2620_s24, %s3609_s15 }
  0x88   :  { %p2626_p2 = pnand %p2624_p1, %p2621_p0 }
  0x8a   :  { %2629 = shalt.err (!%p2626_p2)
}
  0x8b   :  { %s2630_s7 = scalar_lea.vmem %s3102_s17, 256  ;;  %p2635_p4 = scmp.lt.s32.totalorder %s3102_s17, %s3102_s17 }
  0x8c   :  { %p2631_p3 = scmp.ne.s32.totalorder %s3102_s17, %s2630_s7  ;;  %p2636_p5 = scmp.lt.s32.totalorder %s2630_s7, %s2630_s7 }
  0x8e   :  { %p2637_p6 = por %p2636_p5, %p2635_p4 }
  0x90   :  { %p2638_p7 = pnand %p2637_p6, %p2631_p3 }
  0x92   :  { %2641 = shalt.err (!%p2638_p7)
}
  0x93   :  { %219 = dma.hbm_to_vmem [thread:$0]  %s3609_s15, 256, %s3102_s17, [#allocation27], %s2886_s25, %s2886_s25, %s2887_s28  }
  0x94   :  { %s2894_s0 = smov [#allocation2]   ;;  %s2895_s18 = smov [#allocation7]  }
  0x95   :  { %s38_s30 = sshll.u32 %s2894_s0, 4  ;;  %s60_s5 = sshll.u32 %s2895_s18, 4  ;;  %s39_s30 = int_to_ptr.vmem [resolvable:$true] %s38_s30  ;;  %s61_s5 = int_to_ptr.vmem [resolvable:$true] %s60_s5 }
  0x96   :  { %s3623_s11 = sld [smem:[#allocation40_spill]] }
  0x9c   :  { %s2642_s26 = scalar_lea.hbm %s3623_s11, 128 }
  0x9d   :  { %p2643_p8 = scmp.ne.s32.totalorder %s3623_s11, %s2642_s26  ;;  %p2646_p9 = scmp.lt.u32.totalorder %s2642_s26, %s3623_s11 }
  0x9f   :  { %p2648_p10 = pnand %p2646_p9, %p2643_p8 }
  0xa1   :  { %2651 = shalt.err (!%p2648_p10)
}
  0xa2   :  { %s2652_s15 = scalar_lea.vmem %s39_s30, 128  ;;  %p2657_p12 = scmp.lt.s32.totalorder %s39_s30, %s39_s30 }
  0xa3   :  { %p2653_p11 = scmp.ne.s32.totalorder %s39_s30, %s2652_s15  ;;  %p2658_p13 = scmp.lt.s32.totalorder %s2652_s15, %s2652_s15 }
  0xa5   :  { %p2659_p0 = por %p2658_p13, %p2657_p12 }
  0xa7   :  { %p2660_p1 = pnand %p2659_p0, %p2653_p11 }
  0xa9   :  { %2663 = shalt.err (!%p2660_p1)
}
  0xaa   :  { %41 = dma.hbm_to_vmem [thread:$0]  %s3623_s11, 128, %s39_s30, [#allocation3]  }
  0xab   :  { %s2664_s29 = scalar_lea.hbm %s3596_s2, 32 }
  0xac   :  { %p2665_p2 = scmp.ne.s32.totalorder %s3596_s2, %s2664_s29  ;;  %p2668_p3 = scmp.lt.u32.totalorder %s2664_s29, %s3596_s2 }
  0xae   :  { %p2670_p4 = pnand %p2668_p3, %p2665_p2 }
  0xb0   :  { %2673 = shalt.err (!%p2670_p4)
}
  0xb1   :  { %s2674_s18 = scalar_lea.vmem %s61_s5, 32  ;;  %p2679_p6 = scmp.lt.s32.totalorder %s61_s5, %s61_s5 }
  0xb2   :  { %p2675_p5 = scmp.ne.s32.totalorder %s61_s5, %s2674_s18  ;;  %p2680_p7 = scmp.lt.s32.totalorder %s2674_s18, %s2674_s18 }
  0xb4   :  { %p2681_p8 = por %p2680_p7, %p2679_p6 }
  0xb6   :  { %p2682_p9 = pnand %p2681_p8, %p2675_p5 }
  0xb8   :  { %2685 = shalt.err (!%p2682_p9)
}
  0xb9   :  { %63 = dma.hbm_to_vmem [thread:$0]  %s3596_s2, 32, %s61_s5, [#allocation6]  }
  0xba   :  { %s2896_s19 = smov [#allocation10]   ;;  %s2897_s26 = smov [#allocation13]  }
  0xbb   :  { %s81_s11 = sshll.u32 %s2896_s19, 4  ;;  %s105_s3 = sshll.u32 %s2897_s26, 4  ;;  %s82_s11 = int_to_ptr.vmem [resolvable:$true] %s81_s11  ;;  %s3163_s3 = int_to_ptr.vmem [resolvable:$true] %s105_s3 }
  0xbc   :  { %s2686_s24 = scalar_lea.hbm %s3598_s4, 512 }
  0xbd   :  { %p2687_p10 = scmp.ne.s32.totalorder %s3598_s4, %s2686_s24  ;;  %p2690_p11 = scmp.lt.u32.totalorder %s2686_s24, %s3598_s4 }
  0xbf   :  { %p2692_p12 = pnand %p2690_p11, %p2687_p10 }
  0xc1   :  { %2695 = shalt.err (!%p2692_p12)
}
  0xc2   :  { %s2696_s2 = scalar_lea.vmem %s82_s11, 512  ;;  %p2701_p0 = scmp.lt.s32.totalorder %s82_s11, %s82_s11 }
  0xc3   :  { %p2697_p13 = scmp.ne.s32.totalorder %s82_s11, %s2696_s2  ;;  %p2702_p1 = scmp.lt.s32.totalorder %s2696_s2, %s2696_s2 }
  0xc5   :  { %p2703_p2 = por %p2702_p1, %p2701_p0 }
  0xc7   :  { %p2704_p3 = pnand %p2703_p2, %p2697_p13 }
  0xc9   :  { %2707 = shalt.err (!%p2704_p3)
}
  0xca   :  { %s3624_s5 = smov 16   ;;  %s3625_s20 = smov 256  }
  0xcb   :  { %87 = dma.hbm_to_vmem [thread:$0]  %s3598_s4, 512, %s82_s11, [#allocation9], %s3625_s20, %s3625_s20, %s3624_s5  }
  0xcc   :  { %s2708_s0 = scalar_lea.hbm %s3600_s6, 512 }
  0xcd   :  { %p2709_p4 = scmp.ne.s32.totalorder %s3600_s6, %s2708_s0  ;;  %p2712_p5 = scmp.lt.u32.totalorder %s2708_s0, %s3600_s6 }
  0xcf   :  { %p2714_p6 = pnand %p2712_p5, %p2709_p4 }
  0xd1   :  { %2717 = shalt.err (!%p2714_p6)
}
  0xd2   :  { %s2718_s26 = scalar_lea.vmem %s3163_s3, 512  ;;  %p2723_p8 = scmp.lt.s32.totalorder %s3163_s3, %s3163_s3 }
  0xd3   :  { %p2719_p7 = scmp.ne.s32.totalorder %s3163_s3, %s2718_s26  ;;  %p2724_p9 = scmp.lt.s32.totalorder %s2718_s26, %s2718_s26 }
  0xd5   :  { %p2725_p10 = por %p2724_p9, %p2723_p8 }
  0xd7   :  { %p2726_p11 = pnand %p2725_p10, %p2719_p7 }
  0xd9   :  { %2729 = shalt.err (!%p2726_p11)
}
  0xda   :  { %111 = dma.hbm_to_vmem [thread:$0]  %s3600_s6, 512, %s3163_s3, [#allocation12], %s2886_s25, %s2886_s25, %s2887_s28  }
  0xdb   :  { %s2898_s22 = smov [#allocation16]   ;;  %s2899_s24 = smov [#allocation19]  }
  0xdc   :  { %s129_s23 = sshll.u32 %s2898_s22, 4  ;;  %s153_s15 = sshll.u32 %s2899_s24, 4  ;;  %s130_s23 = int_to_ptr.vmem [resolvable:$true] %s129_s23  ;;  %s3200_s15 = int_to_ptr.vmem [resolvable:$true] %s153_s15 }
  0xdd   :  { %s2730_s1 = scalar_lea.hbm %s3602_s8, 256 }
  0xde   :  { %p2731_p12 = scmp.ne.s32.totalorder %s3602_s8, %s2730_s1  ;;  %p2734_p13 = scmp.lt.u32.totalorder %s2730_s1, %s3602_s8 }
  0xe0   :  { %p2736_p0 = pnand %p2734_p13, %p2731_p12 }
  0xe2   :  { %2739 = shalt.err (!%p2736_p0)
}
  0xe3   :  { %s2740_s6 = scalar_lea.vmem %s130_s23, 256  ;;  %p2745_p2 = scmp.lt.s32.totalorder %s130_s23, %s130_s23 }
  0xe4   :  { %p2741_p1 = scmp.ne.s32.totalorder %s130_s23, %s2740_s6  ;;  %p2746_p3 = scmp.lt.s32.totalorder %s2740_s6, %s2740_s6 }
  0xe6   :  { %p2747_p4 = por %p2746_p3, %p2745_p2 }
  0xe8   :  { %p2748_p5 = pnand %p2747_p4, %p2741_p1 }
  0xea   :  { %2751 = shalt.err (!%p2748_p5)
}
  0xeb   :  { %135 = dma.hbm_to_vmem [thread:$0]  %s3602_s8, 256, %s130_s23, [#allocation15], %s2886_s25, %s2886_s25, %s2887_s28  }
  0xec   :  { %s2752_s30 = scalar_lea.hbm %s3604_s10, 256 }
  0xed   :  { %p2753_p6 = scmp.ne.s32.totalorder %s3604_s10, %s2752_s30  ;;  %p2756_p7 = scmp.lt.u32.totalorder %s2752_s30, %s3604_s10 }
  0xef   :  { %p2758_p8 = pnand %p2756_p7, %p2753_p6 }
  0xf1   :  { %2761 = shalt.err (!%p2758_p8)
}
  0xf2   :  { %s2762_s11 = scalar_lea.vmem %s3200_s15, 256  ;;  %p2767_p10 = scmp.lt.s32.totalorder %s3200_s15, %s3200_s15 }
  0xf3   :  { %p2763_p9 = scmp.ne.s32.totalorder %s3200_s15, %s2762_s11  ;;  %p2768_p11 = scmp.lt.s32.totalorder %s2762_s11, %s2762_s11 }
  0xf5   :  { %p2769_p12 = por %p2768_p11, %p2767_p10 }
  0xf7   :  { %p2770_p13 = pnand %p2769_p12, %p2763_p9 }
  0xf9   :  { %2773 = shalt.err (!%p2770_p13)
}
  0xfa   :  { %159 = dma.hbm_to_vmem [thread:$0]  %s3604_s10, 256, %s3200_s15, [#allocation18], %s2886_s25, %s2886_s25, %s2887_s28  }
  0xfb   :  { %s2900_s23 = smov [#allocation22]   ;;  %s2901_s17 = smov [#allocation25]  }
  0xfc   :  { %s177_s24 = sshll.u32 %s2900_s23, 4  ;;  %s201_s9 = sshll.u32 %s2901_s17, 4  ;;  %s178_s24 = int_to_ptr.vmem [resolvable:$true] %s177_s24  ;;  %s3237_s9 = int_to_ptr.vmem [resolvable:$true] %s201_s9 }
  0xfd   :  { %s2774_s29 = scalar_lea.hbm %s3606_s12, 256 }
  0xfe   :  { %p2775_p0 = scmp.ne.s32.totalorder %s3606_s12, %s2774_s29  ;;  %p2778_p1 = scmp.lt.u32.totalorder %s2774_s29, %s3606_s12 }
 0x100   :  { %p2780_p2 = pnand %p2778_p1, %p2775_p0 }
 0x102   :  { %2783 = shalt.err (!%p2780_p2)
}
 0x103   :  { %s2784_s10 = scalar_lea.vmem %s178_s24, 256  ;;  %p2789_p4 = scmp.lt.s32.totalorder %s178_s24, %s178_s24 }
 0x104   :  { %p2785_p3 = scmp.ne.s32.totalorder %s178_s24, %s2784_s10  ;;  %p2790_p5 = scmp.lt.s32.totalorder %s2784_s10, %s2784_s10 }
 0x106   :  { %p2791_p6 = por %p2790_p5, %p2789_p4 }
 0x108   :  { %p2792_p7 = pnand %p2791_p6, %p2785_p3 }
 0x10a   :  { %2795 = shalt.err (!%p2792_p7)
}
 0x10b   :  { %183 = dma.hbm_to_vmem [thread:$0]  %s3606_s12, 256, %s178_s24, [#allocation21], %s2886_s25, %s2886_s25, %s2887_s28  }
 0x10c   :  { %s2796_s30 = scalar_lea.hbm %s3608_s14, 256 }
 0x10d   :  { %p2797_p8 = scmp.ne.s32.totalorder %s3608_s14, %s2796_s30  ;;  %p2800_p9 = scmp.lt.u32.totalorder %s2796_s30, %s3608_s14 }
 0x10f   :  { %p2802_p10 = pnand %p2800_p9, %p2797_p8 }
 0x111   :  { %2805 = shalt.err (!%p2802_p10)
}
 0x112   :  { %s2806_s11 = scalar_lea.vmem %s3237_s9, 256  ;;  %p2811_p12 = scmp.lt.s32.totalorder %s3237_s9, %s3237_s9 }
 0x113   :  { %p2807_p11 = scmp.ne.s32.totalorder %s3237_s9, %s2806_s11  ;;  %p2812_p13 = scmp.lt.s32.totalorder %s2806_s11, %s2806_s11 }
 0x115   :  { %p2813_p0 = por %p2812_p13, %p2811_p12 }
 0x117   :  { %p2814_p1 = pnand %p2813_p0, %p2807_p11 }
 0x119   :  { %2817 = shalt.err (!%p2814_p1)
}
 0x11a   :  { %207 = dma.hbm_to_vmem [thread:$0]  %s3608_s14, 256, %s3237_s9, [#allocation24], %s2886_s25, %s2886_s25, %s2887_s28  }
 0x11b   :  { %s2902_s22 = smov [#allocation28]   ;;  %s2818_s1 = scalar_lea.hbm %s3610_s16, 256 }
 0x11c   :  { %s225_s23 = sshll.u32 %s2902_s22, 4  ;;  %p2819_p2 = scmp.ne.s32.totalorder %s3610_s16, %s2818_s1  ;;  %s226_s23 = int_to_ptr.vmem [resolvable:$true] %s225_s23 }
 0x11d   :  { %p2822_p3 = scmp.lt.u32.totalorder %s2818_s1, %s3610_s16 }
 0x11f   :  { %p2824_p4 = pnand %p2822_p3, %p2819_p2 }
 0x121   :  { %2827 = shalt.err (!%p2824_p4)
}
 0x122   :  { %s2828_s6 = scalar_lea.vmem %s226_s23, 256  ;;  %p2833_p6 = scmp.lt.s32.totalorder %s226_s23, %s226_s23 }
 0x123   :  { %p2829_p5 = scmp.ne.s32.totalorder %s226_s23, %s2828_s6  ;;  %p2834_p7 = scmp.lt.s32.totalorder %s2828_s6, %s2828_s6 }
 0x125   :  { %p2835_p8 = por %p2834_p7, %p2833_p6 }
 0x127   :  { %p2836_p9 = pnand %p2835_p8, %p2829_p5 }
 0x129   :  { %2839 = shalt.err (!%p2836_p9)
}
 0x12a   :  { %231 = dma.hbm_to_vmem [thread:$0]  %s3610_s16, 256, %s226_s23, [#allocation27], %s2886_s25, %s2886_s25, %s2887_s28  }
 0x12b   :  { %2862 = dma.done.wait [#allocation3], 128  }
 0x12c   :  { %2863 = vsyncadd [#allocation3], 4294967168 }
 0x12d   :  { %2864 = dma.done.wait [#allocation6], 1056  }
 0x12e   :  { %2865 = vsyncadd [#allocation6], 4294966240 }
 0x12f   :  { %2866 = dma.done.wait [#allocation9], 4608  }
 0x130   :  { %2867 = vsyncadd [#allocation9], 4294962688 }
 0x131   :  { %2868 = dma.done.wait [#allocation12], 768  }
 0x132   :  { %2869 = vsyncadd [#allocation12], 4294966528 }
 0x133   :  { %2870 = dma.done.wait [#allocation15], 1024  }
 0x134   :  { %2871 = vsyncadd [#allocation15], 4294966272 }
 0x135   :  { %2872 = dma.done.wait [#allocation18], 512  }
 0x136   :  { %2873 = vsyncadd [#allocation18], 4294966784 }
 0x137   :  { %2874 = dma.done.wait [#allocation21], 1024  }
 0x138   :  { %2875 = vsyncadd [#allocation21], 4294966272 }
 0x139   :  { %2876 = dma.done.wait [#allocation24], 512  }
 0x13a   :  { %2877 = vsyncadd [#allocation24], 4294966784 }
 0x13b   :  { %2878 = dma.done.wait [#allocation27], 512  }
 0x13c   :  { %2879 = vsyncadd [#allocation27], 4294966784  ;;  %v2903_v0 = vmov 0.0   ;;  %v2904_v1 = vmov 0   ;;  %v3292_v2 = vld [vmem:[#allocation2] sm:$0xff]  ;;  %vm370_vm0 = vcmask 1043456   ;;  %v348_v55 = vlaneseq }
 0x13d   :  { %439 = vmatprep.mubr.f32.mxu0 %v2903_v0  ;;  %2407 = vset.pattern.permute.xlu0 %v2904_v1  ;;  %v3296_v3 = vcombine.high %v3292_v2, %v3292_v2  ;;  %s2905_s16 = smov 127   ;;  %v361_v4 = vld [vmem:[#allocation14 + $0x10] sm:$0xff]  ;;  %vm363_vm1 = vcmask 31744   ;;  %s2906_s25 = smov 1   ;;  %v362_v5 = vld [vmem:[#allocation14 + $0x18] sm:$0xff]  ;;  %v677_v8 = vld [vmem:[#allocation17 + $0x8] sm:$0xff] }
 0x13e   :  { %2408 = vset.pattern.permute.xlu1 %v2904_v1  ;;  %v660_v6 = vld [vmem:[#allocation16] sm:$0xff]  ;;  %v661_v7 = vld [vmem:[#allocation16 + $0x8] sm:$0xff]  ;;  %v676_v9 = vld [vmem:[#allocation17] sm:$0xff]  ;;  %v349_v56 = vshrl.u32 %v348_v55, 7  ;;  %vm548_vm8 = vcmask 1039360   ;;  %vm342_vm9 = vcmask 7168  }
 0x13f   :  { %544 = vrot.lane.b32.xlu1 %v3292_v2, %s2905_s16  ;;  %337 = vrot.lane.b32.xlu0 %v3296_v3, %s2906_s25  ;;  %v300_v10 = vld [vmem:[#allocation8 + $0x80] sm:$0xff]  ;;  %v301_v11 = vld [vmem:[#allocation8 + $0x88] sm:$0xff]  ;;  %v302_v15 = vld [vmem:[#allocation8 + $0x90] sm:$0xff]  ;;  %vm769_vm14 = vcmask 261120   ;;  %vm858_vm15 = vcmask 130048   ;;  %s2907_s28 = smov [#allocation29]  }
 0x140   :  { %2041 = vmatprep.subr.msk.mxu0 %vm370_vm0, %v3296_v3  ;;  %v284_v12 = vld [vmem:[#allocation8] sm:$0xff]  ;;  %v3314_v13 = vpack.c.bf16 %v301_v11, %v300_v10  ;;  %v285_v14 = vld [vmem:[#allocation8 + $0x8] sm:$0xff]  ;;  %v303_v16 = vld [vmem:[#allocation8 + $0x98] sm:$0xff]  ;;  %v350_v57 = vsub.s32 0, %v349_v56  ;;  %v354_v58 = vsub.s32 1, %v349_v56  ;;  %s2021_s3 = sshll.u32 %s2907_s28, 4  ;;  %s2022_s3 = int_to_ptr.vmem [resolvable:$true] %s2021_s3 }
 0x141   :  { %2042 = vmatpush1.msk.msra.mxu0 %vm370_vm0, %v3292_v2  ;;  %v3316_v17 = vpack.c.bf16 %v285_v14, %v284_v12  ;;  %v3318_v18 = vpack.c.bf16 %v303_v16, %v302_v15  ;;  %v286_v19 = vld [vmem:[#allocation8 + $0x10] sm:$0xff]  ;;  %v287_v20 = vld [vmem:[#allocation8 + $0x18] sm:$0xff]  ;;  %v304_v21 = vld [vmem:[#allocation8 + $0xa0] sm:$0xff]  ;;  %s2840_s10 = scalar_lea.vmem %s2022_s3, 512  ;;  %p2845_p11 = scmp.lt.s32.totalorder %s2022_s3, %s2022_s3 }
 0x142   :  { %2043 = vmatmul.mubr.msk.f32.vlgmr.msra.gmra.mrb[0].mxu0 %vm363_vm1, %v361_v4  ;;  %v305_v22 = vld [vmem:[#allocation8 + $0xa8] sm:$0xff]  ;;  %v678_v24 = vld [vmem:[#allocation19] sm:$0xff]  ;;  %2254 = vmatprep.subr.bf16.mxu1 %v3314_v13  ;;  %v3322_v25 = vpack.c.bf16 %v287_v20, %v286_v19  ;;  %v306_v29 = vld [vmem:[#allocation8 + $0xb0] sm:$0xff]  ;;  %p2841_p10 = scmp.ne.s32.totalorder %s2022_s3, %s2840_s10  ;;  %p2846_p12 = scmp.lt.s32.totalorder %s2840_s10, %s2840_s10 }
 0x143   :  { %546 = vrot.lane.b32.xlu1 %v3296_v3, %s2905_s16  ;;  %445 = vmatprep.mubr.f32.mxu0 %v2903_v0  ;;  %v679_v23 = vld [vmem:[#allocation19 + $0x8] sm:$0xff]  ;;  %v3325_v26 = vpack.c.bf16 %v305_v22, %v304_v21  ;;  %v288_v27 = vld [vmem:[#allocation8 + $0x20] sm:$0xff]  ;;  %v307_v30 = vld [vmem:[#allocation8 + $0xb8] sm:$0xff] }
 0x144   :  { %340 = vrot.lane.b32.xlu0 %v3292_v2, %s2906_s25  ;;  %2256 = vmatpush3.bf16.msra.mxu1 %v3316_v17  ;;  %v289_v28 = vld [vmem:[#allocation8 + $0x28] sm:$0xff]  ;;  %v3331_v32 = vpack.c.bf16 %v307_v30, %v306_v29  ;;  %v290_v33 = vld [vmem:[#allocation8 + $0x30] sm:$0xff]  ;;  %v291_v34 = vld [vmem:[#allocation8 + $0x38] sm:$0xff]  ;;  %p2847_p13 = por %p2846_p12, %p2845_p11 }
 0x145   :  { %2258 = vmatprep.subr.bf16.mxu1 %v3318_v18  ;;  %v3328_v31 = vpack.c.bf16 %v289_v28, %v288_v27  ;;  %v308_v35 = vld [vmem:[#allocation8 + $0xc0] sm:$0xff]  ;;  %v309_v36 = vld [vmem:[#allocation8 + $0xc8] sm:$0xff]  ;;  %v3334_v37 = vpack.c.bf16 %v291_v34, %v290_v33  ;;  %v310_v41 = vld [vmem:[#allocation8 + $0xd0] sm:$0xff] }
 0x146   :  { %2044 = vmatmul.mubr.msk.f32.gmra.mrb[2].mxu0 %vm363_vm1, %v362_v5  ;;  %v3337_v38 = vpack.c.bf16 %v309_v36, %v308_v35  ;;  %v292_v39 = vld [vmem:[#allocation8 + $0x40] sm:$0xff]  ;;  %v293_v40 = vld [vmem:[#allocation8 + $0x48] sm:$0xff]  ;;  %v311_v42 = vld [vmem:[#allocation8 + $0xd8] sm:$0xff]  ;;  %p2848_p0 = pnand %p2847_p13, %p2841_p10 }
 0x147   :  { %528 = vmatprep.mubr.f32.mxu0 %v2903_v0  ;;  %669 = vperm.xlu1 %2408, %v661_v7   ;;  %v3340_v43 = vpack.c.bf16 %v293_v40, %v292_v39  ;;  %v3343_v44 = vpack.c.bf16 %v311_v42, %v310_v41  ;;  %v294_v45 = vld [vmem:[#allocation8 + $0x50] sm:$0xff]  ;;  %v295_v46 = vld [vmem:[#allocation8 + $0x58] sm:$0xff]  ;;  %v312_v47 = vld [vmem:[#allocation8 + $0xe0] sm:$0xff] }
 0x148   :  { %664 = vperm.xlu0 %2407, %v660_v6   ;;  %2260 = vmatpush3.bf16.msra.mxu1 %v3322_v25  ;;  %v313_v48 = vld [vmem:[#allocation8 + $0xe8] sm:$0xff]  ;;  %v3346_v49 = vpack.c.bf16 %v295_v46, %v294_v45  ;;  %v296_v51 = vld [vmem:[#allocation8 + $0x60] sm:$0xff]  ;;  %v283_v54 = vld [vmem:[#allocation7] sm:$0x3] }
 0x149   :  { %2262 = vmatprep.subr.bf16.mxu1 %v3325_v26  ;;  %v3349_v50 = vpack.c.bf16 %v313_v48, %v312_v47  ;;  %v297_v52 = vld [vmem:[#allocation8 + $0x68] sm:$0xff]  ;;  %vm326_vm2 = vcmp.ge.s32.totalorder %v283_v54, 1  ;;  %vm327_vm3 = vcmp.lt.s32.totalorder %v283_v54, 17  ;;  %vm329_vm4 = vcmp.ge.s32.totalorder %v283_v54, 4294967295  ;;  %v333_v16 = vld [vmem:[#allocation14] sm:$0xff]  ;;  %v334_v20 = vld [vmem:[#allocation14 + $0x8] sm:$0xff] }
 0x14a   :  { %v3352_v53 = vpack.c.bf16 %v297_v52, %v296_v51  ;;  %vm330_vm5 = vcmp.lt.s32.totalorder %v283_v54, 15  ;;  %vm328_vm6 = vmand %vm326_vm2, %vm327_vm3  ;;  %v542_v21 = vld [vmem:[#allocation14 + $0x20] sm:$0xff]  ;;  %v543_v22 = vld [vmem:[#allocation14 + $0x28] sm:$0xff] }
 0x14b   :  { %1067 = vperm.xlu1 %2408, %v676_v9   ;;  %vm331_vm7 = vmand %vm329_vm4, %vm330_vm5  ;;  %v347_v59 = vsel %vm328_vm6, 1, %v2904_v1  ;;  %v298_v28 = vld [vmem:[#allocation8 + $0x70] sm:$0xff]  ;;  %v299_v29 = vld [vmem:[#allocation8 + $0x78] sm:$0xff] }
 0x14c   :  { %1072 = vperm.xlu0 %2407, %v677_v8   ;;  %2264 = vmatpush3.bf16.msra.mxu1 %v3328_v31  ;;  %v554_v60 = vsel %vm331_vm7, 1, %v2904_v1  ;;  %v3358_v62 = vrot.slane %v347_v59, %v350_v57  ;;  %v3360_v63 = vrot.slane %v347_v59, %v354_v58  ;;  %v3395_v30 = vpack.c.bf16 %v299_v29, %v298_v28  ;;  %v3420_v54 = vld [vmem:[#allocation11] sm:$0xff]  ;;  %v317_v28 = vld [vmem:[#allocation10 + $0x8] sm:$0xff]  ;;  %v319_v29 = vld [vmem:[#allocation10 + $0x18] sm:$0xff] }
 0x14d   :  { %2266 = vmatprep.subr.bf16.mxu1 %v3331_v32  ;;  %v3362_v4 = vrot.slane %v554_v60, %v354_v58  ;;  %v3364_v6 = vrot.slane %v554_v60, %v350_v57 }
 0x14e   :  { %vm356_vm10 = vcmp.eq.s32.totalorder %v3358_v62, 1  ;;  %vm357_vm11 = vcmp.eq.s32.totalorder %v3360_v63, 1  ;;  %v1149_v62 = vld [vmem:[#allocation20] sm:$0xff] }
 0x14f   :  { %1081 = vperm.xlu1 %2408, %v678_v24   ;;  %vm564_vm12 = vcmp.eq.s32.totalorder %v3362_v4, 1  ;;  %vm563_vm13 = vcmp.eq.s32.totalorder %v3364_v6, 1  ;;  %v315_v24 = vld [vmem:[#allocation8 + $0xf8] sm:$0xff]  ;;  %vm2306_vm2 = vmpackc.low %vm357_vm11, %vm357_vm11  ;;  %v1347_v4 = vld [vmem:[#allocation20 + $0x20] sm:$0xff] }
 0x150   :  { %1086 = vperm.xlu0 %2407, %v679_v23   ;;  %2268 = vmatpush3.bf16.msra.mxu1 %v3334_v37  ;;  %v314_v23 = vld [vmem:[#allocation8 + $0xf0] sm:$0xff]  ;;  %vm2309_vm3 = vmpackc.low %vm356_vm10, %vm356_vm10  ;;  %v1348_v6 = vld [vmem:[#allocation20 + $0x28] sm:$0xff] }
 0x151   :  { %2270 = vmatprep.subr.bf16.mxu1 %v3337_v38  ;;  %v3393_v27 = vpack.c.bf16 %v315_v24, %v314_v23  ;;  %vm2312_vm4 = vmpackc.low %vm564_vm12, %vm564_vm12 }
 0x152   :  { %vm2315_vm5 = vmpackc.low %vm563_vm13, %vm563_vm13 }
 0x154   :  { %2272 = vmatpush3.bf16.msra.mxu1 %v3340_v43 }
 0x155   :  { %2274 = vmatprep.subr.bf16.mxu1 %v3343_v44 }
 0x158   :  { %2276 = vmatpush3.bf16.msra.mxu1 %v3346_v49 }
 0x159   :  { %2278 = vmatprep.subr.bf16.mxu1 %v3349_v50 }
 0x15c   :  { %2280 = vmatpush3.bf16.msra.mxu1 %v3352_v53 }
 0x15d   :  { %2282 = vmatprep.subr.bf16.mxu1 %v3393_v27 }
 0x160   :  { %2284 = vmatpush3.bf16.msra.mxu1 %v3395_v30 }
 0x1b1   :  { %v545_v61 = vpop.permute.xlu1 %544  ;;  %v338_v5 = vpop.permute.xlu0 %337 }
 0x1b5   :  { %v547_v7 = vpop.permute.xlu1 %546 }
 0x1b6   :  { %v553_v8 = vsel %vm548_vm8, %v547_v7, %v545_v61  ;;  %v341_v1 = vpop.permute.xlu0 %340  ;;  %v549_v9 = vsel %vm548_vm8, %v545_v61, %v547_v7 }
 0x1b7   :  { %v343_v10 = vsel %vm342_vm9, %v341_v1, %v338_v5  ;;  %v346_v11 = vsel %vm342_vm9, %v338_v5, %v341_v1  ;;  %v566_v15 = vsel %vm564_vm12, %v553_v8, 0.0  ;;  %v565_v19 = vsel %vm563_vm13, %v549_v9, 0.0 }
 0x1b8   :  { %v358_v12 = vsel %vm356_vm10, %v346_v11, 0.0  ;;  %v359_v14 = vsel %vm357_vm11, %v343_v10, 0.0 }
 0x1b9   :  { %2045 = vmatprep.subr.msk.mxu0 %vm370_vm0, %v359_v14  ;;  %v3428_v14 = vld [vmem:[#allocation13] sm:$0xff] }
 0x1ba   :  { %2046 = vmatpush1.msk.msra.mxu0 %vm370_vm0, %v358_v12  ;;  %v3424_v12 = vld [vmem:[#allocation11 + $0x8] sm:$0xff] }
 0x1bb   :  { %2047 = vmatmul.mubr.msk.f32.vlgmr.msra.gmra.mrb[0].mxu0 %vm363_vm1, %v333_v16  ;;  %2049 = vmatprep.subr.msk.mxu0 %vm370_vm0, %v566_v15 }
 0x1bc   :  { %2050 = vmatpush1.msk.msra.mxu0 %vm370_vm0, %v565_v19  ;;  %534 = vmatprep.mubr.f32.mxu0 %v2903_v0 }
 0x1bf   :  { %2048 = vmatmul.mubr.msk.f32.gmra.mrb[2].mxu0 %vm363_vm1, %v334_v20 }
 0x1c0   :  { %643 = vmatprep.mubr.f32.mxu0 %v2903_v0 }
 0x1c3   :  { %2051 = vmatmul.mubr.msk.f32.vlgmr.msra.gmra.mrb[0].mxu0 %vm363_vm1, %v542_v21 }
 0x1c4   :  { %649 = vmatprep.mubr.f32.mxu0 %v2903_v0 }
 0x1c6   :  { %v670_v41 = vpop.permute.xlu1 %669 }
 0x1c7   :  { %2052 = vmatmul.mubr.msk.f32.gmra.mrb[2].mxu0 %vm363_vm1, %v543_v22  ;;  %v665_v34 = vpop.permute.xlu0 %664 }
 0x1c8   :  { %2219 = vmatprep.mubr.msk.f32.mxu0 %vm769_vm14, %v3420_v54 }
 0x296   :  { %v645_v33 = vpop.f32.mrb[0].mxu0 }
 0x297   :  { %v647_v35 = vpop.f32.mrb[1].mxu0  ;;  %v3401_v39 = vadd.f32 %v665_v34, %v645_v33 }
 0x298   :  { %v3399_v36 = vadd.f32 %v665_v34, %v647_v35  ;;  %v3432_v35 = vpack.c.bf16 %v319_v29, %v317_v28 }
 0x299   :  { %v680_v48 = vmul.f32 %v3401_v39, %v3401_v39 }
 0x29a   :  { %v651_v40 = vpop.f32.mrb[2].mxu0  ;;  %748 = vmatprep.mubr.f32.mxu1 %v3399_v36  ;;  %v681_v47 = vmul.f32 %v3399_v36, %v3399_v36 }
 0x29b   :  { %v653_v42 = vpop.f32.mrb[3].mxu0  ;;  %749 = vmatmul.mubr.f32.vlgmr.msra.gmra.mrb[0].mxu1 %v3401_v39  ;;  %v3407_v46 = vadd.f32 %v670_v41, %v651_v40  ;;  %v316_v40 = vld [vmem:[#allocation10] sm:$0xff] }
 0x29c   :  { %v3405_v45 = vadd.f32 %v670_v41, %v653_v42  ;;  %v318_v41 = vld [vmem:[#allocation10 + $0x10] sm:$0xff]  ;;  %v3434_v42 = vld [vmem:[#allocation13 + $0x8] sm:$0xff] }
 0x29d   :  { %v682_v52 = vmul.f32 %v3407_v46, %v3407_v46 }
 0x29e   :  { %753 = vmatprep.mubr.f32.mxu1 %v3405_v45  ;;  %v683_v51 = vmul.f32 %v3405_v45, %v3405_v45 }
 0x29f   :  { %754 = vmatmul.mubr.f32.gmra.mrb[2].mxu1 %v3407_v46 }
 0x2a0   :  { %758 = vmatprep.mubr.f32.mxu1 %v681_v47  ;;  %v3436_v47 = vpack.c.bf16 %v318_v41, %v316_v40 }
 0x2a3   :  { %759 = vmatmul.mubr.f32.gmra.mrb[4].mxu1 %v680_v48  ;;  %v3438_v48 = vld [vmem:[#allocation13 + $0x10] sm:$0xff] }
 0x2a4   :  { %763 = vmatprep.mubr.f32.mxu1 %v683_v51  ;;  %v3445_v51 = vld [vmem:[#allocation13 + $0x18] sm:$0xff] }
 0x2a7   :  { %764 = vmatmul.mubr.f32.gmra.mrb[6].mxu1 %v682_v52 }
 0x2a8   :  { %1250 = vmatprep.mubr.f32.mxu1 %v2903_v0 }
 0x36e   :  { %v2131_v55 = vpop.f32.mrb[0].mxu1 }
 0x36f   :  { %v2132_v56 = vpop.f32.mrb[1].mxu1 }
 0x370   :  { %v2133_v57 = vadd.f32 %v2132_v56, %v2131_v55 }
 0x372   :  { %v2134_v58 = vpop.f32.mrb[2].mxu1 }
 0x373   :  { %v2135_v59 = vpop.f32.mrb[3].mxu1 }
 0x374   :  { %v2136_v60 = vadd.f32 %v2135_v59, %v2134_v58 }
 0x376   :  { %v2285_v61 = vpack.c.bf16 %v2136_v60, %v2133_v57  ;;  %v2137_v5 = vpop.f32.mrb[4].mxu1 }
 0x377   :  { %v2138_v7 = vpop.f32.mrb[5].mxu1 }
 0x378   :  { %v2139_v8 = vadd.f32 %v2138_v7, %v2137_v5  ;;  %2286 = vmatprep.subr.bf16.mxu0 %v2285_v61 }
 0x379   :  { %2288 = vmatpush3.bf16.msra.mxu0 %v2285_v61 }
 0x37a   :  { %v2140_v1 = vpop.f32.mrb[6].mxu1 }
 0x37b   :  { %v2141_v9 = vpop.f32.mrb[7].mxu1 }
 0x37c   :  { %v2142_v10 = vadd.f32 %v2141_v9, %v2140_v1 }
 0x37e   :  { %v2289_v11 = vpack.c.bf16 %v2142_v10, %v2139_v8 }
 0x380   :  { %2290 = vmatprep.subr.bf16.mxu0 %v2289_v11 }
 0x381   :  { %2292 = vmatpush3.bf16.msra.mxu0 %v2289_v11 }
 0x384   :  { %2220 = vmatmul.mubr.msk.f32.vlgmr.msra.gmra.mrb[4].mxu0 %vm769_vm14, %v3424_v12 }
 0x385   :  { %2226 = vmatprep.mubr.msk.f32.mxu0 %vm858_vm15, %v3428_v14 }
 0x457   :  { %v2221_v15 = vpop.f32.mrb[4].mxu0 }
 0x458   :  { %v842_v16 = vpop.f32.mrb[5].mxu0  ;;  %v852_v20 = vmul.f32 0.03125, %v2221_v15 }
 0x459   :  { %v851_v19 = vmul.f32 0.03125, %v842_v16 }
 0x45b   :  { %v853_v21 = vmul.f32 %v851_v19, %v851_v19 }
 0x45d   :  { %v854_v22 = vsub.f32 %v852_v20, %v853_v21 }
 0x45f   :  { %v855_v23 = vmax.f32 %v854_v22, 0.0 }
 0x461   :  { %v856_v24 = vadd.f32 1e-05, %v855_v23 }
 0x463   :  { %2430 = vrsqrt.f32 %v856_v24 }
 0x46d   :  { %v2431_v33 = vpop.eup %2430 }
 0x46e   :  { %v2293_v34 = vpack.c.bf16 %v2431_v33, %v851_v19 }
 0x470   :  { %2294 = vmatprep.subr.bf16.mxu0 %v2293_v34 }
 0x471   :  { %2296 = vmatpush3.bf16.msra.mxu0 %v2293_v34 }
 0x472   :  { %2298 = vmatprep.subr.bf16.mxu0 %v3432_v35 }
 0x474   :  { %2227 = vmatmul.mubr.msk.f32.vlgmr.msra.gmra.mrb[6].mxu0 %vm858_vm15, %v3434_v42 }
 0x475   :  { %2229 = vmatprep.mubr.msk.f32.mxu0 %vm858_vm15, %v3438_v48  ;;  %2300 = vmatpush1.bf16.msra.mxu0 %v3436_v47 }
 0x476   :  { %2318 = vmatprep.subr.bf16.mxu0 %v3314_v13 }
 0x478   :  { %2230 = vmatmul.mubr.msk.f32.gmra.mrb[8].mxu0 %vm858_vm15, %v3445_v51 }
 0x479   :  { %1032 = vmatprep.mubr.f32.mxu0 %v2903_v0 }
 0x547   :  { %v2228_v52 = vpop.f32.mrb[6].mxu0 }
 0x548   :  { %v937_v55 = vpop.f32.mrb[7].mxu0 }
 0x549   :  { %2059 = vmatmul.mubr.msk.f32.vlgmr.msra.gmra.mrb[10].mxu0 %vm858_vm15, %v937_v55 }
 0x54a   :  { %1038 = vmatprep.mubr.f32.mxu0 %v2903_v0  ;;  %2320 = vmatpush3.bf16.msra.mxu0 %v3316_v17 }
 0x54b   :  { %v2231_v56 = vpop.f32.mrb[8].mxu0  ;;  %2322 = vmatprep.subr.bf16.mxu0 %v3318_v18 }
 0x54c   :  { %v947_v57 = vpop.f32.mrb[9].mxu0 }
 0x54d   :  { %2060 = vmatmul.mubr.msk.f32.gmra.mrb[12].mxu0 %vm858_vm15, %v2228_v52 }
 0x54e   :  { %1044 = vmatprep.mubr.f32.mxu0 %v2903_v0  ;;  %2324 = vmatpush3.bf16.msra.mxu0 %v3322_v25 }
 0x54f   :  { %2326 = vmatprep.subr.bf16.mxu0 %v3325_v26  ;;  %v1068_v26 = vpop.permute.xlu1 %1067 }
 0x551   :  { %2061 = vmatmul.mubr.msk.f32.gmra.mrb[14].mxu0 %vm858_vm15, %v947_v57 }
 0x552   :  { %1050 = vmatprep.mubr.f32.mxu0 %v2903_v0  ;;  %2328 = vmatpush3.bf16.msra.mxu0 %v3328_v31 }
 0x553   :  { %2330 = vmatprep.subr.bf16.mxu0 %v3331_v32 }
 0x555   :  { %2062 = vmatmul.mubr.msk.f32.gmra.mrb[16].mxu0 %vm858_vm15, %v2231_v56 }
 0x556   :  { %2332 = vmatpush3.bf16.msra.mxu0 %v3334_v37 }
 0x557   :  { %2334 = vmatprep.subr.bf16.mxu0 %v3337_v38 }
 0x55a   :  { %2336 = vmatpush3.bf16.msra.mxu0 %v3340_v43 }
 0x55b   :  { %2338 = vmatprep.subr.bf16.mxu0 %v3343_v44  ;;  %v1073_v44 = vpop.permute.xlu0 %1072 }
 0x55e   :  { %2340 = vmatpush3.bf16.msra.mxu0 %v3346_v49 }
 0x55f   :  { %2342 = vmatprep.subr.bf16.mxu0 %v3349_v50  ;;  %v1087_v1 = vpop.permute.xlu0 %1086 }
 0x562   :  { %2344 = vmatpush3.bf16.msra.mxu0 %v3352_v53 }
 0x563   :  { %2346 = vmatprep.subr.bf16.mxu0 %v3393_v27  ;;  %v1082_v27 = vpop.permute.xlu1 %1081 }
 0x566   :  { %2348 = vmatpush3.bf16.msra.mxu0 %v3395_v30 }
 0x61c   :  { %v1034_v13 = vpop.f32.mrb[10].mxu0 }
 0x61d   :  { %v1036_v17 = vpop.f32.mrb[11].mxu0  ;;  %v1057_v31 = vsub.f32 %v3401_v39, %v1034_v13 }
 0x61e   :  { %v1058_v32 = vsub.f32 %v3399_v36, %v1036_v17 }
 0x620   :  { %v1040_v18 = vpop.f32.mrb[12].mxu0 }
 0x621   :  { %v1042_v25 = vpop.f32.mrb[13].mxu0  ;;  %v1059_v50 = vsub.f32 %v3407_v46, %v1040_v18 }
 0x622   :  { %v1060_v30 = vsub.f32 %v3405_v45, %v1042_v25 }
 0x624   :  { %v1046_v37 = vpop.f32.mrb[14].mxu0 }
 0x625   :  { %v1061_v38 = vmul.f32 %v1057_v31, %v1046_v37  ;;  %v1048_v43 = vpop.f32.mrb[15].mxu0 }
 0x626   :  { %v1062_v49 = vmul.f32 %v1058_v32, %v1048_v43 }
 0x627   :  { %v1075_v53 = vmul.f32 %v1068_v26, %v1061_v38 }
 0x628   :  { %v1076_v58 = vmul.f32 %v1068_v26, %v1062_v49  ;;  %v1052_v59 = vpop.f32.mrb[16].mxu0 }
 0x629   :  { %v1089_v60 = vadd.f32 %v1082_v27, %v1075_v53  ;;  %v1063_v61 = vmul.f32 %v1059_v50, %v1052_v59  ;;  %v1054_v5 = vpop.f32.mrb[17].mxu0  ;;  %v1134_v53 = vld [vmem:[#allocation5 + $0x8] sm:$0xff] }
 0x62a   :  { %v1090_v7 = vadd.f32 %v1082_v27, %v1076_v58  ;;  %v1064_v39 = vmul.f32 %v1060_v30, %v1054_v5  ;;  %v1137_v30 = vld [vmem:[#allocation5 + $0x20] sm:$0xff] }
 0x62b   :  { %v1093_v8 = vmin.f32 %v1089_v60, 20.0  ;;  %v1077_v36 = vmul.f32 %v1073_v44, %v1063_v61  ;;  %v1138_v61 = vld [vmem:[#allocation5 + $0x28] sm:$0xff] }
 0x62c   :  { %v1094_v9 = vmin.f32 %v1090_v7, 20.0  ;;  %v1078_v10 = vmul.f32 %v1073_v44, %v1064_v39  ;;  %v1133_v44 = vld [vmem:[#allocation5] sm:$0xff] }
 0x62d   :  { %v1097_v11 = vmul.f32 1.442695, %v1093_v8  ;;  %v1091_v15 = vadd.f32 %v1087_v1, %v1077_v36  ;;  %v1135_v8 = vld [vmem:[#allocation5 + $0x10] sm:$0xff] }
 0x62e   :  { %v1099_v16 = vmul.f32 1.442695, %v1094_v9  ;;  %v1092_v46 = vadd.f32 %v1087_v1, %v1078_v10  ;;  %v1136_v10 = vld [vmem:[#allocation5 + $0x18] sm:$0xff] }
 0x62f   :  { %2432 = vpow2.f32 %v1097_v11  ;;  %v1095_v19 = vmin.f32 %v1091_v15, 20.0 }
 0x630   :  { %2434 = vpow2.f32 %v1099_v16  ;;  %v1096_v45 = vmin.f32 %v1092_v46, 20.0 }
 0x631   :  { %v1101_v20 = vmul.f32 1.442695, %v1095_v19 }
 0x632   :  { %v1103_v21 = vmul.f32 1.442695, %v1096_v45  ;;  %v1140_v45 = vld [vmem:[#allocation5 + $0x38] sm:$0xff] }
 0x633   :  { %2436 = vpow2.f32 %v1101_v20 }
 0x634   :  { %2438 = vpow2.f32 %v1103_v21 }
 0x639   :  { %v2433_v22 = vpop.eup %2432 }
 0x63a   :  { %v2435_v23 = vpop.eup %2434  ;;  %v1105_v24 = vadd.f32 1.0, %v2433_v22 }
 0x63b   :  { %v1106_v28 = vadd.f32 1.0, %v2435_v23 }
 0x63c   :  { %v1109_v29 = vmul.f32 %v1105_v24, %v1105_v24 }
 0x63d   :  { %v2437_v33 = vpop.eup %2436  ;;  %v1110_v34 = vmul.f32 %v1106_v28, %v1106_v28 }
 0x63e   :  { %v2439_v40 = vpop.eup %2438  ;;  %v1121_v41 = vadd.f32 1.0, %v1109_v29  ;;  %v1107_v52 = vadd.f32 1.0, %v2437_v33  ;;  %v2063_v25 = vadd.f32 -1.0, %v1109_v29  ;;  %v1178_v33 = vld [vmem:[#allocation20 + $0x10] sm:$0xff] }
 0x63f   :  { %v1122_v55 = vadd.f32 1.0, %v1110_v34  ;;  %v1108_v56 = vadd.f32 1.0, %v2439_v40  ;;  %v2064_v26 = vadd.f32 -1.0, %v1110_v34  ;;  %v1459_v34 = vld [vmem:[#allocation22 + $0x8] sm:$0xff]  ;;  %v1458_v40 = vld [vmem:[#allocation22] sm:$0xff] }
 0x640   :  { %2440 = vrcp.f32 %v1121_v41  ;;  %v1111_v57 = vmul.f32 %v1107_v52, %v1107_v52  ;;  %v1117_v31 = vmul.f32 %v2063_v25, %v1089_v60  ;;  %v1179_v41 = vld [vmem:[#allocation20 + $0x18] sm:$0xff]  ;;  %v1475_v52 = vld [vmem:[#allocation23 + $0x8] sm:$0xff] }
 0x641   :  { %2442 = vrcp.f32 %v1122_v55  ;;  %v1112_v13 = vmul.f32 %v1108_v56, %v1108_v56  ;;  %v1118_v38 = vmul.f32 %v2064_v26, %v1090_v7  ;;  %v1139_v7 = vld [vmem:[#allocation5 + $0x30] sm:$0xff] }
 0x642   :  { %v1123_v17 = vadd.f32 1.0, %v1111_v57  ;;  %v2065_v32 = vadd.f32 -1.0, %v1111_v57  ;;  %v1474_v55 = vld [vmem:[#allocation23] sm:$0xff]  ;;  %v1477_v56 = vld [vmem:[#allocation25 + $0x8] sm:$0xff]  ;;  %v1476_v57 = vld [vmem:[#allocation25] sm:$0xff] }
 0x643   :  { %v1124_v18 = vadd.f32 1.0, %v1112_v13  ;;  %v2066_v43 = vadd.f32 -1.0, %v1112_v13  ;;  %v1914_v13 = vld [vmem:[#allocation28 + $0x8] sm:$0xff] }
 0x644   :  { %2444 = vrcp.f32 %v1123_v17  ;;  %v1119_v58 = vmul.f32 %v2065_v32, %v1091_v15  ;;  %v1913_v17 = vld [vmem:[#allocation28] sm:$0xff] }
 0x645   :  { %2446 = vrcp.f32 %v1124_v18  ;;  %v1120_v39 = vmul.f32 %v2066_v43, %v1092_v46 }
 0x64a   :  { %v2441_v37 = vpop.eup %2440 }
 0x64b   :  { %v2443_v49 = vpop.eup %2442  ;;  %v1126_v50 = vmul.f32 %v2441_v37, %v1117_v31 }
 0x64c   :  { %v1128_v27 = vmul.f32 %v2443_v49, %v1118_v38 }
 0x64d   :  { %v1141_v59 = vmul.f32 %v1133_v44, %v1126_v50 }
 0x64e   :  { %v2445_v5 = vpop.eup %2444  ;;  %v1142_v36 = vmul.f32 %v1134_v53, %v1128_v27 }
 0x64f   :  { %v2447_v1 = vpop.eup %2446  ;;  %v1130_v9 = vmul.f32 %v2445_v5, %v1119_v58  ;;  %v1145_v60 = vadd.f32 %v1141_v59, %v1137_v30 }
 0x650   :  { %v1132_v11 = vmul.f32 %v2447_v1, %v1120_v39  ;;  %v1146_v16 = vadd.f32 %v1142_v36, %v1138_v61 }
 0x651   :  { %v1143_v19 = vmul.f32 %v1135_v8, %v1130_v9 }
 0x652   :  { %v1144_v20 = vmul.f32 %v1136_v10, %v1132_v11  ;;  %v2419_v21 = vpack.i.bf16 %v1146_v16, %v1145_v60 }
 0x653   :  { %v1147_v22 = vadd.f32 %v1143_v19, %v1139_v7 }
 0x654   :  { %v1148_v23 = vadd.f32 %v1144_v20, %v1140_v45 }
 0x655   :  { %v2414_v15 = vpack.i.bf16 %v1147_v22, %v1145_v60  ;;  %v2303_v24 = vpack.c.bf16 %v1147_v22, %v1145_v60  ;;  %v1150_v60 = vld [vmem:[#allocation20 + $0x8] sm:$0xff] }
 0x656   :  { %v2409_v28 = vpack.i.bf16 %v1148_v23, %v1146_v16  ;;  %v2301_v29 = vpack.c.bf16 %v1148_v23, %v1146_v16  ;;  %v2424_v46 = vpack.i.bf16 %v1148_v23, %v1147_v22 }
 0x657   :  { %2415 = vrot.lane.b32.xlu0 %v2414_v15, %s2906_s25 }
 0x658   :  { %2410 = vrot.lane.b32.xlu1 %v2409_v28, %s2906_s25  ;;  %2302 = vmatprep.subr.bf16.mxu1 %v2301_v29 }
 0x659   :  { %2304 = vmatpush1.bf16.msra.mxu1 %v2303_v24 }
 0x65b   :  { %2425 = vrot.lane.b32.xlu0 %v2424_v46, %s2905_s16 }
 0x65c   :  { %2420 = vrot.lane.b32.xlu1 %v2419_v21, %s2905_s16  ;;  %2067 = vmatmul.mubr.msk.f32.vlgmr.msra.gmra.mrb[8].mxu1 %vm858_vm15, %v1178_v33 }
 0x65d   :  { %1256 = vmatprep.mubr.f32.mxu1 %v2903_v0 }
 0x65f   :  { %1467 = vperm.xlu0 %2407, %v1459_v34  }
 0x660   :  { %1462 = vperm.xlu1 %2408, %v1458_v40   ;;  %2068 = vmatmul.mubr.msk.f32.gmra.mrb[10].mxu1 %vm858_vm15, %v1179_v41 }
 0x661   :  { %1333 = vmatprep.mubr.f32.mxu1 %v2903_v0 }
 0x663   :  { %1850 = vperm.xlu0 %2407, %v1475_v52  }
 0x664   :  { %1845 = vperm.xlu1 %2408, %v1474_v55  }
 0x667   :  { %1864 = vperm.xlu0 %2407, %v1477_v56  }
 0x668   :  { %1859 = vperm.xlu1 %2408, %v1476_v57  }
 0x66b   :  { %1922 = vperm.xlu0 %2407, %v1914_v13  }
 0x66c   :  { %1917 = vperm.xlu1 %2408, %v1913_v17  }
 0x6c9   :  { %v2416_v18 = vpop.permute.xlu0 %2415 }
 0x6ca   :  { %v2418_v25 = vunpack.i.h.bf16 %v2416_v18  ;;  %v2417_v26 = vunpack.i.l.bf16 %v2416_v18  ;;  %v2411_v31 = vpop.permute.xlu1 %2410 }
 0x6cb   :  { %v2413_v32 = vunpack.i.h.bf16 %v2411_v31  ;;  %v2412_v37 = vunpack.i.l.bf16 %v2411_v31 }
 0x6cd   :  { %v1166_v38 = vsel %vm342_vm9, %v2418_v25, %v2413_v32  ;;  %v1172_v43 = vsel %vm342_vm9, %v2413_v32, %v2418_v25  ;;  %v1165_v44 = vsel %vm342_vm9, %v2417_v26, %v2412_v37  ;;  %v1171_v49 = vsel %vm342_vm9, %v2412_v37, %v2417_v26  ;;  %v2426_v50 = vpop.permute.xlu0 %2425  ;;  %v1912_v26 = vld [vmem:[#allocation26 + $0x8] sm:$0xff] }
 0x6ce   :  { %v2305_v53 = vpack.c.bf16 %v1166_v38, %v1165_v44  ;;  %v2308_v27 = vpack.c.bf16 %v1172_v43, %v1171_v49  ;;  %v2428_v30 = vunpack.i.h.bf16 %v2426_v50  ;;  %v2427_v58 = vunpack.i.l.bf16 %v2426_v50  ;;  %v2421_v59 = vpop.permute.xlu1 %2420 }
 0x6cf   :  { %v2423_v61 = vunpack.i.h.bf16 %v2421_v59  ;;  %v2422_v5 = vunpack.i.l.bf16 %v2421_v59 }
 0x6d0   :  { %v1358_v39 = vsel %vm548_vm8, %v2427_v58, %v2428_v30  ;;  %v1366_v8 = vsel %vm548_vm8, %v2428_v30, %v2427_v58  ;;  %2307 = vmatprep.subr.msk.bf16.mxu1 %vm2306_vm2, %v2305_v53 }
 0x6d1   :  { %v1357_v63 = vsel %vm548_vm8, %v2422_v5, %v2423_v61  ;;  %v1365_v36 = vsel %vm548_vm8, %v2423_v61, %v2422_v5  ;;  %2310 = vmatpush1.bf16.msk.msra.mxu1 %vm2309_vm3, %v2308_v27 }
 0x6d2   :  { %v2311_v1 = vpack.c.bf16 %v1366_v8, %v1365_v36  ;;  %v2314_v9 = vpack.c.bf16 %v1358_v39, %v1357_v63 }
 0x6d4   :  { %2073 = vmatmul.mubr.msk.f32.vlgmr.msra.gmra.mrb[8].mxu1 %vm858_vm15, %v1149_v62  ;;  %2313 = vmatprep.subr.msk.bf16.mxu1 %vm2312_vm4, %v2311_v1 }
 0x6d5   :  { %2316 = vmatpush1.bf16.msk.msra.mxu1 %vm2315_vm5, %v2314_v9  ;;  %1339 = vmatprep.mubr.f32.mxu1 %v2903_v0 }
 0x6d8   :  { %2074 = vmatmul.mubr.msk.f32.gmra.mrb[10].mxu1 %vm858_vm15, %v1150_v60 }
 0x6d9   :  { %1441 = vmatprep.mubr.f32.mxu1 %v2903_v0 }
 0x6dc   :  { %2079 = vmatmul.mubr.msk.f32.vlgmr.msra.gmra.mrb[8].mxu1 %vm858_vm15, %v1347_v4 }
 0x6dd   :  { %1447 = vmatprep.mubr.f32.mxu1 %v2903_v0 }
 0x6de   :  { %v1468_v20 = vpop.permute.xlu0 %1467 }
 0x6df   :  { %v1463_v11 = vpop.permute.xlu1 %1462 }
 0x6e0   :  { %2080 = vmatmul.mubr.msk.f32.gmra.mrb[10].mxu1 %vm858_vm15, %v1348_v6 }
 0x6e1   :  { %2247 = vmatprep.mubr.msk.f32.mxu1 %vm858_vm15, %v3428_v14 }
 0x6e2   :  { %v1851_v1 = vpop.permute.xlu0 %1850 }
 0x6e3   :  { %v1846_v5 = vpop.permute.xlu1 %1845 }
 0x7af   :  { %v1443_v10 = vpop.f32.mrb[8].mxu1 }
 0x7b0   :  { %v1445_v7 = vpop.f32.mrb[9].mxu1  ;;  %v3517_v19 = vadd.f32 %v1463_v11, %v1443_v10 }
 0x7b1   :  { %v3515_v16 = vadd.f32 %v1463_v11, %v1445_v7 }
 0x7b2   :  { %v1478_v15 = vmul.f32 %v3517_v19, %v3517_v19 }
 0x7b3   :  { %v1449_v45 = vpop.f32.mrb[10].mxu1  ;;  %1546 = vmatprep.mubr.f32.mxu0 %v3515_v16  ;;  %v1479_v14 = vmul.f32 %v3515_v16, %v3515_v16 }
 0x7b4   :  { %v1451_v21 = vpop.f32.mrb[11].mxu1  ;;  %1547 = vmatmul.mubr.f32.vlgmr.msra.gmra.mrb[18].mxu0 %v3517_v19  ;;  %v3523_v23 = vadd.f32 %v1468_v20, %v1449_v45 }
 0x7b5   :  { %v3521_v22 = vadd.f32 %v1468_v20, %v1451_v21 }
 0x7b6   :  { %v1480_v28 = vmul.f32 %v3523_v23, %v3523_v23 }
 0x7b7   :  { %1551 = vmatprep.mubr.f32.mxu0 %v3521_v22  ;;  %v1481_v24 = vmul.f32 %v3521_v22, %v3521_v22 }
 0x7b8   :  { %1552 = vmatmul.mubr.f32.gmra.mrb[20].mxu0 %v3523_v23 }
 0x7b9   :  { %1556 = vmatprep.mubr.f32.mxu0 %v1479_v14 }
 0x7bc   :  { %1557 = vmatmul.mubr.f32.gmra.mrb[22].mxu0 %v1478_v15  ;;  %v1865_v15 = vpop.permute.xlu0 %1864 }
 0x7bd   :  { %1561 = vmatprep.mubr.f32.mxu0 %v1481_v24 }
 0x7c0   :  { %1562 = vmatmul.mubr.f32.gmra.mrb[24].mxu0 %v1480_v28 }
 0x7c1   :  { %2240 = vmatprep.mubr.msk.f32.mxu0 %vm769_vm14, %v3420_v54  ;;  %v1911_v54 = vld [vmem:[#allocation26] sm:$0xff] }
 0x887   :  { %v2187_v29 = vpop.f32.mrb[18].mxu0 }
 0x888   :  { %v2188_v46 = vpop.f32.mrb[19].mxu0 }
 0x889   :  { %v2189_v33 = vadd.f32 %v2188_v46, %v2187_v29 }
 0x88b   :  { %v2190_v34 = vpop.f32.mrb[20].mxu0 }
 0x88c   :  { %v2191_v40 = vpop.f32.mrb[21].mxu0 }
 0x88d   :  { %v2192_v41 = vadd.f32 %v2191_v40, %v2190_v34 }
 0x88f   :  { %v2349_v52 = vpack.c.bf16 %v2192_v41, %v2189_v33  ;;  %v2193_v55 = vpop.f32.mrb[22].mxu0 }
 0x890   :  { %v2194_v56 = vpop.f32.mrb[23].mxu0 }
 0x891   :  { %v2195_v57 = vadd.f32 %v2194_v56, %v2193_v55  ;;  %2350 = vmatprep.subr.bf16.mxu0 %v2349_v52 }
 0x892   :  { %2352 = vmatpush3.bf16.msra.mxu0 %v2349_v52 }
 0x893   :  { %v2196_v13 = vpop.f32.mrb[24].mxu0 }
 0x894   :  { %v2197_v17 = vpop.f32.mrb[25].mxu0 }
 0x895   :  { %v2198_v18 = vadd.f32 %v2197_v17, %v2196_v13 }
 0x897   :  { %v2353_v25 = vpack.c.bf16 %v2198_v18, %v2195_v57 }
 0x899   :  { %2354 = vmatprep.subr.bf16.mxu0 %v2353_v25 }
 0x89a   :  { %2356 = vmatpush3.bf16.msra.mxu0 %v2353_v25 }
 0x89b   :  { %2095 = vmatprep.subr.msk.mxu0 %vm370_vm0, %v3296_v3 }
 0x89d   :  { %2241 = vmatmul.mubr.msk.f32.vlgmr.msra.gmra.mrb[26].mxu0 %vm769_vm14, %v3424_v12 }
 0x89e   :  { %2096 = vmatpush1.msk.msra.mxu0 %vm370_vm0, %v3292_v2  ;;  %1995 = vmatprep.mubr.f32.mxu0 %v2903_v0 }
 0x8a1   :  { %2097 = vmatmul.mubr.msk.f32.vlgmr.msra.gmra.mrb[28].mxu0 %vm363_vm1, %v1911_v54 }
 0x8a2   :  { %2001 = vmatprep.mubr.f32.mxu0 %v2903_v0 }
 0x8a5   :  { %2098 = vmatmul.mubr.msk.f32.gmra.mrb[30].mxu0 %vm363_vm1, %v1912_v26 }
 0x970   :  { %v2242_v31 = vpop.f32.mrb[26].mxu0 }
 0x971   :  { %v1633_v32 = vpop.f32.mrb[27].mxu0  ;;  %v1643_v3 = vmul.f32 0.03125, %v2242_v31 }
 0x972   :  { %v1642_v37 = vmul.f32 0.03125, %v1633_v32 }
 0x974   :  { %v1644_v38 = vmul.f32 %v1642_v37, %v1642_v37  ;;  %v3547_v43 = vpop.f32.mrb[28].mxu0 }
 0x975   :  { %v3549_v12 = vpop.f32.mrb[29].mxu0 }
 0x976   :  { %v1645_v2 = vsub.f32 %v1643_v3, %v1644_v38 }
 0x978   :  { %v1646_v44 = vmax.f32 %v1645_v2, 0.0  ;;  %v3551_v49 = vpop.f32.mrb[30].mxu0 }
 0x979   :  { %v3553_v50 = vpop.f32.mrb[31].mxu0 }
 0x97a   :  { %v1647_v53 = vadd.f32 1e-05, %v1646_v44 }
 0x97c   :  { %2448 = vrsqrt.f32 %v1647_v53 }
 0x986   :  { %v2449_v27 = vpop.eup %2448 }
 0x987   :  { %v2357_v30 = vpack.c.bf16 %v2449_v27, %v1642_v37 }
 0x989   :  { %2358 = vmatprep.subr.bf16.mxu1 %v2357_v30 }
 0x98a   :  { %2360 = vmatpush3.bf16.msra.mxu1 %v2357_v30 }
 0x98b   :  { %2362 = vmatprep.subr.bf16.mxu1 %v3432_v35 }
 0x98d   :  { %2248 = vmatmul.mubr.msk.f32.vlgmr.msra.gmra.mrb[12].mxu1 %vm858_vm15, %v3434_v42 }
 0x98e   :  { %2250 = vmatprep.mubr.msk.f32.mxu1 %vm858_vm15, %v3438_v48  ;;  %2364 = vmatpush1.bf16.msra.mxu1 %v3436_v47 }
 0x991   :  { %2251 = vmatmul.mubr.msk.f32.gmra.mrb[14].mxu1 %vm858_vm15, %v3445_v51 }
 0x992   :  { %1810 = vmatprep.mubr.f32.mxu1 %v2903_v0 }
 0xa60   :  { %v2249_v58 = vpop.f32.mrb[12].mxu1 }
 0xa61   :  { %v1715_v59 = vpop.f32.mrb[13].mxu1 }
 0xa62   :  { %2087 = vmatmul.mubr.msk.f32.vlgmr.msra.gmra.mrb[16].mxu1 %vm858_vm15, %v1715_v59 }
 0xa63   :  { %1816 = vmatprep.mubr.f32.mxu1 %v2903_v0 }
 0xa64   :  { %v2252_v35 = vpop.f32.mrb[14].mxu1 }
 0xa65   :  { %v1725_v61 = vpop.f32.mrb[15].mxu1 }
 0xa66   :  { %2088 = vmatmul.mubr.msk.f32.gmra.mrb[18].mxu1 %vm858_vm15, %v2249_v58 }
 0xa67   :  { %1822 = vmatprep.mubr.f32.mxu1 %v2903_v0 }
 0xa6a   :  { %2089 = vmatmul.mubr.msk.f32.gmra.mrb[20].mxu1 %vm858_vm15, %v1725_v61 }
 0xa6b   :  { %1828 = vmatprep.mubr.f32.mxu1 %v2903_v0  ;;  %v1860_v0 = vpop.permute.xlu1 %1859 }
 0xa6e   :  { %2090 = vmatmul.mubr.msk.f32.gmra.mrb[22].mxu1 %vm858_vm15, %v2252_v35 }
 0xa6f   :  { %v1918_v59 = vpop.permute.xlu1 %1917 }
 0xb35   :  { %v1812_v42 = vpop.f32.mrb[16].mxu1 }
 0xb36   :  { %v1814_v47 = vpop.f32.mrb[17].mxu1  ;;  %v1835_v39 = vsub.f32 %v3517_v19, %v1812_v42 }
 0xb37   :  { %v1836_v8 = vsub.f32 %v3515_v16, %v1814_v47  ;;  %v1998_v47 = vadd.f32 %v3547_v43, %v1918_v59 }
 0xb39   :  { %v1818_v48 = vpop.f32.mrb[18].mxu1 }
 0xb3a   :  { %v1820_v51 = vpop.f32.mrb[19].mxu1  ;;  %v1837_v60 = vsub.f32 %v3523_v23, %v1818_v48 }
 0xb3b   :  { %v1838_v6 = vsub.f32 %v3521_v22, %v1820_v51  ;;  %v2000_v51 = vadd.f32 %v3549_v12, %v1918_v59 }
 0xb3d   :  { %v1824_v63 = vpop.f32.mrb[20].mxu1 }
 0xb3e   :  { %v1839_v36 = vmul.f32 %v1835_v39, %v1824_v63  ;;  %v1826_v62 = vpop.f32.mrb[21].mxu1 }
 0xb3f   :  { %v1840_v9 = vmul.f32 %v1836_v8, %v1826_v62 }
 0xb40   :  { %v1853_v4 = vmul.f32 %v1846_v5, %v1839_v36  ;;  %v1923_v36 = vpop.permute.xlu0 %1922 }
 0xb41   :  { %v1854_v10 = vmul.f32 %v1846_v5, %v1840_v9  ;;  %v1830_v11 = vpop.f32.mrb[22].mxu1 }
 0xb42   :  { %v1867_v7 = vadd.f32 %v1860_v0, %v1853_v4  ;;  %v1841_v45 = vmul.f32 %v1837_v60, %v1830_v11  ;;  %v1832_v20 = vpop.f32.mrb[23].mxu1  ;;  %v2004_v60 = vadd.f32 %v3551_v49, %v1923_v36 }
 0xb43   :  { %v1868_v21 = vadd.f32 %v1860_v0, %v1854_v10  ;;  %v1842_v19 = vmul.f32 %v1838_v6, %v1832_v20  ;;  %v2006_v0 = vadd.f32 %v3553_v50, %v1923_v36 }
 0xb44   :  { %v1871_v14 = vmin.f32 %v1867_v7, 20.0  ;;  %v1855_v16 = vmul.f32 %v1851_v1, %v1841_v45 }
 0xb45   :  { %v1872_v24 = vmin.f32 %v1868_v21, 20.0  ;;  %v1856_v28 = vmul.f32 %v1851_v1, %v1842_v19 }
 0xb46   :  { %v1875_v29 = vmul.f32 1.442695, %v1871_v14  ;;  %v1869_v46 = vadd.f32 %v1865_v15, %v1855_v16 }
 0xb47   :  { %v1877_v33 = vmul.f32 1.442695, %v1872_v24  ;;  %v1870_v23 = vadd.f32 %v1865_v15, %v1856_v28 }
 0xb48   :  { %2450 = vpow2.f32 %v1875_v29  ;;  %v1873_v34 = vmin.f32 %v1869_v46, 20.0 }
 0xb49   :  { %2452 = vpow2.f32 %v1877_v33  ;;  %v1874_v22 = vmin.f32 %v1870_v23, 20.0 }
 0xb4a   :  { %v1879_v40 = vmul.f32 1.442695, %v1873_v34 }
 0xb4b   :  { %v1881_v41 = vmul.f32 1.442695, %v1874_v22 }
 0xb4c   :  { %2454 = vpow2.f32 %v1879_v40 }
 0xb4d   :  { %2456 = vpow2.f32 %v1881_v41 }
 0xb52   :  { %v2451_v52 = vpop.eup %2450 }
 0xb53   :  { %v2453_v55 = vpop.eup %2452  ;;  %v1883_v56 = vadd.f32 1.0, %v2451_v52 }
 0xb54   :  { %v1884_v57 = vadd.f32 1.0, %v2453_v55 }
 0xb55   :  { %v1887_v13 = vmul.f32 %v1883_v56, %v1883_v56 }
 0xb56   :  { %v2455_v17 = vpop.eup %2454  ;;  %v1888_v18 = vmul.f32 %v1884_v57, %v1884_v57 }
 0xb57   :  { %v2457_v25 = vpop.eup %2456  ;;  %v1899_v54 = vadd.f32 1.0, %v1887_v13  ;;  %v1885_v26 = vadd.f32 1.0, %v2455_v17  ;;  %v2091_v44 = vadd.f32 -1.0, %v1887_v13 }
 0xb58   :  { %v1900_v31 = vadd.f32 1.0, %v1888_v18  ;;  %v1886_v32 = vadd.f32 1.0, %v2457_v25  ;;  %v2092_v53 = vadd.f32 -1.0, %v1888_v18 }
 0xb59   :  { %2458 = vrcp.f32 %v1899_v54  ;;  %v1889_v37 = vmul.f32 %v1885_v26, %v1885_v26  ;;  %v1895_v27 = vmul.f32 %v2091_v44, %v1867_v7 }
 0xb5a   :  { %2460 = vrcp.f32 %v1900_v31  ;;  %v1890_v3 = vmul.f32 %v1886_v32, %v1886_v32  ;;  %v1896_v35 = vmul.f32 %v2092_v53, %v1868_v21 }
 0xb5b   :  { %v1901_v38 = vadd.f32 1.0, %v1889_v37  ;;  %v2093_v30 = vadd.f32 -1.0, %v1889_v37 }
 0xb5c   :  { %v1902_v2 = vadd.f32 1.0, %v1890_v3  ;;  %v2094_v61 = vadd.f32 -1.0, %v1890_v3 }
 0xb5d   :  { %2462 = vrcp.f32 %v1901_v38  ;;  %v1897_v39 = vmul.f32 %v2093_v30, %v1869_v46 }
 0xb5e   :  { %2464 = vrcp.f32 %v1902_v2  ;;  %v1898_v62 = vmul.f32 %v2094_v61, %v1870_v23 }
 0xb63   :  { %v2459_v58 = vpop.eup %2458 }
 0xb64   :  { %v2461_v42 = vpop.eup %2460  ;;  %v1904_v48 = vmul.f32 %v2459_v58, %v1895_v27 }
 0xb65   :  { %v1906_v5 = vmul.f32 %v2461_v42, %v1896_v35 }
 0xb66   :  { %v2008_v8 = vadd.f32 %v1998_v47, %v1904_v48 }
 0xb67   :  { %v2463_v63 = vpop.eup %2462  ;;  %v2009_v1 = vadd.f32 %v2000_v51, %v1906_v5 }
 0xb68   :  { %v2465_v9 = vpop.eup %2464  ;;  %v1908_v4 = vmul.f32 %v2463_v63, %v1897_v39  ;;  %2012 = vst [vmem:[#allocation29] sm:$0xff] %v2008_v8 }
 0xb69   :  { %v1910_v43 = vmul.f32 %v2465_v9, %v1898_v62  ;;  %2013 = vst [vmem:[#allocation29 + $0x8] sm:$0xff] %v2009_v1 }
 0xb6a   :  { %v2010_v6 = vadd.f32 %v2004_v60, %v1908_v4 }
 0xb6b   :  { %v2011_v12 = vadd.f32 %v2006_v0, %v1910_v43 }
 0xb6c   :  { %2014 = vst [vmem:[#allocation29 + $0x10] sm:$0xff] %v2010_v6 }
 0xb6d   :  { %2015 = vst [vmem:[#allocation29 + $0x18] sm:$0xff] %v2011_v12 }
 0xb6e   :  { %2851 = shalt.err (!%p2848_p0)
}
 0xb6f   :  { %s3626_s0 = sld [smem:[#allocation42_spill]] }
 0xb75   :  { %s2852_s18 = scalar_lea.hbm %s3626_s0, 512 }
 0xb76   :  { %p2853_p1 = scmp.ne.s32.totalorder %s3626_s0, %s2852_s18  ;;  %p2856_p2 = scmp.lt.u32.totalorder %s2852_s18, %s3626_s0 }
 0xb78   :  { %p2858_p3 = pnand %p2856_p2, %p2853_p1 }
 0xb7a   :  { %2861 = shalt.err (!%p2858_p3)
}
 0xb7b   :  { %2027 = dma.vmem_to_hbm [thread:$0]  %s2022_s3, 512, %s3626_s0, [#allocation4], %s3625_s20, %s3625_s20, %s3624_s5  }
 0xb7c   :  { %2880 = dma.done.wait [#allocation4], 512  }
 0xb7d   :  { %2881 = vsyncadd [#allocation4], 4294966784 }
 0xb7e   :  { %2031 = vsyncpa [#allocation3], 1 }
 0xb7f   :  { %2032 = vsyncpa [#allocation6], 1 }
 0xb80   :  { %2033 = vsyncpa [#allocation9], 1 }
 0xb81   :  { %2034 = vsyncpa [#allocation12], 1 }
 0xb82   :  { %2035 = vsyncpa [#allocation15], 1 }
 0xb83   :  { %2036 = vsyncpa [#allocation18], 1 }
 0xb84   :  { %2037 = vsyncpa [#allocation21], 1 }
 0xb85   :  { %2038 = vsyncpa [#allocation24], 1 }
 0xb86   :  { %2039 = vsyncpa [#allocation27], 1 }
 0xb87   :  { %2040 = vsyncpa [#allocation4], 1 }

// kernel: tpu_custom_call.1
= control target key start
LH: loop header
LB: loop body
LE: loop exit
PB: predicated region body
PF: predicated region fallthrough
CT: control target
= control target key end

     0   :  { %s3594_s0 = inlined_call_operand.hbm [shape: f32[4,256], index: 0, kind: input, shape index: {}]   ;;  %s3595_s1 = inlined_call_operand.hbm [shape: f32[32,256], index: 1, kind: input, shape index: {}]   ;;  %s3596_s2 = inlined_call_operand.hbm [shape: s32[1,256], index: 2, kind: input, shape index: {}]   ;;  %s3597_s3 = inlined_call_operand.hbm [shape: f32[256,16], index: 3, kind: input, shape index: {}]   ;;  %s3598_s4 = inlined_call_operand.hbm [shape: f32[16,256], index: 4, kind: input, shape index: {}]   ;;  %s3599_s5 = inlined_call_operand.hbm [shape: f32[16,32], index: 5, kind: input, shape index: {}]   ;;  %s3600_s6 = inlined_call_operand.hbm [shape: f32[32,16], index: 6, kind: input, shape index: {}]   ;;  %s3601_s7 = inlined_call_operand.hbm [shape: f32[3,16,4], index: 7, kind: input, shape index: {}]   ;;  %s3602_s8 = inlined_call_operand.hbm [shape: f32[16,1], index: 8, kind: input, shape index: {}]   ;;  %s3603_s9 = inlined_call_operand.hbm [shape: f32[16,1], index: 9, kind: input, shape index: {}]   ;;  %s3604_s10 = inlined_call_operand.hbm [shape: f32[16,1], index: 10, kind: input, shape index: {}]   ;;  %s3605_s11 = inlined_call_operand.hbm [shape: f32[3,16,16], index: 11, kind: input, shape index: {}]   ;;  %s3606_s12 = inlined_call_operand.hbm [shape: f32[16,1], index: 12, kind: input, shape index: {}]   ;;  %s3607_s13 = inlined_call_operand.hbm [shape: f32[16,1], index: 13, kind: input, shape index: {}]   ;;  %s3608_s14 = inlined_call_operand.hbm [shape: f32[16,1], index: 14, kind: input, shape index: {}]   ;;  %s3609_s15 = inlined_call_operand.hbm [shape: f32[16,4], index: 15, kind: input, shape index: {}]   ;;  %s3610_s16 = inlined_call_operand.hbm [shape: f32[16,1], index: 16, kind: input, shape index: {}]   ;;  %s3611_s17 = inlined_call_operand.hbm [shape: f32[16,256], index: 17, kind: output, shape index: {}]  }
   0x1   :  { %3619 = sst [smem:[#allocation40_spill]] %s3594_s0 }
   0x2   :  { %3620 = sst [smem:[#allocation41_spill]] %s3595_s1 }
   0x3   :  { %3621 = sst [smem:[#allocation42_spill]] %s3611_s17 }
   0x4   :  { %22 = vsyncpa [#allocation3], 0 }
   0x5   :  { %23 = vsyncpa [#allocation6], 0 }
   0x6   :  { %24 = vsyncpa [#allocation9], 0 }
   0x7   :  { %25 = vsyncpa [#allocation12], 0 }
   0x8   :  { %26 = vsyncpa [#allocation15], 0 }
   0x9   :  { %27 = vsyncpa [#allocation18], 0 }
   0xa   :  { %28 = vsyncpa [#allocation21], 0 }
   0xb   :  { %29 = vsyncpa [#allocation24], 0 }
   0xc   :  { %30 = vsyncpa [#allocation27], 0 }
   0xd   :  { %31 = vsyncpa [#allocation4], 0  ;;  %s2882_s24 = smov [#allocation5]   ;;  %s3622_s28 = sld [smem:[#allocation41_spill]] }
   0xe   :  { %s47_s25 = sshll.u32 %s2882_s24, 4  ;;  %s48_s25 = int_to_ptr.vmem [resolvable:$true] %s47_s25 }
  0x13   :  { %s2466_s29 = scalar_lea.hbm %s3622_s28, 1024 }
  0x14   :  { %p2467_p0 = scmp.ne.s32.totalorder %s3622_s28, %s2466_s29  ;;  %p2470_p1 = scmp.lt.u32.totalorder %s2466_s29, %s3622_s28 }
  0x16   :  { %p2472_p2 = pnand %p2470_p1, %p2467_p0 }
  0x18   :  { %2475 = shalt.err (!%p2472_p2)
}
  0x19   :  { %s2476_s1 = scalar_lea.vmem %s48_s25, 1024  ;;  %p2481_p4 = scmp.lt.s32.totalorder %s48_s25, %s48_s25 }
  0x1a   :  { %p2477_p3 = scmp.ne.s32.totalorder %s48_s25, %s2476_s1  ;;  %p2482_p5 = scmp.lt.s32.totalorder %s2476_s1, %s2476_s1 }
  0x1c   :  { %p2483_p6 = por %p2482_p5, %p2481_p4 }
  0x1e   :  { %p2484_p7 = pnand %p2483_p6, %p2477_p3 }
  0x20   :  { %2487 = shalt.err (!%p2484_p7)
}
  0x21   :  { %s3615_s20 = smov 256   ;;  %s3617_s21 = smov 16  }
  0x22   :  { %53 = dma.hbm_to_vmem [thread:$0]  %s3622_s28, 1024, %s48_s25, [#allocation6], %s3615_s20, %s3615_s20, %s3617_s21  }
  0x23   :  { %s2885_s24 = smov [#allocation8]   ;;  %s2488_s0 = scalar_lea.hbm %s3597_s3, 4096 }
  0x24   :  { %s69_s26 = sshll.u32 %s2885_s24, 4  ;;  %p2489_p8 = scmp.ne.s32.totalorder %s3597_s3, %s2488_s0  ;;  %s70_s26 = int_to_ptr.vmem [resolvable:$true] %s69_s26 }
  0x25   :  { %p2492_p9 = scmp.lt.u32.totalorder %s2488_s0, %s3597_s3 }
  0x27   :  { %p2494_p10 = pnand %p2492_p9, %p2489_p8 }
  0x29   :  { %2497 = shalt.err (!%p2494_p10)
}
  0x2a   :  { %s2498_s17 = scalar_lea.vmem %s70_s26, 4096  ;;  %p2503_p12 = scmp.lt.s32.totalorder %s70_s26, %s70_s26 }
  0x2b   :  { %p2499_p11 = scmp.ne.s32.totalorder %s70_s26, %s2498_s17  ;;  %p2504_p13 = scmp.lt.s32.totalorder %s2498_s17, %s2498_s17 }
  0x2d   :  { %p2505_p0 = por %p2504_p13, %p2503_p12 }
  0x2f   :  { %p2506_p1 = pnand %p2505_p0, %p2499_p11 }
  0x31   :  { %2509 = shalt.err (!%p2506_p1)
}
  0x32   :  { %s2886_s25 = smov 128   ;;  %s2887_s28 = smov 8  }
  0x33   :  { %75 = dma.hbm_to_vmem [thread:$0]  %s3597_s3, 4096, %s70_s26, [#allocation9], %s2886_s25, %s2886_s25, %s2887_s28  }
  0x34   :  { %s2888_s24 = smov [#allocation11]   ;;  %s2889_s29 = smov [#allocation14]  }
  0x35   :  { %s93_s27 = sshll.u32 %s2888_s24, 4  ;;  %s117_s0 = sshll.u32 %s2889_s29, 4  ;;  %s94_s27 = int_to_ptr.vmem [resolvable:$true] %s93_s27  ;;  %s3028_s0 = int_to_ptr.vmem [resolvable:$true] %s117_s0 }
  0x36   :  { %s2510_s18 = scalar_lea.hbm %s3599_s5, 256 }
  0x37   :  { %p2511_p2 = scmp.ne.s32.totalorder %s3599_s5, %s2510_s18  ;;  %p2514_p3 = scmp.lt.u32.totalorder %s2510_s18, %s3599_s5 }
  0x39   :  { %p2516_p4 = pnand %p2514_p3, %p2511_p2 }
  0x3b   :  { %2519 = shalt.err (!%p2516_p4)
}
  0x3c   :  { %s2520_s3 = scalar_lea.vmem %s94_s27, 256  ;;  %p2525_p6 = scmp.lt.s32.totalorder %s94_s27, %s94_s27 }
  0x3d   :  { %p2521_p5 = scmp.ne.s32.totalorder %s94_s27, %s2520_s3  ;;  %p2526_p7 = scmp.lt.s32.totalorder %s2520_s3, %s2520_s3 }
  0x3f   :  { %p2527_p8 = por %p2526_p7, %p2525_p6 }
  0x41   :  { %p2528_p9 = pnand %p2527_p8, %p2521_p5 }
  0x43   :  { %2531 = shalt.err (!%p2528_p9)
}
  0x44   :  { %99 = dma.hbm_to_vmem [thread:$0]  %s3599_s5, 256, %s94_s27, [#allocation12], %s2886_s25, %s2886_s25, %s2887_s28  }
  0x45   :  { %s2532_s20 = scalar_lea.hbm %s3601_s7, 768 }
  0x46   :  { %p2533_p10 = scmp.ne.s32.totalorder %s3601_s7, %s2532_s20  ;;  %p2536_p11 = scmp.lt.u32.totalorder %s2532_s20, %s3601_s7 }
  0x48   :  { %p2538_p12 = pnand %p2536_p11, %p2533_p10 }
  0x4a   :  { %2541 = shalt.err (!%p2538_p12)
}
  0x4b   :  { %s2542_s18 = scalar_lea.vmem %s3028_s0, 768  ;;  %p2547_p0 = scmp.lt.s32.totalorder %s3028_s0, %s3028_s0 }
  0x4c   :  { %p2543_p13 = scmp.ne.s32.totalorder %s3028_s0, %s2542_s18  ;;  %p2548_p1 = scmp.lt.s32.totalorder %s2542_s18, %s2542_s18 }
  0x4e   :  { %p2549_p2 = por %p2548_p1, %p2547_p0 }
  0x50   :  { %p2550_p3 = pnand %p2549_p2, %p2543_p13 }
  0x52   :  { %2553 = shalt.err (!%p2550_p3)
}
  0x53   :  { %123 = dma.hbm_to_vmem [thread:$0]  %s3601_s7, 768, %s3028_s0, [#allocation15], %s2886_s25, %s2886_s25, %s2887_s28  }
  0x54   :  { %s2890_s19 = smov [#allocation17]   ;;  %s2891_s3 = smov [#allocation20]  }
  0x55   :  { %s141_s1 = sshll.u32 %s2890_s19, 4  ;;  %s165_s26 = sshll.u32 %s2891_s3, 4  ;;  %s142_s1 = int_to_ptr.vmem [resolvable:$true] %s141_s1  ;;  %s3065_s26 = int_to_ptr.vmem [resolvable:$true] %s165_s26 }
  0x56   :  { %s2554_s24 = scalar_lea.hbm %s3603_s9, 256 }
  0x57   :  { %p2555_p4 = scmp.ne.s32.totalorder %s3603_s9, %s2554_s24  ;;  %p2558_p5 = scmp.lt.u32.totalorder %s2554_s24, %s3603_s9 }
  0x59   :  { %p2560_p6 = pnand %p2558_p5, %p2555_p4 }
  0x5b   :  { %2563 = shalt.err (!%p2560_p6)
}
  0x5c   :  { %s2564_s7 = scalar_lea.vmem %s142_s1, 256  ;;  %p2569_p8 = scmp.lt.s32.totalorder %s142_s1, %s142_s1 }
  0x5d   :  { %p2565_p7 = scmp.ne.s32.totalorder %s142_s1, %s2564_s7  ;;  %p2570_p9 = scmp.lt.s32.totalorder %s2564_s7, %s2564_s7 }
  0x5f   :  { %p2571_p10 = por %p2570_p9, %p2569_p8 }
  0x61   :  { %p2572_p11 = pnand %p2571_p10, %p2565_p7 }
  0x63   :  { %2575 = shalt.err (!%p2572_p11)
}
  0x64   :  { %147 = dma.hbm_to_vmem [thread:$0]  %s3603_s9, 256, %s142_s1, [#allocation18], %s2886_s25, %s2886_s25, %s2887_s28  }
  0x65   :  { %s2576_s27 = scalar_lea.hbm %s3605_s11, 768 }
  0x66   :  { %p2577_p12 = scmp.ne.s32.totalorder %s3605_s11, %s2576_s27  ;;  %p2580_p13 = scmp.lt.u32.totalorder %s2576_s27, %s3605_s11 }
  0x68   :  { %p2582_p0 = pnand %p2580_p13, %p2577_p12 }
  0x6a   :  { %2585 = shalt.err (!%p2582_p0)
}
  0x6b   :  { %s2586_s24 = scalar_lea.vmem %s3065_s26, 768  ;;  %p2591_p2 = scmp.lt.s32.totalorder %s3065_s26, %s3065_s26 }
  0x6c   :  { %p2587_p1 = scmp.ne.s32.totalorder %s3065_s26, %s2586_s24  ;;  %p2592_p3 = scmp.lt.s32.totalorder %s2586_s24, %s2586_s24 }
  0x6e   :  { %p2593_p4 = por %p2592_p3, %p2591_p2 }
  0x70   :  { %p2594_p5 = pnand %p2593_p4, %p2587_p1 }
  0x72   :  { %2597 = shalt.err (!%p2594_p5)
}
  0x73   :  { %171 = dma.hbm_to_vmem [thread:$0]  %s3605_s11, 768, %s3065_s26, [#allocation21], %s2886_s25, %s2886_s25, %s2887_s28  }
  0x74   :  { %s2892_s20 = smov [#allocation23]   ;;  %s2893_s29 = smov [#allocation26]  }
  0x75   :  { %s189_s21 = sshll.u32 %s2892_s20, 4  ;;  %s213_s17 = sshll.u32 %s2893_s29, 4  ;;  %s190_s21 = int_to_ptr.vmem [resolvable:$true] %s189_s21  ;;  %s3102_s17 = int_to_ptr.vmem [resolvable:$true] %s213_s17 }
  0x76   :  { %s2598_s30 = scalar_lea.hbm %s3607_s13, 256 }
  0x77   :  { %p2599_p6 = scmp.ne.s32.totalorder %s3607_s13, %s2598_s30  ;;  %p2602_p7 = scmp.lt.u32.totalorder %s2598_s30, %s3607_s13 }
  0x79   :  { %p2604_p8 = pnand %p2602_p7, %p2599_p6 }
  0x7b   :  { %2607 = shalt.err (!%p2604_p8)
}
  0x7c   :  { %s2608_s11 = scalar_lea.vmem %s190_s21, 256  ;;  %p2613_p10 = scmp.lt.s32.totalorder %s190_s21, %s190_s21 }
  0x7d   :  { %p2609_p9 = scmp.ne.s32.totalorder %s190_s21, %s2608_s11  ;;  %p2614_p11 = scmp.lt.s32.totalorder %s2608_s11, %s2608_s11 }
  0x7f   :  { %p2615_p12 = por %p2614_p11, %p2613_p10 }
  0x81   :  { %p2616_p13 = pnand %p2615_p12, %p2609_p9 }
  0x83   :  { %2619 = shalt.err (!%p2616_p13)
}
  0x84   :  { %195 = dma.hbm_to_vmem [thread:$0]  %s3607_s13, 256, %s190_s21, [#allocation24], %s2886_s25, %s2886_s25, %s2887_s28  }
  0x85   :  { %s2620_s24 = scalar_lea.hbm %s3609_s15, 256 }
  0x86   :  { %p2621_p0 = scmp.ne.s32.totalorder %s3609_s15, %s2620_s24  ;;  %p2624_p1 = scmp.lt.u32.totalorder %s2620_s24, %s3609_s15 }
  0x88   :  { %p2626_p2 = pnand %p2624_p1, %p2621_p0 }
  0x8a   :  { %2629 = shalt.err (!%p2626_p2)
}
  0x8b   :  { %s2630_s7 = scalar_lea.vmem %s3102_s17, 256  ;;  %p2635_p4 = scmp.lt.s32.totalorder %s3102_s17, %s3102_s17 }
  0x8c   :  { %p2631_p3 = scmp.ne.s32.totalorder %s3102_s17, %s2630_s7  ;;  %p2636_p5 = scmp.lt.s32.totalorder %s2630_s7, %s2630_s7 }
  0x8e   :  { %p2637_p6 = por %p2636_p5, %p2635_p4 }
  0x90   :  { %p2638_p7 = pnand %p2637_p6, %p2631_p3 }
  0x92   :  { %2641 = shalt.err (!%p2638_p7)
}
  0x93   :  { %219 = dma.hbm_to_vmem [thread:$0]  %s3609_s15, 256, %s3102_s17, [#allocation27], %s2886_s25, %s2886_s25, %s2887_s28  }
  0x94   :  { %s2894_s0 = smov [#allocation2]   ;;  %s2895_s18 = smov [#allocation7]  }
  0x95   :  { %s38_s30 = sshll.u32 %s2894_s0, 4  ;;  %s60_s5 = sshll.u32 %s2895_s18, 4  ;;  %s39_s30 = int_to_ptr.vmem [resolvable:$true] %s38_s30  ;;  %s61_s5 = int_to_ptr.vmem [resolvable:$true] %s60_s5 }
  0x96   :  { %s3623_s11 = sld [smem:[#allocation40_spill]] }
  0x9c   :  { %s2642_s26 = scalar_lea.hbm %s3623_s11, 128 }
  0x9d   :  { %p2643_p8 = scmp.ne.s32.totalorder %s3623_s11, %s2642_s26  ;;  %p2646_p9 = scmp.lt.u32.totalorder %s2642_s26, %s3623_s11 }
  0x9f   :  { %p2648_p10 = pnand %p2646_p9, %p2643_p8 }
  0xa1   :  { %2651 = shalt.err (!%p2648_p10)
}
  0xa2   :  { %s2652_s15 = scalar_lea.vmem %s39_s30, 128  ;;  %p2657_p12 = scmp.lt.s32.totalorder %s39_s30, %s39_s30 }
  0xa3   :  { %p2653_p11 = scmp.ne.s32.totalorder %s39_s30, %s2652_s15  ;;  %p2658_p13 = scmp.lt.s32.totalorder %s2652_s15, %s2652_s15 }
  0xa5   :  { %p2659_p0 = por %p2658_p13, %p2657_p12 }
  0xa7   :  { %p2660_p1 = pnand %p2659_p0, %p2653_p11 }
  0xa9   :  { %2663 = shalt.err (!%p2660_p1)
}
  0xaa   :  { %41 = dma.hbm_to_vmem [thread:$0]  %s3623_s11, 128, %s39_s30, [#allocation3]  }
  0xab   :  { %s2664_s29 = scalar_lea.hbm %s3596_s2, 32 }
  0xac   :  { %p2665_p2 = scmp.ne.s32.totalorder %s3596_s2, %s2664_s29  ;;  %p2668_p3 = scmp.lt.u32.totalorder %s2664_s29, %s3596_s2 }
  0xae   :  { %p2670_p4 = pnand %p2668_p3, %p2665_p2 }
  0xb0   :  { %2673 = shalt.err (!%p2670_p4)
}
  0xb1   :  { %s2674_s18 = scalar_lea.vmem %s61_s5, 32  ;;  %p2679_p6 = scmp.lt.s32.totalorder %s61_s5, %s61_s5 }
  0xb2   :  { %p2675_p5 = scmp.ne.s32.totalorder %s61_s5, %s2674_s18  ;;  %p2680_p7 = scmp.lt.s32.totalorder %s2674_s18, %s2674_s18 }
  0xb4   :  { %p2681_p8 = por %p2680_p7, %p2679_p6 }
  0xb6   :  { %p2682_p9 = pnand %p2681_p8, %p2675_p5 }
  0xb8   :  { %2685 = shalt.err (!%p2682_p9)
}
  0xb9   :  { %63 = dma.hbm_to_vmem [thread:$0]  %s3596_s2, 32, %s61_s5, [#allocation6]  }
  0xba   :  { %s2896_s19 = smov [#allocation10]   ;;  %s2897_s26 = smov [#allocation13]  }
  0xbb   :  { %s81_s11 = sshll.u32 %s2896_s19, 4  ;;  %s105_s3 = sshll.u32 %s2897_s26, 4  ;;  %s82_s11 = int_to_ptr.vmem [resolvable:$true] %s81_s11  ;;  %s3163_s3 = int_to_ptr.vmem [resolvable:$true] %s105_s3 }
  0xbc   :  { %s2686_s24 = scalar_lea.hbm %s3598_s4, 512 }
  0xbd   :  { %p2687_p10 = scmp.ne.s32.totalorder %s3598_s4, %s2686_s24  ;;  %p2690_p11 = scmp.lt.u32.totalorder %s2686_s24, %s3598_s4 }
  0xbf   :  { %p2692_p12 = pnand %p2690_p11, %p2687_p10 }
  0xc1   :  { %2695 = shalt.err (!%p2692_p12)
}
  0xc2   :  { %s2696_s2 = scalar_lea.vmem %s82_s11, 512  ;;  %p2701_p0 = scmp.lt.s32.totalorder %s82_s11, %s82_s11 }
  0xc3   :  { %p2697_p13 = scmp.ne.s32.totalorder %s82_s11, %s2696_s2  ;;  %p2702_p1 = scmp.lt.s32.totalorder %s2696_s2, %s2696_s2 }
  0xc5   :  { %p2703_p2 = por %p2702_p1, %p2701_p0 }
  0xc7   :  { %p2704_p3 = pnand %p2703_p2, %p2697_p13 }
  0xc9   :  { %2707 = shalt.err (!%p2704_p3)
}
  0xca   :  { %s3624_s5 = smov 16   ;;  %s3625_s20 = smov 256  }
  0xcb   :  { %87 = dma.hbm_to_vmem [thread:$0]  %s3598_s4, 512, %s82_s11, [#allocation9], %s3625_s20, %s3625_s20, %s3624_s5  }
  0xcc   :  { %s2708_s0 = scalar_lea.hbm %s3600_s6, 512 }
  0xcd   :  { %p2709_p4 = scmp.ne.s32.totalorder %s3600_s6, %s2708_s0  ;;  %p2712_p5 = scmp.lt.u32.totalorder %s2708_s0, %s3600_s6 }
  0xcf   :  { %p2714_p6 = pnand %p2712_p5, %p2709_p4 }
  0xd1   :  { %2717 = shalt.err (!%p2714_p6)
}
  0xd2   :  { %s2718_s26 = scalar_lea.vmem %s3163_s3, 512  ;;  %p2723_p8 = scmp.lt.s32.totalorder %s3163_s3, %s3163_s3 }
  0xd3   :  { %p2719_p7 = scmp.ne.s32.totalorder %s3163_s3, %s2718_s26  ;;  %p2724_p9 = scmp.lt.s32.totalorder %s2718_s26, %s2718_s26 }
  0xd5   :  { %p2725_p10 = por %p2724_p9, %p2723_p8 }
  0xd7   :  { %p2726_p11 = pnand %p2725_p10, %p2719_p7 }
  0xd9   :  { %2729 = shalt.err (!%p2726_p11)
}
  0xda   :  { %111 = dma.hbm_to_vmem [thread:$0]  %s3600_s6, 512, %s3163_s3, [#allocation12], %s2886_s25, %s2886_s25, %s2887_s28  }
  0xdb   :  { %s2898_s22 = smov [#allocation16]   ;;  %s2899_s24 = smov [#allocation19]  }
  0xdc   :  { %s129_s23 = sshll.u32 %s2898_s22, 4  ;;  %s153_s15 = sshll.u32 %s2899_s24, 4  ;;  %s130_s23 = int_to_ptr.vmem [resolvable:$true] %s129_s23  ;;  %s3200_s15 = int_to_ptr.vmem [resolvable:$true] %s153_s15 }
  0xdd   :  { %s2730_s1 = scalar_lea.hbm %s3602_s8, 256 }
  0xde   :  { %p2731_p12 = scmp.ne.s32.totalorder %s3602_s8, %s2730_s1  ;;  %p2734_p13 = scmp.lt.u32.totalorder %s2730_s1, %s3602_s8 }
  0xe0   :  { %p2736_p0 = pnand %p2734_p13, %p2731_p12 }
  0xe2   :  { %2739 = shalt.err (!%p2736_p0)
}
  0xe3   :  { %s2740_s6 = scalar_lea.vmem %s130_s23, 256  ;;  %p2745_p2 = scmp.lt.s32.totalorder %s130_s23, %s130_s23 }
  0xe4   :  { %p2741_p1 = scmp.ne.s32.totalorder %s130_s23, %s2740_s6  ;;  %p2746_p3 = scmp.lt.s32.totalorder %s2740_s6, %s2740_s6 }
  0xe6   :  { %p2747_p4 = por %p2746_p3, %p2745_p2 }
  0xe8   :  { %p2748_p5 = pnand %p2747_p4, %p2741_p1 }
  0xea   :  { %2751 = shalt.err (!%p2748_p5)
}
  0xeb   :  { %135 = dma.hbm_to_vmem [thread:$0]  %s3602_s8, 256, %s130_s23, [#allocation15], %s2886_s25, %s2886_s25, %s2887_s28  }
  0xec   :  { %s2752_s30 = scalar_lea.hbm %s3604_s10, 256 }
  0xed   :  { %p2753_p6 = scmp.ne.s32.totalorder %s3604_s10, %s2752_s30  ;;  %p2756_p7 = scmp.lt.u32.totalorder %s2752_s30, %s3604_s10 }
  0xef   :  { %p2758_p8 = pnand %p2756_p7, %p2753_p6 }
  0xf1   :  { %2761 = shalt.err (!%p2758_p8)
}
  0xf2   :  { %s2762_s11 = scalar_lea.vmem %s3200_s15, 256  ;;  %p2767_p10 = scmp.lt.s32.totalorder %s3200_s15, %s3200_s15 }
  0xf3   :  { %p2763_p9 = scmp.ne.s32.totalorder %s3200_s15, %s2762_s11  ;;  %p2768_p11 = scmp.lt.s32.totalorder %s2762_s11, %s2762_s11 }
  0xf5   :  { %p2769_p12 = por %p2768_p11, %p2767_p10 }
  0xf7   :  { %p2770_p13 = pnand %p2769_p12, %p2763_p9 }
  0xf9   :  { %2773 = shalt.err (!%p2770_p13)
}
  0xfa   :  { %159 = dma.hbm_to_vmem [thread:$0]  %s3604_s10, 256, %s3200_s15, [#allocation18], %s2886_s25, %s2886_s25, %s2887_s28  }
  0xfb   :  { %s2900_s23 = smov [#allocation22]   ;;  %s2901_s17 = smov [#allocation25]  }
  0xfc   :  { %s177_s24 = sshll.u32 %s2900_s23, 4  ;;  %s201_s9 = sshll.u32 %s2901_s17, 4  ;;  %s178_s24 = int_to_ptr.vmem [resolvable:$true] %s177_s24  ;;  %s3237_s9 = int_to_ptr.vmem [resolvable:$true] %s201_s9 }
  0xfd   :  { %s2774_s29 = scalar_lea.hbm %s3606_s12, 256 }
  0xfe   :  { %p2775_p0 = scmp.ne.s32.totalorder %s3606_s12, %s2774_s29  ;;  %p2778_p1 = scmp.lt.u32.totalorder %s2774_s29, %s3606_s12 }
 0x100   :  { %p2780_p2 = pnand %p2778_p1, %p2775_p0 }
 0x102   :  { %2783 = shalt.err (!%p2780_p2)
}
 0x103   :  { %s2784_s10 = scalar_lea.vmem %s178_s24, 256  ;;  %p2789_p4 = scmp.lt.s32.totalorder %s178_s24, %s178_s24 }
 0x104   :  { %p2785_p3 = scmp.ne.s32.totalorder %s178_s24, %s2784_s10  ;;  %p2790_p5 = scmp.lt.s32.totalorder %s2784_s10, %s2784_s10 }
 0x106   :  { %p2791_p6 = por %p2790_p5, %p2789_p4 }
 0x108   :  { %p2792_p7 = pnand %p2791_p6, %p2785_p3 }
 0x10a   :  { %2795 = shalt.err (!%p2792_p7)
}
 0x10b   :  { %183 = dma.hbm_to_vmem [thread:$0]  %s3606_s12, 256, %s178_s24, [#allocation21], %s2886_s25, %s2886_s25, %s2887_s28  }
 0x10c   :  { %s2796_s30 = scalar_lea.hbm %s3608_s14, 256 }
 0x10d   :  { %p2797_p8 = scmp.ne.s32.totalorder %s3608_s14, %s2796_s30  ;;  %p2800_p9 = scmp.lt.u32.totalorder %s2796_s30, %s3608_s14 }
 0x10f   :  { %p2802_p10 = pnand %p2800_p9, %p2797_p8 }
 0x111   :  { %2805 = shalt.err (!%p2802_p10)
}
 0x112   :  { %s2806_s11 = scalar_lea.vmem %s3237_s9, 256  ;;  %p2811_p12 = scmp.lt.s32.totalorder %s3237_s9, %s3237_s9 }
 0x113   :  { %p2807_p11 = scmp.ne.s32.totalorder %s3237_s9, %s2806_s11  ;;  %p2812_p13 = scmp.lt.s32.totalorder %s2806_s11, %s2806_s11 }
 0x115   :  { %p2813_p0 = por %p2812_p13, %p2811_p12 }
 0x117   :  { %p2814_p1 = pnand %p2813_p0, %p2807_p11 }
 0x119   :  { %2817 = shalt.err (!%p2814_p1)
}
 0x11a   :  { %207 = dma.hbm_to_vmem [thread:$0]  %s3608_s14, 256, %s3237_s9, [#allocation24], %s2886_s25, %s2886_s25, %s2887_s28  }
 0x11b   :  { %s2902_s22 = smov [#allocation28]   ;;  %s2818_s1 = scalar_lea.hbm %s3610_s16, 256 }
 0x11c   :  { %s225_s23 = sshll.u32 %s2902_s22, 4  ;;  %p2819_p2 = scmp.ne.s32.totalorder %s3610_s16, %s2818_s1  ;;  %s226_s23 = int_to_ptr.vmem [resolvable:$true] %s225_s23 }
 0x11d   :  { %p2822_p3 = scmp.lt.u32.totalorder %s2818_s1, %s3610_s16 }
 0x11f   :  { %p2824_p4 = pnand %p2822_p3, %p2819_p2 }
 0x121   :  { %2827 = shalt.err (!%p2824_p4)
}
 0x122   :  { %s2828_s6 = scalar_lea.vmem %s226_s23, 256  ;;  %p2833_p6 = scmp.lt.s32.totalorder %s226_s23, %s226_s23 }
 0x123   :  { %p2829_p5 = scmp.ne.s32.totalorder %s226_s23, %s2828_s6  ;;  %p2834_p7 = scmp.lt.s32.totalorder %s2828_s6, %s2828_s6 }
 0x125   :  { %p2835_p8 = por %p2834_p7, %p2833_p6 }
 0x127   :  { %p2836_p9 = pnand %p2835_p8, %p2829_p5 }
 0x129   :  { %2839 = shalt.err (!%p2836_p9)
}
 0x12a   :  { %231 = dma.hbm_to_vmem [thread:$0]  %s3610_s16, 256, %s226_s23, [#allocation27], %s2886_s25, %s2886_s25, %s2887_s28  }
 0x12b   :  { %2862 = dma.done.wait [#allocation3], 128  }
 0x12c   :  { %2863 = vsyncadd [#allocation3], 4294967168 }
 0x12d   :  { %2864 = dma.done.wait [#allocation6], 1056  }
 0x12e   :  { %2865 = vsyncadd [#allocation6], 4294966240 }
 0x12f   :  { %2866 = dma.done.wait [#allocation9], 4608  }
 0x130   :  { %2867 = vsyncadd [#allocation9], 4294962688 }
 0x131   :  { %2868 = dma.done.wait [#allocation12], 768  }
 0x132   :  { %2869 = vsyncadd [#allocation12], 4294966528 }
 0x133   :  { %2870 = dma.done.wait [#allocation15], 1024  }
 0x134   :  { %2871 = vsyncadd [#allocation15], 4294966272 }
 0x135   :  { %2872 = dma.done.wait [#allocation18], 512  }
 0x136   :  { %2873 = vsyncadd [#allocation18], 4294966784 }
 0x137   :  { %2874 = dma.done.wait [#allocation21], 1024  }
 0x138   :  { %2875 = vsyncadd [#allocation21], 4294966272 }
 0x139   :  { %2876 = dma.done.wait [#allocation24], 512  }
 0x13a   :  { %2877 = vsyncadd [#allocation24], 4294966784 }
 0x13b   :  { %2878 = dma.done.wait [#allocation27], 512  }
 0x13c   :  { %2879 = vsyncadd [#allocation27], 4294966784  ;;  %v2903_v0 = vmov 0.0   ;;  %v2904_v1 = vmov 0   ;;  %v3292_v2 = vld [vmem:[#allocation2] sm:$0xff]  ;;  %vm370_vm0 = vcmask 1043456   ;;  %v348_v55 = vlaneseq }
 0x13d   :  { %439 = vmatprep.mubr.f32.mxu0 %v2903_v0  ;;  %2407 = vset.pattern.permute.xlu0 %v2904_v1  ;;  %v3296_v3 = vcombine.high %v3292_v2, %v3292_v2  ;;  %s2905_s16 = smov 127   ;;  %v361_v4 = vld [vmem:[#allocation14 + $0x10] sm:$0xff]  ;;  %vm363_vm1 = vcmask 31744   ;;  %s2906_s25 = smov 1   ;;  %v362_v5 = vld [vmem:[#allocation14 + $0x18] sm:$0xff]  ;;  %v677_v8 = vld [vmem:[#allocation17 + $0x8] sm:$0xff] }
 0x13e   :  { %2408 = vset.pattern.permute.xlu1 %v2904_v1  ;;  %v660_v6 = vld [vmem:[#allocation16] sm:$0xff]  ;;  %v661_v7 = vld [vmem:[#allocation16 + $0x8] sm:$0xff]  ;;  %v676_v9 = vld [vmem:[#allocation17] sm:$0xff]  ;;  %v349_v56 = vshrl.u32 %v348_v55, 7  ;;  %vm548_vm8 = vcmask 1039360   ;;  %vm342_vm9 = vcmask 7168  }
 0x13f   :  { %544 = vrot.lane.b32.xlu1 %v3292_v2, %s2905_s16  ;;  %337 = vrot.lane.b32.xlu0 %v3296_v3, %s2906_s25  ;;  %v300_v10 = vld [vmem:[#allocation8 + $0x80] sm:$0xff]  ;;  %v301_v11 = vld [vmem:[#allocation8 + $0x88] sm:$0xff]  ;;  %v302_v15 = vld [vmem:[#allocation8 + $0x90] sm:$0xff]  ;;  %vm769_vm14 = vcmask 261120   ;;  %vm858_vm15 = vcmask 130048   ;;  %s2907_s28 = smov [#allocation29]  }
 0x140   :  { %2041 = vmatprep.subr.msk.mxu0 %vm370_vm0, %v3296_v3  ;;  %v284_v12 = vld [vmem:[#allocation8] sm:$0xff]  ;;  %v3314_v13 = vpack.c.bf16 %v301_v11, %v300_v10  ;;  %v285_v14 = vld [vmem:[#allocation8 + $0x8] sm:$0xff]  ;;  %v303_v16 = vld [vmem:[#allocation8 + $0x98] sm:$0xff]  ;;  %v350_v57 = vsub.s32 0, %v349_v56  ;;  %v354_v58 = vsub.s32 1, %v349_v56  ;;  %s2021_s3 = sshll.u32 %s2907_s28, 4  ;;  %s2022_s3 = int_to_ptr.vmem [resolvable:$true] %s2021_s3 }
 0x141   :  { %2042 = vmatpush1.msk.msra.mxu0 %vm370_vm0, %v3292_v2  ;;  %v3316_v17 = vpack.c.bf16 %v285_v14, %v284_v12  ;;  %v3318_v18 = vpack.c.bf16 %v303_v16, %v302_v15  ;;  %v286_v19 = vld [vmem:[#allocation8 + $0x10] sm:$0xff]  ;;  %v287_v20 = vld [vmem:[#allocation8 + $0x18] sm:$0xff]  ;;  %v304_v21 = vld [vmem:[#allocation8 + $0xa0] sm:$0xff]  ;;  %s2840_s10 = scalar_lea.vmem %s2022_s3, 512  ;;  %p2845_p11 = scmp.lt.s32.totalorder %s2022_s3, %s2022_s3 }
 0x142   :  { %2043 = vmatmul.mubr.msk.f32.vlgmr.msra.gmra.mrb[0].mxu0 %vm363_vm1, %v361_v4  ;;  %v305_v22 = vld [vmem:[#allocation8 + $0xa8] sm:$0xff]  ;;  %v678_v24 = vld [vmem:[#allocation19] sm:$0xff]  ;;  %2254 = vmatprep.subr.bf16.mxu1 %v3314_v13  ;;  %v3322_v25 = vpack.c.bf16 %v287_v20, %v286_v19  ;;  %v306_v29 = vld [vmem:[#allocation8 + $0xb0] sm:$0xff]  ;;  %p2841_p10 = scmp.ne.s32.totalorder %s2022_s3, %s2840_s10  ;;  %p2846_p12 = scmp.lt.s32.totalorder %s2840_s10, %s2840_s10 }
 0x143   :  { %546 = vrot.lane.b32.xlu1 %v3296_v3, %s2905_s16  ;;  %445 = vmatprep.mubr.f32.mxu0 %v2903_v0  ;;  %v679_v23 = vld [vmem:[#allocation19 + $0x8] sm:$0xff]  ;;  %v3325_v26 = vpack.c.bf16 %v305_v22, %v304_v21  ;;  %v288_v27 = vld [vmem:[#allocation8 + $0x20] sm:$0xff]  ;;  %v307_v30 = vld [vmem:[#allocation8 + $0xb8] sm:$0xff] }
 0x144   :  { %340 = vrot.lane.b32.xlu0 %v3292_v2, %s2906_s25  ;;  %2256 = vmatpush3.bf16.msra.mxu1 %v3316_v17  ;;  %v289_v28 = vld [vmem:[#allocation8 + $0x28] sm:$0xff]  ;;  %v3331_v32 = vpack.c.bf16 %v307_v30, %v306_v29  ;;  %v290_v33 = vld [vmem:[#allocation8 + $0x30] sm:$0xff]  ;;  %v291_v34 = vld [vmem:[#allocation8 + $0x38] sm:$0xff]  ;;  %p2847_p13 = por %p2846_p12, %p2845_p11 }
 0x145   :  { %2258 = vmatprep.subr.bf16.mxu1 %v3318_v18  ;;  %v3328_v31 = vpack.c.bf16 %v289_v28, %v288_v27  ;;  %v308_v35 = vld [vmem:[#allocation8 + $0xc0] sm:$0xff]  ;;  %v309_v36 = vld [vmem:[#allocation8 + $0xc8] sm:$0xff]  ;;  %v3334_v37 = vpack.c.bf16 %v291_v34, %v290_v33  ;;  %v310_v41 = vld [vmem:[#allocation8 + $0xd0] sm:$0xff] }
 0x146   :  { %2044 = vmatmul.mubr.msk.f32.gmra.mrb[2].mxu0 %vm363_vm1, %v362_v5  ;;  %v3337_v38 = vpack.c.bf16 %v309_v36, %v308_v35  ;;  %v292_v39 = vld [vmem:[#allocation8 + $0x40] sm:$0xff]  ;;  %v293_v40 = vld [vmem:[#allocation8 + $0x48] sm:$0xff]  ;;  %v311_v42 = vld [vmem:[#allocation8 + $0xd8] sm:$0xff]  ;;  %p2848_p0 = pnand %p2847_p13, %p2841_p10 }
 0x147   :  { %528 = vmatprep.mubr.f32.mxu0 %v2903_v0  ;;  %669 = vperm.xlu1 %2408, %v661_v7   ;;  %v3340_v43 = vpack.c.bf16 %v293_v40, %v292_v39  ;;  %v3343_v44 = vpack.c.bf16 %v311_v42, %v310_v41  ;;  %v294_v45 = vld [vmem:[#allocation8 + $0x50] sm:$0xff]  ;;  %v295_v46 = vld [vmem:[#allocation8 + $0x58] sm:$0xff]  ;;  %v312_v47 = vld [vmem:[#allocation8 + $0xe0] sm:$0xff] }
 0x148   :  { %664 = vperm.xlu0 %2407, %v660_v6   ;;  %2260 = vmatpush3.bf16.msra.mxu1 %v3322_v25  ;;  %v313_v48 = vld [vmem:[#allocation8 + $0xe8] sm:$0xff]  ;;  %v3346_v49 = vpack.c.bf16 %v295_v46, %v294_v45  ;;  %v296_v51 = vld [vmem:[#allocation8 + $0x60] sm:$0xff]  ;;  %v283_v54 = vld [vmem:[#allocation7] sm:$0x3] }
 0x149   :  { %2262 = vmatprep.subr.bf16.mxu1 %v3325_v26  ;;  %v3349_v50 = vpack.c.bf16 %v313_v48, %v312_v47  ;;  %v297_v52 = vld [vmem:[#allocation8 + $0x68] sm:$0xff]  ;;  %vm326_vm2 = vcmp.ge.s32.totalorder %v283_v54, 1  ;;  %vm327_vm3 = vcmp.lt.s32.totalorder %v283_v54, 17  ;;  %vm329_vm4 = vcmp.ge.s32.totalorder %v283_v54, 4294967295  ;;  %v333_v16 = vld [vmem:[#allocation14] sm:$0xff]  ;;  %v334_v20 = vld [vmem:[#allocation14 + $0x8] sm:$0xff] }
 0x14a   :  { %v3352_v53 = vpack.c.bf16 %v297_v52, %v296_v51  ;;  %vm330_vm5 = vcmp.lt.s32.totalorder %v283_v54, 15  ;;  %vm328_vm6 = vmand %vm326_vm2, %vm327_vm3  ;;  %v542_v21 = vld [vmem:[#allocation14 + $0x20] sm:$0xff]  ;;  %v543_v22 = vld [vmem:[#allocation14 + $0x28] sm:$0xff] }
 0x14b   :  { %1067 = vperm.xlu1 %2408, %v676_v9   ;;  %vm331_vm7 = vmand %vm329_vm4, %vm330_vm5  ;;  %v347_v59 = vsel %vm328_vm6, 1, %v2904_v1  ;;  %v298_v28 = vld [vmem:[#allocation8 + $0x70] sm:$0xff]  ;;  %v299_v29 = vld [vmem:[#allocation8 + $0x78] sm:$0xff] }
 0x14c   :  { %1072 = vperm.xlu0 %2407, %v677_v8   ;;  %2264 = vmatpush3.bf16.msra.mxu1 %v3328_v31  ;;  %v554_v60 = vsel %vm331_vm7, 1, %v2904_v1  ;;  %v3358_v62 = vrot.slane %v347_v59, %v350_v57  ;;  %v3360_v63 = vrot.slane %v347_v59, %v354_v58  ;;  %v3395_v30 = vpack.c.bf16 %v299_v29, %v298_v28  ;;  %v3420_v54 = vld [vmem:[#allocation11] sm:$0xff]  ;;  %v317_v28 = vld [vmem:[#allocation10 + $0x8] sm:$0xff]  ;;  %v319_v29 = vld [vmem:[#allocation10 + $0x18] sm:$0xff] }
 0x14d   :  { %2266 = vmatprep.subr.bf16.mxu1 %v3331_v32  ;;  %v3362_v4 = vrot.slane %v554_v60, %v354_v58  ;;  %v3364_v6 = vrot.slane %v554_v60, %v350_v57 }
 0x14e   :  { %vm356_vm10 = vcmp.eq.s32.totalorder %v3358_v62, 1  ;;  %vm357_vm11 = vcmp.eq.s32.totalorder %v3360_v63, 1  ;;  %v1149_v62 = vld [vmem:[#allocation20] sm:$0xff] }
 0x14f   :  { %1081 = vperm.xlu1 %2408, %v678_v24   ;;  %vm564_vm12 = vcmp.eq.s32.totalorder %v3362_v4, 1  ;;  %vm563_vm13 = vcmp.eq.s32.totalorder %v3364_v6, 1  ;;  %v315_v24 = vld [vmem:[#allocation8 + $0xf8] sm:$0xff]  ;;  %vm2306_vm2 = vmpackc.low %vm357_vm11, %vm357_vm11  ;;  %v1347_v4 = vld [vmem:[#allocation20 + $0x20] sm:$0xff] }
 0x150   :  { %1086 = vperm.xlu0 %2407, %v679_v23   ;;  %2268 = vmatpush3.bf16.msra.mxu1 %v3334_v37  ;;  %v314_v23 = vld [vmem:[#allocation8 + $0xf0] sm:$0xff]  ;;  %vm2309_vm3 = vmpackc.low %vm356_vm10, %vm356_vm10  ;;  %v1348_v6 = vld [vmem:[#allocation20 + $0x28] sm:$0xff] }
 0x151   :  { %2270 = vmatprep.subr.bf16.mxu1 %v3337_v38  ;;  %v3393_v27 = vpack.c.bf16 %v315_v24, %v314_v23  ;;  %vm2312_vm4 = vmpackc.low %vm564_vm12, %vm564_vm12 }
 0x152   :  { %vm2315_vm5 = vmpackc.low %vm563_vm13, %vm563_vm13 }
 0x154   :  { %2272 = vmatpush3.bf16.msra.mxu1 %v3340_v43 }
 0x155   :  { %2274 = vmatprep.subr.bf16.mxu1 %v3343_v44 }
 0x158   :  { %2276 = vmatpush3.bf16.msra.mxu1 %v3346_v49 }
 0x159   :  { %2278 = vmatprep.subr.bf16.mxu1 %v3349_v50 }
 0x15c   :  { %2280 = vmatpush3.bf16.msra.mxu1 %v3352_v53 }
 0x15d   :  { %2282 = vmatprep.subr.bf16.mxu1 %v3393_v27 }
 0x160   :  { %2284 = vmatpush3.bf16.msra.mxu1 %v3395_v30 }
 0x1b1   :  { %v545_v61 = vpop.permute.xlu1 %544  ;;  %v338_v5 = vpop.permute.xlu0 %337 }
 0x1b5   :  { %v547_v7 = vpop.permute.xlu1 %546 }
 0x1b6   :  { %v553_v8 = vsel %vm548_vm8, %v547_v7, %v545_v61  ;;  %v341_v1 = vpop.permute.xlu0 %340  ;;  %v549_v9 = vsel %vm548_vm8, %v545_v61, %v547_v7 }
 0x1b7   :  { %v343_v10 = vsel %vm342_vm9, %v341_v1, %v338_v5  ;;  %v346_v11 = vsel %vm342_vm9, %v338_v5, %v341_v1  ;;  %v566_v15 = vsel %vm564_vm12, %v553_v8, 0.0  ;;  %v565_v19 = vsel %vm563_vm13, %v549_v9, 0.0 }
 0x1b8   :  { %v358_v12 = vsel %vm356_vm10, %v346_v11, 0.0  ;;  %v359_v14 = vsel %vm357_vm11, %v343_v10, 0.0 }
 0x1b9   :  { %2045 = vmatprep.subr.msk.mxu0 %vm370_vm0, %v359_v14  ;;  %v3428_v14 = vld [vmem:[#allocation13] sm:$0xff] }
 0x1ba   :  { %2046 = vmatpush1.msk.msra.mxu0 %vm370_vm0, %v358_v12  ;;  %v3424_v12 = vld [vmem:[#allocation11 + $0x8] sm:$0xff] }
 0x1bb   :  { %2047 = vmatmul.mubr.msk.f32.vlgmr.msra.gmra.mrb[0].mxu0 %vm363_vm1, %v333_v16  ;;  %2049 = vmatprep.subr.msk.mxu0 %vm370_vm0, %v566_v15 }
 0x1bc   :  { %2050 = vmatpush1.msk.msra.mxu0 %vm370_vm0, %v565_v19  ;;  %534 = vmatprep.mubr.f32.mxu0 %v2903_v0 }
 0x1bf   :  { %2048 = vmatmul.mubr.msk.f32.gmra.mrb[2].mxu0 %vm363_vm1, %v334_v20 }
 0x1c0   :  { %643 = vmatprep.mubr.f32.mxu0 %v2903_v0 }
 0x1c3   :  { %2051 = vmatmul.mubr.msk.f32.vlgmr.msra.gmra.mrb[0].mxu0 %vm363_vm1, %v542_v21 }
 0x1c4   :  { %649 = vmatprep.mubr.f32.mxu0 %v2903_v0 }
 0x1c6   :  { %v670_v41 = vpop.permute.xlu1 %669 }
 0x1c7   :  { %2052 = vmatmul.mubr.msk.f32.gmra.mrb[2].mxu0 %vm363_vm1, %v543_v22  ;;  %v665_v34 = vpop.permute.xlu0 %664 }
 0x1c8   :  { %2219 = vmatprep.mubr.msk.f32.mxu0 %vm769_vm14, %v3420_v54 }
 0x296   :  { %v645_v33 = vpop.f32.mrb[0].mxu0 }
 0x297   :  { %v647_v35 = vpop.f32.mrb[1].mxu0  ;;  %v3401_v39 = vadd.f32 %v665_v34, %v645_v33 }
 0x298   :  { %v3399_v36 = vadd.f32 %v665_v34, %v647_v35  ;;  %v3432_v35 = vpack.c.bf16 %v319_v29, %v317_v28 }
 0x299   :  { %v680_v48 = vmul.f32 %v3401_v39, %v3401_v39 }
 0x29a   :  { %v651_v40 = vpop.f32.mrb[2].mxu0  ;;  %748 = vmatprep.mubr.f32.mxu1 %v3399_v36  ;;  %v681_v47 = vmul.f32 %v3399_v36, %v3399_v36 }
 0x29b   :  { %v653_v42 = vpop.f32.mrb[3].mxu0  ;;  %749 = vmatmul.mubr.f32.vlgmr.msra.gmra.mrb[0].mxu1 %v3401_v39  ;;  %v3407_v46 = vadd.f32 %v670_v41, %v651_v40  ;;  %v316_v40 = vld [vmem:[#allocation10] sm:$0xff] }
 0x29c   :  { %v3405_v45 = vadd.f32 %v670_v41, %v653_v42  ;;  %v318_v41 = vld [vmem:[#allocation10 + $0x10] sm:$0xff]  ;;  %v3434_v42 = vld [vmem:[#allocation13 + $0x8] sm:$0xff] }
 0x29d   :  { %v682_v52 = vmul.f32 %v3407_v46, %v3407_v46 }
 0x29e   :  { %753 = vmatprep.mubr.f32.mxu1 %v3405_v45  ;;  %v683_v51 = vmul.f32 %v3405_v45, %v3405_v45 }
 0x29f   :  { %754 = vmatmul.mubr.f32.gmra.mrb[2].mxu1 %v3407_v46 }
 0x2a0   :  { %758 = vmatprep.mubr.f32.mxu1 %v681_v47  ;;  %v3436_v47 = vpack.c.bf16 %v318_v41, %v316_v40 }
 0x2a3   :  { %759 = vmatmul.mubr.f32.gmra.mrb[4].mxu1 %v680_v48  ;;  %v3438_v48 = vld [vmem:[#allocation13 + $0x10] sm:$0xff] }
 0x2a4   :  { %763 = vmatprep.mubr.f32.mxu1 %v683_v51  ;;  %v3445_v51 = vld [vmem:[#allocation13 + $0x18] sm:$0xff] }
 0x2a7   :  { %764 = vmatmul.mubr.f32.gmra.mrb[6].mxu1 %v682_v52 }
 0x2a8   :  { %1250 = vmatprep.mubr.f32.mxu1 %v2903_v0 }
 0x36e   :  { %v2131_v55 = vpop.f32.mrb[0].mxu1 }
 0x36f   :  { %v2132_v56 = vpop.f32.mrb[1].mxu1 }
 0x370   :  { %v2133_v57 = vadd.f32 %v2132_v56, %v2131_v55 }
 0x372   :  { %v2134_v58 = vpop.f32.mrb[2].mxu1 }
 0x373   :  { %v2135_v59 = vpop.f32.mrb[3].mxu1 }
 0x374   :  { %v2136_v60 = vadd.f32 %v2135_v59, %v2134_v58 }
 0x376   :  { %v2285_v61 = vpack.c.bf16 %v2136_v60, %v2133_v57  ;;  %v2137_v5 = vpop.f32.mrb[4].mxu1 }
 0x377   :  { %v2138_v7 = vpop.f32.mrb[5].mxu1 }
 0x378   :  { %v2139_v8 = vadd.f32 %v2138_v7, %v2137_v5  ;;  %2286 = vmatprep.subr.bf16.mxu0 %v2285_v61 }
 0x379   :  { %2288 = vmatpush3.bf16.msra.mxu0 %v2285_v61 }
 0x37a   :  { %v2140_v1 = vpop.f32.mrb[6].mxu1 }
 0x37b   :  { %v2141_v9 = vpop.f32.mrb[7].mxu1 }
 0x37c   :  { %v2142_v10 = vadd.f32 %v2141_v9, %v2140_v1 }
 0x37e   :  { %v2289_v11 = vpack.c.bf16 %v2142_v10, %v2139_v8 }
 0x380   :  { %2290 = vmatprep.subr.bf16.mxu0 %v2289_v11 }
 0x381   :  { %2292 = vmatpush3.bf16.msra.mxu0 %v2289_v11 }
 0x384   :  { %2220 = vmatmul.mubr.msk.f32.vlgmr.msra.gmra.mrb[4].mxu0 %vm769_vm14, %v3424_v12 }
 0x385   :  { %2226 = vmatprep.mubr.msk.f32.mxu0 %vm858_vm15, %v3428_v14 }
 0x457   :  { %v2221_v15 = vpop.f32.mrb[4].mxu0 }
 0x458   :  { %v842_v16 = vpop.f32.mrb[5].mxu0  ;;  %v852_v20 = vmul.f32 0.03125, %v2221_v15 }
 0x459   :  { %v851_v19 = vmul.f32 0.03125, %v842_v16 }
 0x45b   :  { %v853_v21 = vmul.f32 %v851_v19, %v851_v19 }
 0x45d   :  { %v854_v22 = vsub.f32 %v852_v20, %v853_v21 }
 0x45f   :  { %v855_v23 = vmax.f32 %v854_v22, 0.0 }
 0x461   :  { %v856_v24 = vadd.f32 1e-05, %v855_v23 }
 0x463   :  { %2430 = vrsqrt.f32 %v856_v24 }
 0x46d   :  { %v2431_v33 = vpop.eup %2430 }
 0x46e   :  { %v2293_v34 = vpack.c.bf16 %v2431_v33, %v851_v19 }
 0x470   :  { %2294 = vmatprep.subr.bf16.mxu0 %v2293_v34 }
 0x471   :  { %2296 = vmatpush3.bf16.msra.mxu0 %v2293_v34 }
 0x472   :  { %2298 = vmatprep.subr.bf16.mxu0 %v3432_v35 }
 0x474   :  { %2227 = vmatmul.mubr.msk.f32.vlgmr.msra.gmra.mrb[6].mxu0 %vm858_vm15, %v3434_v42 }
 0x475   :  { %2229 = vmatprep.mubr.msk.f32.mxu0 %vm858_vm15, %v3438_v48  ;;  %2300 = vmatpush1.bf16.msra.mxu0 %v3436_v47 }
 0x476   :  { %2318 = vmatprep.subr.bf16.mxu0 %v3314_v13 }
 0x478   :  { %2230 = vmatmul.mubr.msk.f32.gmra.mrb[8].mxu0 %vm858_vm15, %v3445_v51 }
 0x479   :  { %1032 = vmatprep.mubr.f32.mxu0 %v2903_v0 }
 0x547   :  { %v2228_v52 = vpop.f32.mrb[6].mxu0 }
 0x548   :  { %v937_v55 = vpop.f32.mrb[7].mxu0 }
 0x549   :  { %2059 = vmatmul.mubr.msk.f32.vlgmr.msra.gmra.mrb[10].mxu0 %vm858_vm15, %v937_v55 }
 0x54a   :  { %1038 = vmatprep.mubr.f32.mxu0 %v2903_v0  ;;  %2320 = vmatpush3.bf16.msra.mxu0 %v3316_v17 }
 0x54b   :  { %v2231_v56 = vpop.f32.mrb[8].mxu0  ;;  %2322 = vmatprep.subr.bf16.mxu0 %v3318_v18 }
 0x54c   :  { %v947_v57 = vpop.f32.mrb[9].mxu0 }
 0x54d   :  { %2060 = vmatmul.mubr.msk.f32.gmra.mrb[12].mxu0 %vm858_vm15, %v2228_v52 }
 0x54e   :  { %1044 = vmatprep.mubr.f32.mxu0 %v2903_v0  ;;  %2324 = vmatpush3.bf16.msra.mxu0 %v3322_v25 }
 0x54f   :  { %2326 = vmatprep.subr.bf16.mxu0 %v3325_v26  ;;  %v1068_v26 = vpop.permute.xlu1 %1067 }
 0x551   :  { %2061 = vmatmul.mubr.msk.f32.gmra.mrb[14].mxu0 %vm858_vm15, %v947_v57 }
 0x552   :  { %1050 = vmatprep.mubr.f32.mxu0 %v2903_v0  ;;  %2328 = vmatpush3.bf16.msra.mxu0 %v3328_v31 }
 0x553   :  { %2330 = vmatprep.subr.bf16.mxu0 %v3331_v32 }
 0x555   :  { %2062 = vmatmul.mubr.msk.f32.gmra.mrb[16].mxu0 %vm858_vm15, %v2231_v56 }
 0x556   :  { %2332 = vmatpush3.bf16.msra.mxu0 %v3334_v37 }
 0x557   :  { %2334 = vmatprep.subr.bf16.mxu0 %v3337_v38 }
 0x55a   :  { %2336 = vmatpush3.bf16.msra.mxu0 %v3340_v43 }
 0x55b   :  { %2338 = vmatprep.subr.bf16.mxu0 %v3343_v44  ;;  %v1073_v44 = vpop.permute.xlu0 %1072 }
 0x55e   :  { %2340 = vmatpush3.bf16.msra.mxu0 %v3346_v49 }
 0x55f   :  { %2342 = vmatprep.subr.bf16.mxu0 %v3349_v50  ;;  %v1087_v1 = vpop.permute.xlu0 %1086 }
 0x562   :  { %2344 = vmatpush3.bf16.msra.mxu0 %v3352_v53 }
 0x563   :  { %2346 = vmatprep.subr.bf16.mxu0 %v3393_v27  ;;  %v1082_v27 = vpop.permute.xlu1 %1081 }
 0x566   :  { %2348 = vmatpush3.bf16.msra.mxu0 %v3395_v30 }
 0x61c   :  { %v1034_v13 = vpop.f32.mrb[10].mxu0 }
 0x61d   :  { %v1036_v17 = vpop.f32.mrb[11].mxu0  ;;  %v1057_v31 = vsub.f32 %v3401_v39, %v1034_v13 }
 0x61e   :  { %v1058_v32 = vsub.f32 %v3399_v36, %v1036_v17 }
 0x620   :  { %v1040_v18 = vpop.f32.mrb[12].mxu0 }
 0x621   :  { %v1042_v25 = vpop.f32.mrb[13].mxu0  ;;  %v1059_v50 = vsub.f32 %v3407_v46, %v1040_v18 }
 0x622   :  { %v1060_v30 = vsub.f32 %v3405_v45, %v1042_v25 }
 0x624   :  { %v1046_v37 = vpop.f32.mrb[14].mxu0 }
 0x625   :  { %v1061_v38 = vmul.f32 %v1057_v31, %v1046_v37  ;;  %v1048_v43 = vpop.f32.mrb[15].mxu0 }
 0x626   :  { %v1062_v49 = vmul.f32 %v1058_v32, %v1048_v43 }
 0x627   :  { %v1075_v53 = vmul.f32 %v1068_v26, %v1061_v38 }
 0x628   :  { %v1076_v58 = vmul.f32 %v1068_v26, %v1062_v49  ;;  %v1052_v59 = vpop.f32.mrb[16].mxu0 }
 0x629   :  { %v1089_v60 = vadd.f32 %v1082_v27, %v1075_v53  ;;  %v1063_v61 = vmul.f32 %v1059_v50, %v1052_v59  ;;  %v1054_v5 = vpop.f32.mrb[17].mxu0  ;;  %v1134_v53 = vld [vmem:[#allocation5 + $0x8] sm:$0xff] }
 0x62a   :  { %v1090_v7 = vadd.f32 %v1082_v27, %v1076_v58  ;;  %v1064_v39 = vmul.f32 %v1060_v30, %v1054_v5  ;;  %v1137_v30 = vld [vmem:[#allocation5 + $0x20] sm:$0xff] }
 0x62b   :  { %v1093_v8 = vmin.f32 %v1089_v60, 20.0  ;;  %v1077_v36 = vmul.f32 %v1073_v44, %v1063_v61  ;;  %v1138_v61 = vld [vmem:[#allocation5 + $0x28] sm:$0xff] }
 0x62c   :  { %v1094_v9 = vmin.f32 %v1090_v7, 20.0  ;;  %v1078_v10 = vmul.f32 %v1073_v44, %v1064_v39  ;;  %v1133_v44 = vld [vmem:[#allocation5] sm:$0xff] }
 0x62d   :  { %v1097_v11 = vmul.f32 1.442695, %v1093_v8  ;;  %v1091_v15 = vadd.f32 %v1087_v1, %v1077_v36  ;;  %v1135_v8 = vld [vmem:[#allocation5 + $0x10] sm:$0xff] }
 0x62e   :  { %v1099_v16 = vmul.f32 1.442695, %v1094_v9  ;;  %v1092_v46 = vadd.f32 %v1087_v1, %v1078_v10  ;;  %v1136_v10 = vld [vmem:[#allocation5 + $0x18] sm:$0xff] }
 0x62f   :  { %2432 = vpow2.f32 %v1097_v11  ;;  %v1095_v19 = vmin.f32 %v1091_v15, 20.0 }
 0x630   :  { %2434 = vpow2.f32 %v1099_v16  ;;  %v1096_v45 = vmin.f32 %v1092_v46, 20.0 }
 0x631   :  { %v1101_v20 = vmul.f32 1.442695, %v1095_v19 }
 0x632   :  { %v1103_v21 = vmul.f32 1.442695, %v1096_v45  ;;  %v1140_v45 = vld [vmem:[#allocation5 + $0x38] sm:$0xff] }
 0x633   :  { %2436 = vpow2.f32 %v1101_v20 }
 0x634   :  { %2438 = vpow2.f32 %v1103_v21 }
 0x639   :  { %v2433_v22 = vpop.eup %2432 }
 0x63a   :  { %v2435_v23 = vpop.eup %2434  ;;  %v1105_v24 = vadd.f32 1.0, %v2433_v22 }
 0x63b   :  { %v1106_v28 = vadd.f32 1.0, %v2435_v23 }
 0x63c   :  { %v1109_v29 = vmul.f32 %v1105_v24, %v1105_v24 }
 0x63d   :  { %v2437_v33 = vpop.eup %2436  ;;  %v1110_v34 = vmul.f32 %v1106_v28, %v1106_v28 }
 0x63e   :  { %v2439_v40 = vpop.eup %2438  ;;  %v1121_v41 = vadd.f32 1.0, %v1109_v29  ;;  %v1107_v52 = vadd.f32 1.0, %v2437_v33  ;;  %v2063_v25 = vadd.f32 -1.0, %v1109_v29  ;;  %v1178_v33 = vld [vmem:[#allocation20 + $0x10] sm:$0xff] }
 0x63f   :  { %v1122_v55 = vadd.f32 1.0, %v1110_v34  ;;  %v1108_v56 = vadd.f32 1.0, %v2439_v40  ;;  %v2064_v26 = vadd.f32 -1.0, %v1110_v34  ;;  %v1459_v34 = vld [vmem:[#allocation22 + $0x8] sm:$0xff]  ;;  %v1458_v40 = vld [vmem:[#allocation22] sm:$0xff] }
 0x640   :  { %2440 = vrcp.f32 %v1121_v41  ;;  %v1111_v57 = vmul.f32 %v1107_v52, %v1107_v52  ;;  %v1117_v31 = vmul.f32 %v2063_v25, %v1089_v60  ;;  %v1179_v41 = vld [vmem:[#allocation20 + $0x18] sm:$0xff]  ;;  %v1475_v52 = vld [vmem:[#allocation23 + $0x8] sm:$0xff] }
 0x641   :  { %2442 = vrcp.f32 %v1122_v55  ;;  %v1112_v13 = vmul.f32 %v1108_v56, %v1108_v56  ;;  %v1118_v38 = vmul.f32 %v2064_v26, %v1090_v7  ;;  %v1139_v7 = vld [vmem:[#allocation5 + $0x30] sm:$0xff] }
 0x642   :  { %v1123_v17 = vadd.f32 1.0, %v1111_v57  ;;  %v2065_v32 = vadd.f32 -1.0, %v1111_v57  ;;  %v1474_v55 = vld [vmem:[#allocation23] sm:$0xff]  ;;  %v1477_v56 = vld [vmem:[#allocation25 + $0x8] sm:$0xff]  ;;  %v1476_v57 = vld [vmem:[#allocation25] sm:$0xff] }
 0x643   :  { %v1124_v18 = vadd.f32 1.0, %v1112_v13  ;;  %v2066_v43 = vadd.f32 -1.0, %v1112_v13  ;;  %v1914_v13 = vld [vmem:[#allocation28 + $0x8] sm:$0xff] }
 0x644   :  { %2444 = vrcp.f32 %v1123_v17  ;;  %v1119_v58 = vmul.f32 %v2065_v32, %v1091_v15  ;;  %v1913_v17 = vld [vmem:[#allocation28] sm:$0xff] }
 0x645   :  { %2446 = vrcp.f32 %v1124_v18  ;;  %v1120_v39 = vmul.f32 %v2066_v43, %v1092_v46 }
 0x64a   :  { %v2441_v37 = vpop.eup %2440 }
 0x64b   :  { %v2443_v49 = vpop.eup %2442  ;;  %v1126_v50 = vmul.f32 %v2441_v37, %v1117_v31 }
 0x64c   :  { %v1128_v27 = vmul.f32 %v2443_v49, %v1118_v38 }
 0x64d   :  { %v1141_v59 = vmul.f32 %v1133_v44, %v1126_v50 }
 0x64e   :  { %v2445_v5 = vpop.eup %2444  ;;  %v1142_v36 = vmul.f32 %v1134_v53, %v1128_v27 }
 0x64f   :  { %v2447_v1 = vpop.eup %2446  ;;  %v1130_v9 = vmul.f32 %v2445_v5, %v1119_v58  ;;  %v1145_v60 = vadd.f32 %v1141_v59, %v1137_v30 }
 0x650   :  { %v1132_v11 = vmul.f32 %v2447_v1, %v1120_v39  ;;  %v1146_v16 = vadd.f32 %v1142_v36, %v1138_v61 }
 0x651   :  { %v1143_v19 = vmul.f32 %v1135_v8, %v1130_v9 }
 0x652   :  { %v1144_v20 = vmul.f32 %v1136_v10, %v1132_v11  ;;  %v2419_v21 = vpack.i.bf16 %v1146_v16, %v1145_v60 }
 0x653   :  { %v1147_v22 = vadd.f32 %v1143_v19, %v1139_v7 }
 0x654   :  { %v1148_v23 = vadd.f32 %v1144_v20, %v1140_v45 }
 0x655   :  { %v2414_v15 = vpack.i.bf16 %v1147_v22, %v1145_v60  ;;  %v2303_v24 = vpack.c.bf16 %v1147_v22, %v1145_v60  ;;  %v1150_v60 = vld [vmem:[#allocation20 + $0x8] sm:$0xff] }
 0x656   :  { %v2409_v28 = vpack.i.bf16 %v1148_v23, %v1146_v16  ;;  %v2301_v29 = vpack.c.bf16 %v1148_v23, %v1146_v16  ;;  %v2424_v46 = vpack.i.bf16 %v1148_v23, %v1147_v22 }
 0x657   :  { %2415 = vrot.lane.b32.xlu0 %v2414_v15, %s2906_s25 }
 0x658   :  { %2410 = vrot.lane.b32.xlu1 %v2409_v28, %s2906_s25  ;;  %2302 = vmatprep.subr.bf16.mxu1 %v2301_v29 }
 0x659   :  { %2304 = vmatpush1.bf16.msra.mxu1 %v2303_v24 }
 0x65b   :  { %2425 = vrot.lane.b32.xlu0 %v2424_v46, %s2905_s16 }
 0x65c   :  { %2420 = vrot.lane.b32.xlu1 %v2419_v21, %s2905_s16  ;;  %2067 = vmatmul.mubr.msk.f32.vlgmr.msra.gmra.mrb[8].mxu1 %vm858_vm15, %v1178_v33 }
 0x65d   :  { %1256 = vmatprep.mubr.f32.mxu1 %v2903_v0 }
 0x65f   :  { %1467 = vperm.xlu0 %2407, %v1459_v34  }
 0x660   :  { %1462 = vperm.xlu1 %2408, %v1458_v40   ;;  %2068 = vmatmul.mubr.msk.f32.gmra.mrb[10].mxu1 %vm858_vm15, %v1179_v41 }
 0x661   :  { %1333 = vmatprep.mubr.f32.mxu1 %v2903_v0 }
 0x663   :  { %1850 = vperm.xlu0 %2407, %v1475_v52  }
 0x664   :  { %1845 = vperm.xlu1 %2408, %v1474_v55  }
 0x667   :  { %1864 = vperm.xlu0 %2407, %v1477_v56  }
 0x668   :  { %1859 = vperm.xlu1 %2408, %v1476_v57  }
 0x66b   :  { %1922 = vperm.xlu0 %2407, %v1914_v13  }
 0x66c   :  { %1917 = vperm.xlu1 %2408, %v1913_v17  }
 0x6c9   :  { %v2416_v18 = vpop.permute.xlu0 %2415 }
 0x6ca   :  { %v2418_v25 = vunpack.i.h.bf16 %v2416_v18  ;;  %v2417_v26 = vunpack.i.l.bf16 %v2416_v18  ;;  %v2411_v31 = vpop.permute.xlu1 %2410 }
 0x6cb   :  { %v2413_v32 = vunpack.i.h.bf16 %v2411_v31  ;;  %v2412_v37 = vunpack.i.l.bf16 %v2411_v31 }
 0x6cd   :  { %v1166_v38 = vsel %vm342_vm9, %v2418_v25, %v2413_v32  ;;  %v1172_v43 = vsel %vm342_vm9, %v2413_v32, %v2418_v25  ;;  %v1165_v44 = vsel %vm342_vm9, %v2417_v26, %v2412_v37  ;;  %v1171_v49 = vsel %vm342_vm9, %v2412_v37, %v2417_v26  ;;  %v2426_v50 = vpop.permute.xlu0 %2425  ;;  %v1912_v26 = vld [vmem:[#allocation26 + $0x8] sm:$0xff] }
 0x6ce   :  { %v2305_v53 = vpack.c.bf16 %v1166_v38, %v1165_v44  ;;  %v2308_v27 = vpack.c.bf16 %v1172_v43, %v1171_v49  ;;  %v2428_v30 = vunpack.i.h.bf16 %v2426_v50  ;;  %v2427_v58 = vunpack.i.l.bf16 %v2426_v50  ;;  %v2421_v59 = vpop.permute.xlu1 %2420 }
 0x6cf   :  { %v2423_v61 = vunpack.i.h.bf16 %v2421_v59  ;;  %v2422_v5 = vunpack.i.l.bf16 %v2421_v59 }
 0x6d0   :  { %v1358_v39 = vsel %vm548_vm8, %v2427_v58, %v2428_v30  ;;  %v1366_v8 = vsel %vm548_vm8, %v2428_v30, %v2427_v58  ;;  %2307 = vmatprep.subr.msk.bf16.mxu1 %vm2306_vm2, %v2305_v53 }
 0x6d1   :  { %v1357_v63 = vsel %vm548_vm8, %v2422_v5, %v2423_v61  ;;  %v1365_v36 = vsel %vm548_vm8, %v2423_v61, %v2422_v5  ;;  %2310 = vmatpush1.bf16.msk.msra.mxu1 %vm2309_vm3, %v2308_v27 }
 0x6d2   :  { %v2311_v1 = vpack.c.bf16 %v1366_v8, %v1365_v36  ;;  %v2314_v9 = vpack.c.bf16 %v1358_v39, %v1357_v63 }
 0x6d4   :  { %2073 = vmatmul.mubr.msk.f32.vlgmr.msra.gmra.mrb[8].mxu1 %vm858_vm15, %v1149_v62  ;;  %2313 = vmatprep.subr.msk.bf16.mxu1 %vm2312_vm4, %v2311_v1 }
 0x6d5   :  { %2316 = vmatpush1.bf16.msk.msra.mxu1 %vm2315_vm5, %v2314_v9  ;;  %1339 = vmatprep.mubr.f32.mxu1 %v2903_v0 }
 0x6d8   :  { %2074 = vmatmul.mubr.msk.f32.gmra.mrb[10].mxu1 %vm858_vm15, %v1150_v60 }
 0x6d9   :  { %1441 = vmatprep.mubr.f32.mxu1 %v2903_v0 }
 0x6dc   :  { %2079 = vmatmul.mubr.msk.f32.vlgmr.msra.gmra.mrb[8].mxu1 %vm858_vm15, %v1347_v4 }
 0x6dd   :  { %1447 = vmatprep.mubr.f32.mxu1 %v2903_v0 }
 0x6de   :  { %v1468_v20 = vpop.permute.xlu0 %1467 }
 0x6df   :  { %v1463_v11 = vpop.permute.xlu1 %1462 }
 0x6e0   :  { %2080 = vmatmul.mubr.msk.f32.gmra.mrb[10].mxu1 %vm858_vm15, %v1348_v6 }
 0x6e1   :  { %2247 = vmatprep.mubr.msk.f32.mxu1 %vm858_vm15, %v3428_v14 }
 0x6e2   :  { %v1851_v1 = vpop.permute.xlu0 %1850 }
 0x6e3   :  { %v1846_v5 = vpop.permute.xlu1 %1845 }
 0x7af   :  { %v1443_v10 = vpop.f32.mrb[8].mxu1 }
 0x7b0   :  { %v1445_v7 = vpop.f32.mrb[9].mxu1  ;;  %v3517_v19 = vadd.f32 %v1463_v11, %v1443_v10 }
 0x7b1   :  { %v3515_v16 = vadd.f32 %v1463_v11, %v1445_v7 }
 0x7b2   :  { %v1478_v15 = vmul.f32 %v3517_v19, %v3517_v19 }
 0x7b3   :  { %v1449_v45 = vpop.f32.mrb[10].mxu1  ;;  %1546 = vmatprep.mubr.f32.mxu0 %v3515_v16  ;;  %v1479_v14 = vmul.f32 %v3515_v16, %v3515_v16 }
 0x7b4   :  { %v1451_v21 = vpop.f32.mrb[11].mxu1  ;;  %1547 = vmatmul.mubr.f32.vlgmr.msra.gmra.mrb[18].mxu0 %v3517_v19  ;;  %v3523_v23 = vadd.f32 %v1468_v20, %v1449_v45 }
 0x7b5   :  { %v3521_v22 = vadd.f32 %v1468_v20, %v1451_v21 }
 0x7b6   :  { %v1480_v28 = vmul.f32 %v3523_v23, %v3523_v23 }
 0x7b7   :  { %1551 = vmatprep.mubr.f32.mxu0 %v3521_v22  ;;  %v1481_v24 = vmul.f32 %v3521_v22, %v3521_v22 }
 0x7b8   :  { %1552 = vmatmul.mubr.f32.gmra.mrb[20].mxu0 %v3523_v23 }
 0x7b9   :  { %1556 = vmatprep.mubr.f32.mxu0 %v1479_v14 }
 0x7bc   :  { %1557 = vmatmul.mubr.f32.gmra.mrb[22].mxu0 %v1478_v15  ;;  %v1865_v15 = vpop.permute.xlu0 %1864 }
 0x7bd   :  { %1561 = vmatprep.mubr.f32.mxu0 %v1481_v24 }
 0x7c0   :  { %1562 = vmatmul.mubr.f32.gmra.mrb[24].mxu0 %v1480_v28 }
 0x7c1   :  { %2240 = vmatprep.mubr.msk.f32.mxu0 %vm769_vm14, %v3420_v54  ;;  %v1911_v54 = vld [vmem:[#allocation26] sm:$0xff] }
 0x887   :  { %v2187_v29 = vpop.f32.mrb[18].mxu0 }
 0x888   :  { %v2188_v46 = vpop.f32.mrb[19].mxu0 }
 0x889   :  { %v2189_v33 = vadd.f32 %v2188_v46, %v2187_v29 }
 0x88b   :  { %v2190_v34 = vpop.f32.mrb[20].mxu0 }
 0x88c   :  { %v2191_v40 = vpop.f32.mrb[21].mxu0 }
 0x88d   :  { %v2192_v41 = vadd.f32 %v2191_v40, %v2190_v34 }
 0x88f   :  { %v2349_v52 = vpack.c.bf16 %v2192_v41, %v2189_v33  ;;  %v2193_v55 = vpop.f32.mrb[22].mxu0 }
 0x890   :  { %v2194_v56 = vpop.f32.mrb[23].mxu0 }
 0x891   :  { %v2195_v57 = vadd.f32 %v2194_v56, %v2193_v55  ;;  %2350 = vmatprep.subr.bf16.mxu0 %v2349_v52 }
 0x892   :  { %2352 = vmatpush3.bf16.msra.mxu0 %v2349_v52 }
 0x893   :  { %v2196_v13 = vpop.f32.mrb[24].mxu0 }
 0x894   :  { %v2197_v17 = vpop.f32.mrb[25].mxu0 }
 0x895   :  { %v2198_v18 = vadd.f32 %v2197_v17, %v2196_v13 }
 0x897   :  { %v2353_v25 = vpack.c.bf16 %v2198_v18, %v2195_v57 }
 0x899   :  { %2354 = vmatprep.subr.bf16.mxu0 %v2353_v25 }
 0x89a   :  { %2356 = vmatpush3.bf16.msra.mxu0 %v2353_v25 }
 0x89b   :  { %2095 = vmatprep.subr.msk.mxu0 %vm370_vm0, %v3296_v3 }
 0x89d   :  { %2241 = vmatmul.mubr.msk.f32.vlgmr.msra.gmra.mrb[26].mxu0 %vm769_vm14, %v3424_v12 }
 0x89e   :  { %2096 = vmatpush1.msk.msra.mxu0 %vm370_vm0, %v3292_v2  ;;  %1995 = vmatprep.mubr.f32.mxu0 %v2903_v0 }
 0x8a1   :  { %2097 = vmatmul.mubr.msk.f32.vlgmr.msra.gmra.mrb[28].mxu0 %vm363_vm1, %v1911_v54 }
 0x8a2   :  { %2001 = vmatprep.mubr.f32.mxu0 %v2903_v0 }
 0x8a5   :  { %2098 = vmatmul.mubr.msk.f32.gmra.mrb[30].mxu0 %vm363_vm1, %v1912_v26 }
 0x970   :  { %v2242_v31 = vpop.f32.mrb[26].mxu0 }
 0x971   :  { %v1633_v32 = vpop.f32.mrb[27].mxu0  ;;  %v1643_v3 = vmul.f32 0.03125, %v2242_v31 }
 0x972   :  { %v1642_v37 = vmul.f32 0.03125, %v1633_v32 }
 0x974   :  { %v1644_v38 = vmul.f32 %v1642_v37, %v1642_v37  ;;  %v3547_v43 = vpop.f32.mrb[28].mxu0 }
 0x975   :  { %v3549_v12 = vpop.f32.mrb[29].mxu0 }
 0x976   :  { %v1645_v2 = vsub.f32 %v1643_v3, %v1644_v38 }
 0x978   :  { %v1646_v44 = vmax.f32 %v1645_v2, 0.0  ;;  %v3551_v49 = vpop.f32.mrb[30].mxu0 }
 0x979   :  { %v3553_v50 = vpop.f32.mrb[31].mxu0 }
 0x97a   :  { %v1647_v53 = vadd.f32 1e-05, %v1646_v44 }
 0x97c   :  { %2448 = vrsqrt.f32 %v1647_v53 }
 0x986   :  { %v2449_v27 = vpop.eup %2448 }
 0x987   :  { %v2357_v30 = vpack.c.bf16 %v2449_v27, %v1642_v37 }
 0x989   :  { %2358 = vmatprep.subr.bf16.mxu1 %v2357_v30 }
 0x98a   :  { %2360 = vmatpush3.bf16.msra.mxu1 %v2357_v30 }
 0x98b   :  { %2362 = vmatprep.subr.bf16.mxu1 %v3432_v35 }
 0x98d   :  { %2248 = vmatmul.mubr.msk.f32.vlgmr.msra.gmra.mrb[12].mxu1 %vm858_vm15, %v3434_v42 }
 0x98e   :  { %2250 = vmatprep.mubr.msk.f32.mxu1 %vm858_vm15, %v3438_v48  ;;  %2364 = vmatpush1.bf16.msra.mxu1 %v3436_v47 }
 0x991   :  { %2251 = vmatmul.mubr.msk.f32.gmra.mrb[14].mxu1 %vm858_vm15, %v3445_v51 }
 0x992   :  { %1810 = vmatprep.mubr.f32.mxu1 %v2903_v0 }
 0xa60   :  { %v2249_v58 = vpop.f32.mrb[12].mxu1 }
 0xa61   :  { %v1715_v59 = vpop.f32.mrb[13].mxu1 }
 0xa62   :  { %2087 = vmatmul.mubr.msk.f32.vlgmr.msra.gmra.mrb[16].mxu1 %vm858_vm15, %v1715_v59 }
 0xa63   :  { %1816 = vmatprep.mubr.f32.mxu1 %v2903_v0 }
 0xa64   :  { %v2252_v35 = vpop.f32.mrb[14].mxu1 }
 0xa65   :  { %v1725_v61 = vpop.f32.mrb[15].mxu1 }
 0xa66   :  { %2088 = vmatmul.mubr.msk.f32.gmra.mrb[18].mxu1 %vm858_vm15, %v2249_v58 }
 0xa67   :  { %1822 = vmatprep.mubr.f32.mxu1 %v2903_v0 }
 0xa6a   :  { %2089 = vmatmul.mubr.msk.f32.gmra.mrb[20].mxu1 %vm858_vm15, %v1725_v61 }
 0xa6b   :  { %1828 = vmatprep.mubr.f32.mxu1 %v2903_v0  ;;  %v1860_v0 = vpop.permute.xlu1 %1859 }
 0xa6e   :  { %2090 = vmatmul.mubr.msk.f32.gmra.mrb[22].mxu1 %vm858_vm15, %v2252_v35 }
 0xa6f   :  { %v1918_v59 = vpop.permute.xlu1 %1917 }
 0xb35   :  { %v1812_v42 = vpop.f32.mrb[16].mxu1 }
 0xb36   :  { %v1814_v47 = vpop.f32.mrb[17].mxu1  ;;  %v1835_v39 = vsub.f32 %v3517_v19, %v1812_v42 }
 0xb37   :  { %v1836_v8 = vsub.f32 %v3515_v16, %v1814_v47  ;;  %v1998_v47 = vadd.f32 %v3547_v43, %v1918_v59 }
 0xb39   :  { %v1818_v48 = vpop.f32.mrb[18].mxu1 }
 0xb3a   :  { %v1820_v51 = vpop.f32.mrb[19].mxu1  ;;  %v1837_v60 = vsub.f32 %v3523_v23, %v1818_v48 }
 0xb3b   :  { %v1838_v6 = vsub.f32 %v3521_v22, %v1820_v51  ;;  %v2000_v51 = vadd.f32 %v3549_v12, %v1918_v59 }
 0xb3d   :  { %v1824_v63 = vpop.f32.mrb[20].mxu1 }
 0xb3e   :  { %v1839_v36 = vmul.f32 %v1835_v39, %v1824_v63  ;;  %v1826_v62 = vpop.f32.mrb[21].mxu1 }
 0xb3f   :  { %v1840_v9 = vmul.f32 %v1836_v8, %v1826_v62 }
 0xb40   :  { %v1853_v4 = vmul.f32 %v1846_v5, %v1839_v36  ;;  %v1923_v36 = vpop.permute.xlu0 %1922 }
 0xb41   :  { %v1854_v10 = vmul.f32 %v1846_v5, %v1840_v9  ;;  %v1830_v11 = vpop.f32.mrb[22].mxu1 }
 0xb42   :  { %v1867_v7 = vadd.f32 %v1860_v0, %v1853_v4  ;;  %v1841_v45 = vmul.f32 %v1837_v60, %v1830_v11  ;;  %v1832_v20 = vpop.f32.mrb[23].mxu1  ;;  %v2004_v60 = vadd.f32 %v3551_v49, %v1923_v36 }
 0xb43   :  { %v1868_v21 = vadd.f32 %v1860_v0, %v1854_v10  ;;  %v1842_v19 = vmul.f32 %v1838_v6, %v1832_v20  ;;  %v2006_v0 = vadd.f32 %v3553_v50, %v1923_v36 }
 0xb44   :  { %v1871_v14 = vmin.f32 %v1867_v7, 20.0  ;;  %v1855_v16 = vmul.f32 %v1851_v1, %v1841_v45 }
 0xb45   :  { %v1872_v24 = vmin.f32 %v1868_v21, 20.0  ;;  %v1856_v28 = vmul.f32 %v1851_v1, %v1842_v19 }
 0xb46   :  { %v1875_v29 = vmul.f32 1.442695, %v1871_v14  ;;  %v1869_v46 = vadd.f32 %v1865_v15, %v1855_v16 }
 0xb47   :  { %v1877_v33 = vmul.f32 1.442695, %v1872_v24  ;;  %v1870_v23 = vadd.f32 %v1865_v15, %v1856_v28 }
 0xb48   :  { %2450 = vpow2.f32 %v1875_v29  ;;  %v1873_v34 = vmin.f32 %v1869_v46, 20.0 }
 0xb49   :  { %2452 = vpow2.f32 %v1877_v33  ;;  %v1874_v22 = vmin.f32 %v1870_v23, 20.0 }
 0xb4a   :  { %v1879_v40 = vmul.f32 1.442695, %v1873_v34 }
 0xb4b   :  { %v1881_v41 = vmul.f32 1.442695, %v1874_v22 }
 0xb4c   :  { %2454 = vpow2.f32 %v1879_v40 }
 0xb4d   :  { %2456 = vpow2.f32 %v1881_v41 }
 0xb52   :  { %v2451_v52 = vpop.eup %2450 }
 0xb53   :  { %v2453_v55 = vpop.eup %2452  ;;  %v1883_v56 = vadd.f32 1.0, %v2451_v52 }
 0xb54   :  { %v1884_v57 = vadd.f32 1.0, %v2453_v55 }
 0xb55   :  { %v1887_v13 = vmul.f32 %v1883_v56, %v1883_v56 }
 0xb56   :  { %v2455_v17 = vpop.eup %2454  ;;  %v1888_v18 = vmul.f32 %v1884_v57, %v1884_v57 }
 0xb57   :  { %v2457_v25 = vpop.eup %2456  ;;  %v1899_v54 = vadd.f32 1.0, %v1887_v13  ;;  %v1885_v26 = vadd.f32 1.0, %v2455_v17  ;;  %v2091_v44 = vadd.f32 -1.0, %v1887_v13 }
 0xb58   :  { %v1900_v31 = vadd.f32 1.0, %v1888_v18  ;;  %v1886_v32 = vadd.f32 1.0, %v2457_v25  ;;  %v2092_v53 = vadd.f32 -1.0, %v1888_v18 }
 0xb59   :  { %2458 = vrcp.f32 %v1899_v54  ;;  %v1889_v37 = vmul.f32 %v1885_v26, %v1885_v26  ;;  %v1895_v27 = vmul.f32 %v2091_v44, %v1867_v7 }
 0xb5a   :  { %2460 = vrcp.f32 %v1900_v31  ;;  %v1890_v3 = vmul.f32 %v1886_v32, %v1886_v32  ;;  %v1896_v35 = vmul.f32 %v2092_v53, %v1868_v21 }
 0xb5b   :  { %v1901_v38 = vadd.f32 1.0, %v1889_v37  ;;  %v2093_v30 = vadd.f32 -1.0, %v1889_v37 }
 0xb5c   :  { %v1902_v2 = vadd.f32 1.0, %v1890_v3  ;;  %v2094_v61 = vadd.f32 -1.0, %v1890_v3 }
 0xb5d   :  { %2462 = vrcp.f32 %v1901_v38  ;;  %v1897_v39 = vmul.f32 %v2093_v30, %v1869_v46 }
 0xb5e   :  { %2464 = vrcp.f32 %v1902_v2  ;;  %v1898_v62 = vmul.f32 %v2094_v61, %v1870_v23 }
 0xb63   :  { %v2459_v58 = vpop.eup %2458 }
 0xb64   :  { %v2461_v42 = vpop.eup %2460  ;;  %v1904_v48 = vmul.f32 %v2459_v58, %v1895_v27 }
 0xb65   :  { %v1906_v5 = vmul.f32 %v2461_v42, %v1896_v35 }
 0xb66   :  { %v2008_v8 = vadd.f32 %v1998_v47, %v1904_v48 }
 0xb67   :  { %v2463_v63 = vpop.eup %2462  ;;  %v2009_v1 = vadd.f32 %v2000_v51, %v1906_v5 }
 0xb68   :  { %v2465_v9 = vpop.eup %2464  ;;  %v1908_v4 = vmul.f32 %v2463_v63, %v1897_v39  ;;  %2012 = vst [vmem:[#allocation29] sm:$0xff] %v2008_v8 }
 0xb69   :  { %v1910_v43 = vmul.f32 %v2465_v9, %v1898_v62  ;;  %2013 = vst [vmem:[#allocation29 + $0x8] sm:$0xff] %v2009_v1 }
 0xb6a   :  { %v2010_v6 = vadd.f32 %v2004_v60, %v1908_v4 }
 0xb6b   :  { %v2011_v12 = vadd.f32 %v2006_v0, %v1910_v43 }
 0xb6c   :  { %2014 = vst [vmem:[#allocation29 + $0x10] sm:$0xff] %v2010_v6 }
 0xb6d   :  { %2015 = vst [vmem:[#allocation29 + $0x18] sm:$0xff] %v2011_v12 }
 0xb6e   :  { %2851 = shalt.err (!%p2848_p0)
}
 0xb6f   :  { %s3626_s0 = sld [smem:[#allocation42_spill]] }
 0xb75   :  { %s2852_s18 = scalar_lea.hbm %s3626_s0, 512 }
 0xb76   :  { %p2853_p1 = scmp.ne.s32.totalorder %s3626_s0, %s2852_s18  ;;  %p2856_p2 = scmp.lt.u32.totalorder %s2852_s18, %s3626_s0 }
 0xb78   :  { %p2858_p3 = pnand %p2856_p2, %p2853_p1 }
 0xb7a   :  { %2861 = shalt.err (!%p2858_p3)
}
 0xb7b   :  { %2027 = dma.vmem_to_hbm [thread:$0]  %s2022_s3, 512, %s3626_s0, [#allocation4], %s3625_s20, %s3625_s20, %s3624_s5  }
 0xb7c   :  { %2880 = dma.done.wait [#allocation4], 512  }
 0xb7d   :  { %2881 = vsyncadd [#allocation4], 4294966784 }
 0xb7e   :  { %2031 = vsyncpa [#allocation3], 1 }
 0xb7f   :  { %2032 = vsyncpa [#allocation6], 1 }
 0xb80   :  { %2033 = vsyncpa [#allocation9], 1 }
 0xb81   :  { %2034 = vsyncpa [#allocation12], 1 }
 0xb82   :  { %2035 = vsyncpa [#allocation15], 1 }
 0xb83   :  { %2036 = vsyncpa [#allocation18], 1 }
 0xb84   :  { %2037 = vsyncpa [#allocation21], 1 }
 0xb85   :  { %2038 = vsyncpa [#allocation24], 1 }
 0xb86   :  { %2039 = vsyncpa [#allocation27], 1 }
 0xb87   :  { %2040 = vsyncpa [#allocation4], 1 }

</bundles_post_ra>
